<compile_context>
chip_gen: v7x
topology: tpu7x:2x2x1
jax: 0.10.0
libtpu: 0.0.40
codegen_flags: <defaults>
</compile_context>

<pallas_src>
import functools

import jax
import jax.numpy as jnp
import numpy as np
from jax import lax
from jax.experimental import pallas as pl
from jax.experimental.pallas import tpu as pltpu  # noqa: F401  (TPU backend assumed)


# ----------------------------- Pallas kernel --------------------------------
def _speller_decode_kernel(
    init_word_ref, k_ref, v_ref,
    wih_ref, whh_ref, b_ref,                    # under LSTM, gates fused: [C,4H],[H,4H],[1,4H]
    wq_ref, wo_ref,                             # fused q projection [H,D]; output proj [D,D]
    wuih_h_ref, wuih_c_ref, wuhh_ref, bu_ref,   # upper LSTM, gates fused: [H,4S],[D,4S],[S,4S],[1,4S]
    wc_ref, bc_ref,                             # character distribution [S,C],[1,C]
    pred_ref, attn_ref,                         # outputs: [steps,B,C], [steps*nh,B,U]
    *, steps, n_heads, head_dim, rnn_hidden_dim, speller_hidden_dim):
  B, _ = init_word_ref.shape
  H = rnn_hidden_dim
  S = speller_hidden_dim
  scale = 1.0 / float(np.sqrt(head_dim))

  # Everything except the recurrent state is step-invariant: load into VMEM values once.
  k_all = k_ref[...]                            # [nh, B, U, dh]  (hoisted K projection)
  v_all = v_ref[...]                            # [nh, B, U, dh]  (hoisted V projection)
  wih = wih_ref[...]; whh = whh_ref[...]; b = b_ref[...]
  wq = wq_ref[...]; wo = wo_ref[...]
  wuih_h = wuih_h_ref[...]; wuih_c = wuih_c_ref[...]
  wuhh = wuhh_ref[...]; bu = bu_ref[...]
  wc = wc_ref[...]; bc = bc_ref[...]

  def softmax_last(x):
    x = x - jnp.max(x, axis=-1, keepdims=True)
    e = jnp.exp(x)
    # exact reciprocal (approx=True would use the EUP but needs looser test tolerances)
    return e * pl.reciprocal(jnp.sum(e, axis=-1, keepdims=True), approx=False)

  def body(step, carry):
    word, h, c, uh, uc = carry

    # ---- under LSTM cell: all four gates (i,f,g,o) from lane-fused [*, 4H] matmuls ----
    g = (jnp.dot(word, wih, preferred_element_type=jnp.float32)
         + jnp.dot(h, whh, preferred_element_type=jnp.float32) + b)
    i_g = jax.nn.sigmoid(g[:, 0 * H:1 * H])
    f_g = jax.nn.sigmoid(g[:, 1 * H:2 * H])
    g_g = jnp.tanh(g[:, 2 * H:3 * H])
    o_g = jax.nn.sigmoid(g[:, 3 * H:4 * H])
    c_new = f_g * c + i_g * g_g
    h_new = o_g * jnp.tanh(c_new)                                   # rnn_output [B, H]

    # ---- multi-head attention over precomputed K/V ----
    q = jnp.dot(h_new, wq, preferred_element_type=jnp.float32)      # [B, D], all heads fused
    ctx_heads = []
    for hh in range(n_heads):                                       # short static head loop
      qh = q[:, None, hh * head_dim:(hh + 1) * head_dim]            # [B, 1, dh]
      sc = jnp.einsum('bqd,bkd->bqk', qh, k_all[hh],
                      preferred_element_type=jnp.float32) * scale   # [B, 1, U] on the MXU
      p = softmax_last(sc)
      ctx_heads.append(jnp.einsum('bqk,bkd->bqd', p, v_all[hh],
                                  preferred_element_type=jnp.float32)[:, 0, :])  # [B, dh]
      attn_ref[step * n_heads + hh] = p[:, 0, :]                    # [B, U] written in place
    ctx = jnp.dot(jnp.concatenate(ctx_heads, axis=-1), wo,
                  preferred_element_type=jnp.float32)               # [B, D]

    # ---- upper LSTM cell over [rnn_output | context]: lane-fused [*, 4S] matmuls ----
    ug = (jnp.dot(h_new, wuih_h, preferred_element_type=jnp.float32)
          + jnp.dot(ctx, wuih_c, preferred_element_type=jnp.float32)
          + jnp.dot(uh, wuhh, preferred_element_type=jnp.float32) + bu)
    ui = jax.nn.sigmoid(ug[:, 0 * S:1 * S])
    uf = jax.nn.sigmoid(ug[:, 1 * S:2 * S])
    ugg = jnp.tanh(ug[:, 2 * S:3 * S])
    uo = jax.nn.sigmoid(ug[:, 3 * S:4 * S])
    uc_new = uf * uc + ui * ugg
    uh_new = uo * jnp.tanh(uc_new)                                  # after_rnn [B, S]

    # ---- character distribution + softmax ----
    pred = softmax_last(jnp.dot(uh_new, wc, preferred_element_type=jnp.float32) + bc)
    pred_ref[step] = pred

    # inference branch: feed the raw prediction back as the next word
    return (pred, h_new, c_new, uh_new, uc_new)

  zeros = lambda n: jnp.zeros((B, n), jnp.float32)
  lax.fori_loop(0, steps, body,
                (init_word_ref[...], zeros(H), zeros(H), zeros(S), zeros(S)),
                unroll=True)


# ----------------------------- wrapper ---------------------------------------
def speller2_decode(params, listener_feature, *, max_label_len, output_class_dim,
                    rnn_hidden_dim, dimension, n_heads):
  B, U, L = listener_feature.shape
  C = output_class_dim
  H = rnn_hidden_dim
  D = dimension
  S = D + H
  dh = D // n_heads
  steps = max_label_len - 1

  init_word = jnp.zeros((B, C), jnp.float32).at[:, 0].set(1.0)

  # K/V are step-invariant: one big projection each here, per-head layout for the kernel.
  def project(w):
    x = (listener_feature.reshape(B * U, L) @ w).reshape(B, U, n_heads, dh)
    return x.transpose(2, 0, 1, 3)                                  # [nh, B, U, dh]
  k = project(params['wk'])
  v = project(params['wv'])

  inputs = (init_word, k, v,
            params['wih'], params['whh'], params['b'],
            params['wq'], params['wo'],
            params['wuih_h'], params['wuih_c'], params['wuhh'], params['bu'],
            params['wc'], params['bc'])

  kernel = functools.partial(
      _speller_decode_kernel, steps=steps, n_heads=n_heads, head_dim=dh,
      rnn_hidden_dim=H, speller_hidden_dim=S)

  # Single pallas_call, no grid: whole arrays live in VMEM, the decode recurrence runs
  # as an in-kernel loop, and each output is written back with a single DMA.
  preds, attn_flat = pl.pallas_call(
      kernel,
      out_shape=(jax.ShapeDtypeStruct((steps, B, C), jnp.float32),
                 jax.ShapeDtypeStruct((steps * n_heads, B, U), jnp.float32)),
  )(*inputs)

  # torch.stack(pred_lst).transpose(1, 0) -> [B, steps, C]; attention as [steps, B, nh, U]
  attns = attn_flat.reshape(steps, n_heads, B, U).transpose(0, 2, 1, 3)
  return preds.transpose(1, 0, 2), attns


# ----------------------------- plain-JAX glue & reference --------------------
def listener_standin(params, listener_tensor):
  # Deterministic stand-in for the (external) pyramidal-LSTM Listener:
  # 8x time reduction via frame stacking + tanh projection to listener_hidden_dim.
  B, T, F = listener_tensor.shape
  x = listener_tensor.reshape(B, T // 8, 8 * F)
  return jnp.tanh(x @ params['w_list'] + params['b_list'])          # [B, U, L]


def reference_forward(params, listener_tensor, *, max_label_len, output_class_dim,
                      rnn_hidden_dim, dimension, n_heads):
  lf = listener_standin(params, listener_tensor)
  B, U, L = lf.shape
  C = output_class_dim
  H = rnn_hidden_dim
  D = dimension
  S = D + H
  dh = D // n_heads
  k = (lf.reshape(B * U, L) @ params['wk']).reshape(B, U, n_heads, dh)
  v = (lf.reshape(B * U, L) @ params['wv']).reshape(B, U, n_heads, dh)
  word = jnp.zeros((B, C), jnp.float32).at[:, 0].set(1.0)
  h = jnp.zeros((B, H)); c = jnp.zeros((B, H))
  uh = jnp.zeros((B, S)); uc = jnp.zeros((B, S))
  preds, attns = [], []
  for _ in range(max_label_len - 1):
    g = word @ params['wih'] + h @ params['whh'] + params['b']
    i_g, f_g = jax.nn.sigmoid(g[:, :H]), jax.nn.sigmoid(g[:, H:2 * H])
    g_g, o_g = jnp.tanh(g[:, 2 * H:3 * H]), jax.nn.sigmoid(g[:, 3 * H:])
    c = f_g * c + i_g * g_g
    h = o_g * jnp.tanh(c)
    q = (h @ params['wq']).reshape(B, n_heads, dh)
    sc = jnp.einsum('bhd,buhd->bhu', q, k) / np.sqrt(dh)
    p = jax.nn.softmax(sc, -1)                                      # [B, nh, U]
    ctx = jnp.einsum('bhu,buhd->bhd', p, v).reshape(B, D) @ params['wo']
    ug = (h @ params['wuih_h'] + ctx @ params['wuih_c'] + uh @ params['wuhh'] + params['bu'])
    ui, uf = jax.nn.sigmoid(ug[:, :S]), jax.nn.sigmoid(ug[:, S:2 * S])
    ugg, uo = jnp.tanh(ug[:, 2 * S:3 * S]), jax.nn.sigmoid(ug[:, 3 * S:])
    uc = uf * uc + ui * ugg
    uh = uo * jnp.tanh(uc)
    pred = jax.nn.softmax(uh @ params['wc'] + params['bc'], -1)
    preds.append(pred)
    attns.append(p)
    word = pred
  return jnp.stack(preds).transpose(1, 0, 2), jnp.stack(attns)


def make_params(key, *, feature_dim, listener_hidden_dim, output_class_dim,
                rnn_hidden_dim, dimension, n_heads):
  C = output_class_dim
  H = rnn_hidden_dim
  L = listener_hidden_dim
  D = dimension
  S = D + H
  ks = jax.random.split(key, 16)
  n = lambda k, s: (0.1 * jax.random.normal(k, s)).astype(jnp.float32)
  return {
      'w_list': n(ks[0], (8 * feature_dim, L)), 'b_list': n(ks[1], (1, L)),
      # under LSTM cell, gate order (i, f, g, o) fused along the last axis
      'wih': n(ks[2], (C, 4 * H)), 'whh': n(ks[3], (H, 4 * H)), 'b': n(ks[4], (1, 4 * H)),
      # MHA: head h occupies columns [h*dh, (h+1)*dh)
      'wq': n(ks[5], (H, D)), 'wk': n(ks[6], (L, D)), 'wv': n(ks[7], (L, D)),
      'wo': n(ks[8], (D, D)),
      # upper LSTM cell over [rnn_output | context]
      'wuih_h': n(ks[9], (H, 4 * S)), 'wuih_c': n(ks[10], (D, 4 * S)),
      'wuhh': n(ks[11], (S, 4 * S)), 'bu': n(ks[12], (1, 4 * S)),
      'wc': n(ks[13], (S, C)), 'bc': n(ks[14], (1, C)),
  }


if __name__ == "__main__":
  # small shapes consistent with the module
  B, T, F = 2, 32, 40
  output_class_dim = 16
  rnn_hidden_dim = 32
  listener_hidden_dim = 32
  dimension = 32
  n_heads = 4
  max_label_len = 5

  key = jax.random.PRNGKey(0)
  k_params, k_x = jax.random.split(key)
  params = make_params(k_params, feature_dim=F, listener_hidden_dim=listener_hidden_dim,
                       output_class_dim=output_class_dim, rnn_hidden_dim=rnn_hidden_dim,
                       dimension=dimension, n_heads=n_heads)
  listener_tensor = jax.random.normal(k_x, (B, T, F), jnp.float32)

  lf = listener_standin(params, listener_tensor)
  preds, attns = speller2_decode(
      params, lf, max_label_len=max_label_len, output_class_dim=output_class_dim,
      rnn_hidden_dim=rnn_hidden_dim, dimension=dimension, n_heads=n_heads)
  preds = jax.block_until_ready(preds)
  attns = jax.block_until_ready(attns)

  ref_preds, ref_attns = reference_forward(
      params, listener_tensor, max_label_len=max_label_len,
      output_class_dim=output_class_dim, rnn_hidden_dim=rnn_hidden_dim,
      dimension=dimension, n_heads=n_heads)
  np.testing.assert_allclose(np.asarray(preds), np.asarray(ref_preds), rtol=1e-3, atol=1e-4)
  np.testing.assert_allclose(np.asarray(attns), np.asarray(ref_attns), rtol=1e-3, atol=1e-4)

  print("KERNEL_OK")
</pallas_src>

<mosaic_0001>
module attributes {stable_mosaic.version = 11 : i64} {
  func.func @_speller_decode_kernel(%arg0: memref<2x16xf32, #tpu.memory_space<vmem>>, %arg1: memref<4x2x4x8xf32, #tpu.memory_space<vmem>>, %arg2: memref<4x2x4x8xf32, #tpu.memory_space<vmem>>, %arg3: memref<16x128xf32, #tpu.memory_space<vmem>>, %arg4: memref<32x128xf32, #tpu.memory_space<vmem>>, %arg5: memref<1x128xf32, #tpu.memory_space<vmem>>, %arg6: memref<32x32xf32, #tpu.memory_space<vmem>>, %arg7: memref<32x32xf32, #tpu.memory_space<vmem>>, %arg8: memref<32x256xf32, #tpu.memory_space<vmem>>, %arg9: memref<32x256xf32, #tpu.memory_space<vmem>>, %arg10: memref<64x256xf32, #tpu.memory_space<vmem>>, %arg11: memref<1x256xf32, #tpu.memory_space<vmem>>, %arg12: memref<64x16xf32, #tpu.memory_space<vmem>>, %arg13: memref<1x16xf32, #tpu.memory_space<vmem>>, %arg14: memref<4x2x16xf32, #tpu.memory_space<vmem>>, %arg15: memref<16x2x4xf32, #tpu.memory_space<vmem>>) attributes {dimension_semantics = [], scalar_prefetch = 0 : i64, scratch_operands = 0 : i64, tpu.core_type = #tpu.core_type<tc>} {
    %c0 = arith.constant 0 : index
    %c0_0 = arith.constant 0 : index
    %c0_1 = arith.constant 0 : index
    %c0_2 = arith.constant 0 : index
    %0 = vector.load %arg1[%c0, %c0_0, %c0_1, %c0_2] : memref<4x2x4x8xf32, #tpu.memory_space<vmem>>, vector<4x2x4x8xf32>
    %c0_3 = arith.constant 0 : index
    %c0_4 = arith.constant 0 : index
    %c0_5 = arith.constant 0 : index
    %c0_6 = arith.constant 0 : index
    %1 = vector.load %arg2[%c0_3, %c0_4, %c0_5, %c0_6] : memref<4x2x4x8xf32, #tpu.memory_space<vmem>>, vector<4x2x4x8xf32>
    %c0_7 = arith.constant 0 : index
    %c0_8 = arith.constant 0 : index
    %2 = vector.load %arg3[%c0_7, %c0_8] : memref<16x128xf32, #tpu.memory_space<vmem>>, vector<16x128xf32>
    %c0_9 = arith.constant 0 : index
    %c0_10 = arith.constant 0 : index
    %3 = vector.load %arg4[%c0_9, %c0_10] : memref<32x128xf32, #tpu.memory_space<vmem>>, vector<32x128xf32>
    %c0_11 = arith.constant 0 : index
    %c0_12 = arith.constant 0 : index
    %4 = vector.load %arg5[%c0_11, %c0_12] : memref<1x128xf32, #tpu.memory_space<vmem>>, vector<1x128xf32>
    %c0_13 = arith.constant 0 : index
    %c0_14 = arith.constant 0 : index
    %5 = vector.load %arg6[%c0_13, %c0_14] : memref<32x32xf32, #tpu.memory_space<vmem>>, vector<32x32xf32>
    %c0_15 = arith.constant 0 : index
    %c0_16 = arith.constant 0 : index
    %6 = vector.load %arg7[%c0_15, %c0_16] : memref<32x32xf32, #tpu.memory_space<vmem>>, vector<32x32xf32>
    %c0_17 = arith.constant 0 : index
    %c0_18 = arith.constant 0 : index
    %7 = vector.load %arg8[%c0_17, %c0_18] : memref<32x256xf32, #tpu.memory_space<vmem>>, vector<32x256xf32>
    %c0_19 = arith.constant 0 : index
    %c0_20 = arith.constant 0 : index
    %8 = vector.load %arg9[%c0_19, %c0_20] : memref<32x256xf32, #tpu.memory_space<vmem>>, vector<32x256xf32>
    %c0_21 = arith.constant 0 : index
    %c0_22 = arith.constant 0 : index
    %9 = vector.load %arg10[%c0_21, %c0_22] : memref<64x256xf32, #tpu.memory_space<vmem>>, vector<64x256xf32>
    %c0_23 = arith.constant 0 : index
    %c0_24 = arith.constant 0 : index
    %10 = vector.load %arg11[%c0_23, %c0_24] : memref<1x256xf32, #tpu.memory_space<vmem>>, vector<1x256xf32>
    %c0_25 = arith.constant 0 : index
    %c0_26 = arith.constant 0 : index
    %11 = vector.load %arg12[%c0_25, %c0_26] : memref<64x16xf32, #tpu.memory_space<vmem>>, vector<64x16xf32>
    %c0_27 = arith.constant 0 : index
    %c0_28 = arith.constant 0 : index
    %12 = vector.load %arg13[%c0_27, %c0_28] : memref<1x16xf32, #tpu.memory_space<vmem>>, vector<1x16xf32>
    %c0_29 = arith.constant 0 : index
    %c0_30 = arith.constant 0 : index
    %13 = vector.load %arg0[%c0_29, %c0_30] : memref<2x16xf32, #tpu.memory_space<vmem>>, vector<2x16xf32>
    %cst = arith.constant 0.000000e+00 : f32
    %14 = vector.broadcast %cst : f32 to vector<2x32xf32>
    %cst_31 = arith.constant 0.000000e+00 : f32
    %15 = vector.broadcast %cst_31 : f32 to vector<2x32xf32>
    %cst_32 = arith.constant 0.000000e+00 : f32
    %16 = vector.broadcast %cst_32 : f32 to vector<2x64xf32>
    %cst_33 = arith.constant 0.000000e+00 : f32
    %17 = vector.broadcast %cst_33 : f32 to vector<2x64xf32>
    %c0_i32 = arith.constant 0 : i32
    %cst_34 = arith.constant dense<0.000000e+00> : vector<2x128xf32>
    %18 = tpu.matmul %13, %2, %cst_34 {dimension_numbers = #tpu.dot_dimension_numbers<[1], [0], [0], [1], [0, 0, 1, 1], [], []>} : vector<2x16xf32>, vector<16x128xf32>, vector<2x128xf32> -> vector<2x128xf32>
    %cst_35 = arith.constant dense<0.000000e+00> : vector<2x128xf32>
    %19 = tpu.matmul %14, %3, %cst_35 {dimension_numbers = #tpu.dot_dimension_numbers<[1], [0], [0], [1], [0, 0, 1, 1], [], []>} : vector<2x32xf32>, vector<32x128xf32>, vector<2x128xf32> -> vector<2x128xf32>
    %20 = arith.addf %18, %19 : vector<2x128xf32>
    %21 = vector.broadcast %4 : vector<1x128xf32> to vector<2x128xf32>
    %22 = arith.addf %20, %21 : vector<2x128xf32>
    %23 = vector.extract_strided_slice %22 {offsets = [0, 0], sizes = [2, 32], strides = [1, 1]} : vector<2x128xf32> to vector<2x32xf32>
    %24 = arith.negf %23 : vector<2x32xf32>
    %25 = math.exp %24 : vector<2x32xf32>
    %cst_36 = arith.constant 1.000000e+00 : f32
    %26 = vector.broadcast %cst_36 : f32 to vector<2x32xf32>
    %27 = arith.addf %26, %25 : vector<2x32xf32>
    %28 = arith.divf %26, %27 : vector<2x32xf32>
    %29 = vector.extract_strided_slice %22 {offsets = [0, 32], sizes = [2, 32], strides = [1, 1]} : vector<2x128xf32> to vector<2x32xf32>
    %30 = arith.negf %29 : vector<2x32xf32>
    %31 = math.exp %30 : vector<2x32xf32>
    %cst_37 = arith.constant 1.000000e+00 : f32
    %32 = vector.broadcast %cst_37 : f32 to vector<2x32xf32>
    %33 = arith.addf %32, %31 : vector<2x32xf32>
    %34 = arith.divf %32, %33 : vector<2x32xf32>
    %35 = vector.extract_strided_slice %22 {offsets = [0, 64], sizes = [2, 32], strides = [1, 1]} : vector<2x128xf32> to vector<2x32xf32>
    %36 = math.tanh %35 : vector<2x32xf32>
    %37 = vector.extract_strided_slice %22 {offsets = [0, 96], sizes = [2, 32], strides = [1, 1]} : vector<2x128xf32> to vector<2x32xf32>
    %38 = arith.negf %37 : vector<2x32xf32>
    %39 = math.exp %38 : vector<2x32xf32>
    %cst_38 = arith.constant 1.000000e+00 : f32
    %40 = vector.broadcast %cst_38 : f32 to vector<2x32xf32>
    %41 = arith.addf %40, %39 : vector<2x32xf32>
    %42 = arith.divf %40, %41 : vector<2x32xf32>
    %43 = arith.mulf %34, %15 : vector<2x32xf32>
    %44 = arith.mulf %28, %36 : vector<2x32xf32>
    %45 = arith.addf %43, %44 : vector<2x32xf32>
    %46 = math.tanh %45 : vector<2x32xf32>
    %47 = arith.mulf %42, %46 : vector<2x32xf32>
    %cst_39 = arith.constant dense<0.000000e+00> : vector<2x32xf32>
    %48 = tpu.matmul %47, %5, %cst_39 {dimension_numbers = #tpu.dot_dimension_numbers<[1], [0], [0], [1], [0, 0, 1, 1], [], []>} : vector<2x32xf32>, vector<32x32xf32>, vector<2x32xf32> -> vector<2x32xf32>
    %49 = vector.extract_strided_slice %48 {offsets = [0, 0], sizes = [2, 8], strides = [1, 1]} : vector<2x32xf32> to vector<2x8xf32>
    %50 = vector.shape_cast %49 : vector<2x8xf32> to vector<2x1x8xf32>
    %51 = vector.extract_strided_slice %0 {offsets = [0, 0, 0, 0], sizes = [1, 2, 4, 8], strides = [1, 1, 1, 1]} : vector<4x2x4x8xf32> to vector<1x2x4x8xf32>
    %52 = vector.shape_cast %51 : vector<1x2x4x8xf32> to vector<2x4x8xf32>
    "tpu.trace_start"() <{level = 10 : i32, message = "bqd,bkd->bqk"}> : () -> ()
    %cst_40 = arith.constant dense<0.000000e+00> : vector<2x1x4xf32>
    %53 = tpu.matmul %50, %52, %cst_40 {dimension_numbers = #tpu.dot_dimension_numbers<[2], [2], [1], [1], [0, 0, 0, 1, 1, 1], [0], [0]>} : vector<2x1x8xf32>, vector<2x4x8xf32>, vector<2x1x4xf32> -> vector<2x1x4xf32>
    "tpu.trace_stop"() : () -> ()
    %cst_41 = arith.constant 0.353553385 : f32
    %54 = vector.broadcast %cst_41 : f32 to vector<2x1x4xf32>
    %55 = arith.mulf %53, %54 : vector<2x1x4xf32>
    %cst_42 = arith.constant dense<0xFF800000> : vector<2x1xf32>
    %56 = vector.multi_reduction <maximumf>, %55, %cst_42 [2] : vector<2x1x4xf32> to vector<2x1xf32>
    %57 = vector.shape_cast %56 : vector<2x1xf32> to vector<2x1x1xf32>
    %58 = vector.broadcast %57 : vector<2x1x1xf32> to vector<2x1x4xf32>
    %59 = arith.subf %55, %58 : vector<2x1x4xf32>
    %60 = math.exp %59 : vector<2x1x4xf32>
    %cst_43 = arith.constant dense<0.000000e+00> : vector<2x1xf32>
    %61 = vector.multi_reduction <add>, %60, %cst_43 [2] : vector<2x1x4xf32> to vector<2x1xf32>
    %62 = vector.shape_cast %61 : vector<2x1xf32> to vector<2x1x1xf32>
    %63 = tpu.reciprocal %62 : vector<2x1x1xf32> -> vector<2x1x1xf32>
    %64 = vector.broadcast %63 : vector<2x1x1xf32> to vector<2x1x4xf32>
    %65 = arith.mulf %60, %64 : vector<2x1x4xf32>
    %66 = vector.extract_strided_slice %1 {offsets = [0, 0, 0, 0], sizes = [1, 2, 4, 8], strides = [1, 1, 1, 1]} : vector<4x2x4x8xf32> to vector<1x2x4x8xf32>
    %67 = vector.shape_cast %66 : vector<1x2x4x8xf32> to vector<2x4x8xf32>
    "tpu.trace_start"() <{level = 10 : i32, message = "bqk,bkd->bqd"}> : () -> ()
    %cst_44 = arith.constant dense<0.000000e+00> : vector<2x1x8xf32>
    %68 = tpu.matmul %65, %67, %cst_44 {dimension_numbers = #tpu.dot_dimension_numbers<[2], [1], [1], [2], [0, 0, 0, 1, 1, 2], [0], [0]>} : vector<2x1x4xf32>, vector<2x4x8xf32>, vector<2x1x8xf32> -> vector<2x1x8xf32>
    "tpu.trace_stop"() : () -> ()
    %69 = vector.shape_cast %68 : vector<2x1x8xf32> to vector<2x8xf32>
    %70 = vector.shape_cast %65 : vector<2x1x4xf32> to vector<2x4xf32>
    %c4_i32 = arith.constant 4 : i32
    %71 = arith.muli %c0_i32, %c4_i32 : i32
    %c0_i32_45 = arith.constant 0 : i32
    %72 = arith.addi %71, %c0_i32_45 : i32
    %73 = arith.index_cast %72 : i32 to index
    %c0_46 = arith.constant 0 : index
    %c0_47 = arith.constant 0 : index
    %74 = vector.load %arg15[%73, %c0_46, %c0_47] : memref<16x2x4xf32, #tpu.memory_space<vmem>>, vector<1x2x4xf32>
    %75 = vector.shape_cast %74 : vector<1x2x4xf32> to vector<2x4xf32>
    %76 = vector.shape_cast %70 : vector<2x4xf32> to vector<1x2x4xf32>
    tpu.vector_store %arg15[%73, %c0_46, %c0_47], %76 {strides = array<i32>} : memref<16x2x4xf32, #tpu.memory_space<vmem>>, vector<1x2x4xf32>,
    %77 = vector.extract_strided_slice %48 {offsets = [0, 8], sizes = [2, 8], strides = [1, 1]} : vector<2x32xf32> to vector<2x8xf32>
    %78 = vector.shape_cast %77 : vector<2x8xf32> to vector<2x1x8xf32>
    %79 = vector.extract_strided_slice %0 {offsets = [1, 0, 0, 0], sizes = [1, 2, 4, 8], strides = [1, 1, 1, 1]} : vector<4x2x4x8xf32> to vector<1x2x4x8xf32>
    %80 = vector.shape_cast %79 : vector<1x2x4x8xf32> to vector<2x4x8xf32>
    "tpu.trace_start"() <{level = 10 : i32, message = "bqd,bkd->bqk"}> : () -> ()
    %cst_48 = arith.constant dense<0.000000e+00> : vector<2x1x4xf32>
    %81 = tpu.matmul %78, %80, %cst_48 {dimension_numbers = #tpu.dot_dimension_numbers<[2], [2], [1], [1], [0, 0, 0, 1, 1, 1], [0], [0]>} : vector<2x1x8xf32>, vector<2x4x8xf32>, vector<2x1x4xf32> -> vector<2x1x4xf32>
    "tpu.trace_stop"() : () -> ()
    %cst_49 = arith.constant 0.353553385 : f32
    %82 = vector.broadcast %cst_49 : f32 to vector<2x1x4xf32>
    %83 = arith.mulf %81, %82 : vector<2x1x4xf32>
    %cst_50 = arith.constant dense<0xFF800000> : vector<2x1xf32>
    %84 = vector.multi_reduction <maximumf>, %83, %cst_50 [2] : vector<2x1x4xf32> to vector<2x1xf32>
    %85 = vector.shape_cast %84 : vector<2x1xf32> to vector<2x1x1xf32>
    %86 = vector.broadcast %85 : vector<2x1x1xf32> to vector<2x1x4xf32>
    %87 = arith.subf %83, %86 : vector<2x1x4xf32>
    %88 = math.exp %87 : vector<2x1x4xf32>
    %cst_51 = arith.constant dense<0.000000e+00> : vector<2x1xf32>
    %89 = vector.multi_reduction <add>, %88, %cst_51 [2] : vector<2x1x4xf32> to vector<2x1xf32>
    %90 = vector.shape_cast %89 : vector<2x1xf32> to vector<2x1x1xf32>
    %91 = tpu.reciprocal %90 : vector<2x1x1xf32> -> vector<2x1x1xf32>
    %92 = vector.broadcast %91 : vector<2x1x1xf32> to vector<2x1x4xf32>
    %93 = arith.mulf %88, %92 : vector<2x1x4xf32>
    %94 = vector.extract_strided_slice %1 {offsets = [1, 0, 0, 0], sizes = [1, 2, 4, 8], strides = [1, 1, 1, 1]} : vector<4x2x4x8xf32> to vector<1x2x4x8xf32>
    %95 = vector.shape_cast %94 : vector<1x2x4x8xf32> to vector<2x4x8xf32>
    "tpu.trace_start"() <{level = 10 : i32, message = "bqk,bkd->bqd"}> : () -> ()
    %cst_52 = arith.constant dense<0.000000e+00> : vector<2x1x8xf32>
    %96 = tpu.matmul %93, %95, %cst_52 {dimension_numbers = #tpu.dot_dimension_numbers<[2], [1], [1], [2], [0, 0, 0, 1, 1, 2], [0], [0]>} : vector<2x1x4xf32>, vector<2x4x8xf32>, vector<2x1x8xf32> -> vector<2x1x8xf32>
    "tpu.trace_stop"() : () -> ()
    %97 = vector.shape_cast %96 : vector<2x1x8xf32> to vector<2x8xf32>
    %98 = vector.shape_cast %93 : vector<2x1x4xf32> to vector<2x4xf32>
    %c4_i32_53 = arith.constant 4 : i32
    %99 = arith.muli %c0_i32, %c4_i32_53 : i32
    %c1_i32 = arith.constant 1 : i32
    %100 = arith.addi %99, %c1_i32 : i32
    %101 = arith.index_cast %100 : i32 to index
    %c0_54 = arith.constant 0 : index
    %c0_55 = arith.constant 0 : index
    %102 = vector.load %arg15[%101, %c0_54, %c0_55] : memref<16x2x4xf32, #tpu.memory_space<vmem>>, vector<1x2x4xf32>
    %103 = vector.shape_cast %102 : vector<1x2x4xf32> to vector<2x4xf32>
    %104 = vector.shape_cast %98 : vector<2x4xf32> to vector<1x2x4xf32>
    tpu.vector_store %arg15[%101, %c0_54, %c0_55], %104 {strides = array<i32>} : memref<16x2x4xf32, #tpu.memory_space<vmem>>, vector<1x2x4xf32>,
    %105 = vector.extract_strided_slice %48 {offsets = [0, 16], sizes = [2, 8], strides = [1, 1]} : vector<2x32xf32> to vector<2x8xf32>
    %106 = vector.shape_cast %105 : vector<2x8xf32> to vector<2x1x8xf32>
    %107 = vector.extract_strided_slice %0 {offsets = [2, 0, 0, 0], sizes = [1, 2, 4, 8], strides = [1, 1, 1, 1]} : vector<4x2x4x8xf32> to vector<1x2x4x8xf32>
    %108 = vector.shape_cast %107 : vector<1x2x4x8xf32> to vector<2x4x8xf32>
    "tpu.trace_start"() <{level = 10 : i32, message = "bqd,bkd->bqk"}> : () -> ()
    %cst_56 = arith.constant dense<0.000000e+00> : vector<2x1x4xf32>
    %109 = tpu.matmul %106, %108, %cst_56 {dimension_numbers = #tpu.dot_dimension_numbers<[2], [2], [1], [1], [0, 0, 0, 1, 1, 1], [0], [0]>} : vector<2x1x8xf32>, vector<2x4x8xf32>, vector<2x1x4xf32> -> vector<2x1x4xf32>
    "tpu.trace_stop"() : () -> ()
    %cst_57 = arith.constant 0.353553385 : f32
    %110 = vector.broadcast %cst_57 : f32 to vector<2x1x4xf32>
    %111 = arith.mulf %109, %110 : vector<2x1x4xf32>
    %cst_58 = arith.constant dense<0xFF800000> : vector<2x1xf32>
    %112 = vector.multi_reduction <maximumf>, %111, %cst_58 [2] : vector<2x1x4xf32> to vector<2x1xf32>
    %113 = vector.shape_cast %112 : vector<2x1xf32> to vector<2x1x1xf32>
    %114 = vector.broadcast %113 : vector<2x1x1xf32> to vector<2x1x4xf32>
    %115 = arith.subf %111, %114 : vector<2x1x4xf32>
    %116 = math.exp %115 : vector<2x1x4xf32>
    %cst_59 = arith.constant dense<0.000000e+00> : vector<2x1xf32>
    %117 = vector.multi_reduction <add>, %116, %cst_59 [2] : vector<2x1x4xf32> to vector<2x1xf32>
    %118 = vector.shape_cast %117 : vector<2x1xf32> to vector<2x1x1xf32>
    %119 = tpu.reciprocal %118 : vector<2x1x1xf32> -> vector<2x1x1xf32>
    %120 = vector.broadcast %119 : vector<2x1x1xf32> to vector<2x1x4xf32>
    %121 = arith.mulf %116, %120 : vector<2x1x4xf32>
    %122 = vector.extract_strided_slice %1 {offsets = [2, 0, 0, 0], sizes = [1, 2, 4, 8], strides = [1, 1, 1, 1]} : vector<4x2x4x8xf32> to vector<1x2x4x8xf32>
    %123 = vector.shape_cast %122 : vector<1x2x4x8xf32> to vector<2x4x8xf32>
    "tpu.trace_start"() <{level = 10 : i32, message = "bqk,bkd->bqd"}> : () -> ()
    %cst_60 = arith.constant dense<0.000000e+00> : vector<2x1x8xf32>
    %124 = tpu.matmul %121, %123, %cst_60 {dimension_numbers = #tpu.dot_dimension_numbers<[2], [1], [1], [2], [0, 0, 0, 1, 1, 2], [0], [0]>} : vector<2x1x4xf32>, vector<2x4x8xf32>, vector<2x1x8xf32> -> vector<2x1x8xf32>
    "tpu.trace_stop"() : () -> ()
    %125 = vector.shape_cast %124 : vector<2x1x8xf32> to vector<2x8xf32>
    %126 = vector.shape_cast %121 : vector<2x1x4xf32> to vector<2x4xf32>
    %c4_i32_61 = arith.constant 4 : i32
    %127 = arith.muli %c0_i32, %c4_i32_61 : i32
    %c2_i32 = arith.constant 2 : i32
    %128 = arith.addi %127, %c2_i32 : i32
    %129 = arith.index_cast %128 : i32 to index
    %c0_62 = arith.constant 0 : index
    %c0_63 = arith.constant 0 : index
    %130 = vector.load %arg15[%129, %c0_62, %c0_63] : memref<16x2x4xf32, #tpu.memory_space<vmem>>, vector<1x2x4xf32>
    %131 = vector.shape_cast %130 : vector<1x2x4xf32> to vector<2x4xf32>
    %132 = vector.shape_cast %126 : vector<2x4xf32> to vector<1x2x4xf32>
    tpu.vector_store %arg15[%129, %c0_62, %c0_63], %132 {strides = array<i32>} : memref<16x2x4xf32, #tpu.memory_space<vmem>>, vector<1x2x4xf32>,
    %133 = vector.extract_strided_slice %48 {offsets = [0, 24], sizes = [2, 8], strides = [1, 1]} : vector<2x32xf32> to vector<2x8xf32>
    %134 = vector.shape_cast %133 : vector<2x8xf32> to vector<2x1x8xf32>
    %135 = vector.extract_strided_slice %0 {offsets = [3, 0, 0, 0], sizes = [1, 2, 4, 8], strides = [1, 1, 1, 1]} : vector<4x2x4x8xf32> to vector<1x2x4x8xf32>
    %136 = vector.shape_cast %135 : vector<1x2x4x8xf32> to vector<2x4x8xf32>
    "tpu.trace_start"() <{level = 10 : i32, message = "bqd,bkd->bqk"}> : () -> ()
    %cst_64 = arith.constant dense<0.000000e+00> : vector<2x1x4xf32>
    %137 = tpu.matmul %134, %136, %cst_64 {dimension_numbers = #tpu.dot_dimension_numbers<[2], [2], [1], [1], [0, 0, 0, 1, 1, 1], [0], [0]>} : vector<2x1x8xf32>, vector<2x4x8xf32>, vector<2x1x4xf32> -> vector<2x1x4xf32>
    "tpu.trace_stop"() : () -> ()
    %cst_65 = arith.constant 0.353553385 : f32
    %138 = vector.broadcast %cst_65 : f32 to vector<2x1x4xf32>
    %139 = arith.mulf %137, %138 : vector<2x1x4xf32>
    %cst_66 = arith.constant dense<0xFF800000> : vector<2x1xf32>
    %140 = vector.multi_reduction <maximumf>, %139, %cst_66 [2] : vector<2x1x4xf32> to vector<2x1xf32>
    %141 = vector.shape_cast %140 : vector<2x1xf32> to vector<2x1x1xf32>
    %142 = vector.broadcast %141 : vector<2x1x1xf32> to vector<2x1x4xf32>
    %143 = arith.subf %139, %142 : vector<2x1x4xf32>
    %144 = math.exp %143 : vector<2x1x4xf32>
    %cst_67 = arith.constant dense<0.000000e+00> : vector<2x1xf32>
    %145 = vector.multi_reduction <add>, %144, %cst_67 [2] : vector<2x1x4xf32> to vector<2x1xf32>
    %146 = vector.shape_cast %145 : vector<2x1xf32> to vector<2x1x1xf32>
    %147 = tpu.reciprocal %146 : vector<2x1x1xf32> -> vector<2x1x1xf32>
    %148 = vector.broadcast %147 : vector<2x1x1xf32> to vector<2x1x4xf32>
    %149 = arith.mulf %144, %148 : vector<2x1x4xf32>
    %150 = vector.extract_strided_slice %1 {offsets = [3, 0, 0, 0], sizes = [1, 2, 4, 8], strides = [1, 1, 1, 1]} : vector<4x2x4x8xf32> to vector<1x2x4x8xf32>
    %151 = vector.shape_cast %150 : vector<1x2x4x8xf32> to vector<2x4x8xf32>
    "tpu.trace_start"() <{level = 10 : i32, message = "bqk,bkd->bqd"}> : () -> ()
    %cst_68 = arith.constant dense<0.000000e+00> : vector<2x1x8xf32>
    %152 = tpu.matmul %149, %151, %cst_68 {dimension_numbers = #tpu.dot_dimension_numbers<[2], [1], [1], [2], [0, 0, 0, 1, 1, 2], [0], [0]>} : vector<2x1x4xf32>, vector<2x4x8xf32>, vector<2x1x8xf32> -> vector<2x1x8xf32>
    "tpu.trace_stop"() : () -> ()
    %153 = vector.shape_cast %152 : vector<2x1x8xf32> to vector<2x8xf32>
    %154 = vector.shape_cast %149 : vector<2x1x4xf32> to vector<2x4xf32>
    %c4_i32_69 = arith.constant 4 : i32
    %155 = arith.muli %c0_i32, %c4_i32_69 : i32
    %c3_i32 = arith.constant 3 : i32
    %156 = arith.addi %155, %c3_i32 : i32
    %157 = arith.index_cast %156 : i32 to index
    %c0_70 = arith.constant 0 : index
    %c0_71 = arith.constant 0 : index
    %158 = vector.load %arg15[%157, %c0_70, %c0_71] : memref<16x2x4xf32, #tpu.memory_space<vmem>>, vector<1x2x4xf32>
    %159 = vector.shape_cast %158 : vector<1x2x4xf32> to vector<2x4xf32>
    %160 = vector.shape_cast %154 : vector<2x4xf32> to vector<1x2x4xf32>
    tpu.vector_store %arg15[%157, %c0_70, %c0_71], %160 {strides = array<i32>} : memref<16x2x4xf32, #tpu.memory_space<vmem>>, vector<1x2x4xf32>,
    %161 = tpu.concatenate %69, %97, %125, %153 in 1 : vector<2x8xf32>, vector<2x8xf32>, vector<2x8xf32>, vector<2x8xf32> -> vector<2x32xf32>
    %cst_72 = arith.constant dense<0.000000e+00> : vector<2x32xf32>
    %162 = tpu.matmul %161, %6, %cst_72 {dimension_numbers = #tpu.dot_dimension_numbers<[1], [0], [0], [1], [0, 0, 1, 1], [], []>} : vector<2x32xf32>, vector<32x32xf32>, vector<2x32xf32> -> vector<2x32xf32>
    %cst_73 = arith.constant dense<0.000000e+00> : vector<2x256xf32>
    %163 = tpu.matmul %47, %7, %cst_73 {dimension_numbers = #tpu.dot_dimension_numbers<[1], [0], [0], [1], [0, 0, 1, 1], [], []>} : vector<2x32xf32>, vector<32x256xf32>, vector<2x256xf32> -> vector<2x256xf32>
    %cst_74 = arith.constant dense<0.000000e+00> : vector<2x256xf32>
    %164 = tpu.matmul %162, %8, %cst_74 {dimension_numbers = #tpu.dot_dimension_numbers<[1], [0], [0], [1], [0, 0, 1, 1], [], []>} : vector<2x32xf32>, vector<32x256xf32>, vector<2x256xf32> -> vector<2x256xf32>
    %165 = arith.addf %163, %164 : vector<2x256xf32>
    %cst_75 = arith.constant dense<0.000000e+00> : vector<2x256xf32>
    %166 = tpu.matmul %16, %9, %cst_75 {dimension_numbers = #tpu.dot_dimension_numbers<[1], [0], [0], [1], [0, 0, 1, 1], [], []>} : vector<2x64xf32>, vector<64x256xf32>, vector<2x256xf32> -> vector<2x256xf32>
    %167 = arith.addf %165, %166 : vector<2x256xf32>
    %168 = vector.broadcast %10 : vector<1x256xf32> to vector<2x256xf32>
    %169 = arith.addf %167, %168 : vector<2x256xf32>
    %170 = vector.extract_strided_slice %169 {offsets = [0, 0], sizes = [2, 64], strides = [1, 1]} : vector<2x256xf32> to vector<2x64xf32>
    %171 = arith.negf %170 : vector<2x64xf32>
    %172 = math.exp %171 : vector<2x64xf32>
    %cst_76 = arith.constant 1.000000e+00 : f32
    %173 = vector.broadcast %cst_76 : f32 to vector<2x64xf32>
    %174 = arith.addf %173, %172 : vector<2x64xf32>
    %175 = arith.divf %173, %174 : vector<2x64xf32>
    %176 = vector.extract_strided_slice %169 {offsets = [0, 64], sizes = [2, 64], strides = [1, 1]} : vector<2x256xf32> to vector<2x64xf32>
    %177 = arith.negf %176 : vector<2x64xf32>
    %178 = math.exp %177 : vector<2x64xf32>
    %cst_77 = arith.constant 1.000000e+00 : f32
    %179 = vector.broadcast %cst_77 : f32 to vector<2x64xf32>
    %180 = arith.addf %179, %178 : vector<2x64xf32>
    %181 = arith.divf %179, %180 : vector<2x64xf32>
    %182 = vector.extract_strided_slice %169 {offsets = [0, 128], sizes = [2, 64], strides = [1, 1]} : vector<2x256xf32> to vector<2x64xf32>
    %183 = math.tanh %182 : vector<2x64xf32>
    %184 = vector.extract_strided_slice %169 {offsets = [0, 192], sizes = [2, 64], strides = [1, 1]} : vector<2x256xf32> to vector<2x64xf32>
    %185 = arith.negf %184 : vector<2x64xf32>
    %186 = math.exp %185 : vector<2x64xf32>
    %cst_78 = arith.constant 1.000000e+00 : f32
    %187 = vector.broadcast %cst_78 : f32 to vector<2x64xf32>
    %188 = arith.addf %187, %186 : vector<2x64xf32>
    %189 = arith.divf %187, %188 : vector<2x64xf32>
    %190 = arith.mulf %181, %17 : vector<2x64xf32>
    %191 = arith.mulf %175, %183 : vector<2x64xf32>
    %192 = arith.addf %190, %191 : vector<2x64xf32>
    %193 = math.tanh %192 : vector<2x64xf32>
    %194 = arith.mulf %189, %193 : vector<2x64xf32>
    %cst_79 = arith.constant dense<0.000000e+00> : vector<2x16xf32>
    %195 = tpu.matmul %194, %11, %cst_79 {dimension_numbers = #tpu.dot_dimension_numbers<[1], [0], [0], [1], [0, 0, 1, 1], [], []>} : vector<2x64xf32>, vector<64x16xf32>, vector<2x16xf32> -> vector<2x16xf32>
    %196 = vector.broadcast %12 : vector<1x16xf32> to vector<2x16xf32>
    %197 = arith.addf %195, %196 : vector<2x16xf32>
    %cst_80 = arith.constant dense<0xFF800000> : vector<2xf32>
    %198 = vector.multi_reduction <maximumf>, %197, %cst_80 [1] : vector<2x16xf32> to vector<2xf32>
    %199 = vector.shape_cast %198 : vector<2xf32> to vector<2x1xf32>
    %200 = vector.broadcast %199 : vector<2x1xf32> to vector<2x16xf32>
    %201 = arith.subf %197, %200 : vector<2x16xf32>
    %202 = math.exp %201 : vector<2x16xf32>
    %cst_81 = arith.constant dense<0.000000e+00> : vector<2xf32>
    %203 = vector.multi_reduction <add>, %202, %cst_81 [1] : vector<2x16xf32> to vector<2xf32>
    %204 = vector.shape_cast %203 : vector<2xf32> to vector<2x1xf32>
    %205 = tpu.reciprocal %204 : vector<2x1xf32> -> vector<2x1xf32>
    %206 = vector.broadcast %205 : vector<2x1xf32> to vector<2x16xf32>
    %207 = arith.mulf %202, %206 : vector<2x16xf32>
    %208 = arith.index_cast %c0_i32 : i32 to index
    %c0_82 = arith.constant 0 : index
    %c0_83 = arith.constant 0 : index
    %209 = vector.load %arg14[%208, %c0_82, %c0_83] : memref<4x2x16xf32, #tpu.memory_space<vmem>>, vector<1x2x16xf32>
    %210 = vector.shape_cast %209 : vector<1x2x16xf32> to vector<2x16xf32>
    %211 = vector.shape_cast %207 : vector<2x16xf32> to vector<1x2x16xf32>
    tpu.vector_store %arg14[%208, %c0_82, %c0_83], %211 {strides = array<i32>} : memref<4x2x16xf32, #tpu.memory_space<vmem>>, vector<1x2x16xf32>,
    %c1_i32_84 = arith.constant 1 : i32
    %cst_85 = arith.constant dense<0.000000e+00> : vector<2x128xf32>
    %212 = tpu.matmul %207, %2, %cst_85 {dimension_numbers = #tpu.dot_dimension_numbers<[1], [0], [0], [1], [0, 0, 1, 1], [], []>} : vector<2x16xf32>, vector<16x128xf32>, vector<2x128xf32> -> vector<2x128xf32>
    %cst_86 = arith.constant dense<0.000000e+00> : vector<2x128xf32>
    %213 = tpu.matmul %47, %3, %cst_86 {dimension_numbers = #tpu.dot_dimension_numbers<[1], [0], [0], [1], [0, 0, 1, 1], [], []>} : vector<2x32xf32>, vector<32x128xf32>, vector<2x128xf32> -> vector<2x128xf32>
    %214 = arith.addf %212, %213 : vector<2x128xf32>
    %215 = vector.broadcast %4 : vector<1x128xf32> to vector<2x128xf32>
    %216 = arith.addf %214, %215 : vector<2x128xf32>
    %217 = vector.extract_strided_slice %216 {offsets = [0, 0], sizes = [2, 32], strides = [1, 1]} : vector<2x128xf32> to vector<2x32xf32>
    %218 = arith.negf %217 : vector<2x32xf32>
    %219 = math.exp %218 : vector<2x32xf32>
    %cst_87 = arith.constant 1.000000e+00 : f32
    %220 = vector.broadcast %cst_87 : f32 to vector<2x32xf32>
    %221 = arith.addf %220, %219 : vector<2x32xf32>
    %222 = arith.divf %220, %221 : vector<2x32xf32>
    %223 = vector.extract_strided_slice %216 {offsets = [0, 32], sizes = [2, 32], strides = [1, 1]} : vector<2x128xf32> to vector<2x32xf32>
    %224 = arith.negf %223 : vector<2x32xf32>
    %225 = math.exp %224 : vector<2x32xf32>
    %cst_88 = arith.constant 1.000000e+00 : f32
    %226 = vector.broadcast %cst_88 : f32 to vector<2x32xf32>
    %227 = arith.addf %226, %225 : vector<2x32xf32>
    %228 = arith.divf %226, %227 : vector<2x32xf32>
    %229 = vector.extract_strided_slice %216 {offsets = [0, 64], sizes = [2, 32], strides = [1, 1]} : vector<2x128xf32> to vector<2x32xf32>
    %230 = math.tanh %229 : vector<2x32xf32>
    %231 = vector.extract_strided_slice %216 {offsets = [0, 96], sizes = [2, 32], strides = [1, 1]} : vector<2x128xf32> to vector<2x32xf32>
    %232 = arith.negf %231 : vector<2x32xf32>
    %233 = math.exp %232 : vector<2x32xf32>
    %cst_89 = arith.constant 1.000000e+00 : f32
    %234 = vector.broadcast %cst_89 : f32 to vector<2x32xf32>
    %235 = arith.addf %234, %233 : vector<2x32xf32>
    %236 = arith.divf %234, %235 : vector<2x32xf32>
    %237 = arith.mulf %228, %45 : vector<2x32xf32>
    %238 = arith.mulf %222, %230 : vector<2x32xf32>
    %239 = arith.addf %237, %238 : vector<2x32xf32>
    %240 = math.tanh %239 : vector<2x32xf32>
    %241 = arith.mulf %236, %240 : vector<2x32xf32>
    %cst_90 = arith.constant dense<0.000000e+00> : vector<2x32xf32>
    %242 = tpu.matmul %241, %5, %cst_90 {dimension_numbers = #tpu.dot_dimension_numbers<[1], [0], [0], [1], [0, 0, 1, 1], [], []>} : vector<2x32xf32>, vector<32x32xf32>, vector<2x32xf32> -> vector<2x32xf32>
    %243 = vector.extract_strided_slice %242 {offsets = [0, 0], sizes = [2, 8], strides = [1, 1]} : vector<2x32xf32> to vector<2x8xf32>
    %244 = vector.shape_cast %243 : vector<2x8xf32> to vector<2x1x8xf32>
    %245 = vector.extract_strided_slice %0 {offsets = [0, 0, 0, 0], sizes = [1, 2, 4, 8], strides = [1, 1, 1, 1]} : vector<4x2x4x8xf32> to vector<1x2x4x8xf32>
    %246 = vector.shape_cast %245 : vector<1x2x4x8xf32> to vector<2x4x8xf32>
    "tpu.trace_start"() <{level = 10 : i32, message = "bqd,bkd->bqk"}> : () -> ()
    %cst_91 = arith.constant dense<0.000000e+00> : vector<2x1x4xf32>
    %247 = tpu.matmul %244, %246, %cst_91 {dimension_numbers = #tpu.dot_dimension_numbers<[2], [2], [1], [1], [0, 0, 0, 1, 1, 1], [0], [0]>} : vector<2x1x8xf32>, vector<2x4x8xf32>, vector<2x1x4xf32> -> vector<2x1x4xf32>
    "tpu.trace_stop"() : () -> ()
    %cst_92 = arith.constant 0.353553385 : f32
    %248 = vector.broadcast %cst_92 : f32 to vector<2x1x4xf32>
    %249 = arith.mulf %247, %248 : vector<2x1x4xf32>
    %cst_93 = arith.constant dense<0xFF800000> : vector<2x1xf32>
    %250 = vector.multi_reduction <maximumf>, %249, %cst_93 [2] : vector<2x1x4xf32> to vector<2x1xf32>
    %251 = vector.shape_cast %250 : vector<2x1xf32> to vector<2x1x1xf32>
    %252 = vector.broadcast %251 : vector<2x1x1xf32> to vector<2x1x4xf32>
    %253 = arith.subf %249, %252 : vector<2x1x4xf32>
    %254 = math.exp %253 : vector<2x1x4xf32>
    %cst_94 = arith.constant dense<0.000000e+00> : vector<2x1xf32>
    %255 = vector.multi_reduction <add>, %254, %cst_94 [2] : vector<2x1x4xf32> to vector<2x1xf32>
    %256 = vector.shape_cast %255 : vector<2x1xf32> to vector<2x1x1xf32>
    %257 = tpu.reciprocal %256 : vector<2x1x1xf32> -> vector<2x1x1xf32>
    %258 = vector.broadcast %257 : vector<2x1x1xf32> to vector<2x1x4xf32>
    %259 = arith.mulf %254, %258 : vector<2x1x4xf32>
    %260 = vector.extract_strided_slice %1 {offsets = [0, 0, 0, 0], sizes = [1, 2, 4, 8], strides = [1, 1, 1, 1]} : vector<4x2x4x8xf32> to vector<1x2x4x8xf32>
    %261 = vector.shape_cast %260 : vector<1x2x4x8xf32> to vector<2x4x8xf32>
    "tpu.trace_start"() <{level = 10 : i32, message = "bqk,bkd->bqd"}> : () -> ()
    %cst_95 = arith.constant dense<0.000000e+00> : vector<2x1x8xf32>
    %262 = tpu.matmul %259, %261, %cst_95 {dimension_numbers = #tpu.dot_dimension_numbers<[2], [1], [1], [2], [0, 0, 0, 1, 1, 2], [0], [0]>} : vector<2x1x4xf32>, vector<2x4x8xf32>, vector<2x1x8xf32> -> vector<2x1x8xf32>
    "tpu.trace_stop"() : () -> ()
    %263 = vector.shape_cast %262 : vector<2x1x8xf32> to vector<2x8xf32>
    %264 = vector.shape_cast %259 : vector<2x1x4xf32> to vector<2x4xf32>
    %c4_i32_96 = arith.constant 4 : i32
    %265 = arith.muli %c1_i32_84, %c4_i32_96 : i32
    %c0_i32_97 = arith.constant 0 : i32
    %266 = arith.addi %265, %c0_i32_97 : i32
    %267 = arith.index_cast %266 : i32 to index
    %c0_98 = arith.constant 0 : index
    %c0_99 = arith.constant 0 : index
    %268 = vector.load %arg15[%267, %c0_98, %c0_99] : memref<16x2x4xf32, #tpu.memory_space<vmem>>, vector<1x2x4xf32>
    %269 = vector.shape_cast %268 : vector<1x2x4xf32> to vector<2x4xf32>
    %270 = vector.shape_cast %264 : vector<2x4xf32> to vector<1x2x4xf32>
    tpu.vector_store %arg15[%267, %c0_98, %c0_99], %270 {strides = array<i32>} : memref<16x2x4xf32, #tpu.memory_space<vmem>>, vector<1x2x4xf32>,
    %271 = vector.extract_strided_slice %242 {offsets = [0, 8], sizes = [2, 8], strides = [1, 1]} : vector<2x32xf32> to vector<2x8xf32>
    %272 = vector.shape_cast %271 : vector<2x8xf32> to vector<2x1x8xf32>
    %273 = vector.extract_strided_slice %0 {offsets = [1, 0, 0, 0], sizes = [1, 2, 4, 8], strides = [1, 1, 1, 1]} : vector<4x2x4x8xf32> to vector<1x2x4x8xf32>
    %274 = vector.shape_cast %273 : vector<1x2x4x8xf32> to vector<2x4x8xf32>
    "tpu.trace_start"() <{level = 10 : i32, message = "bqd,bkd->bqk"}> : () -> ()
    %cst_100 = arith.constant dense<0.000000e+00> : vector<2x1x4xf32>
    %275 = tpu.matmul %272, %274, %cst_100 {dimension_numbers = #tpu.dot_dimension_numbers<[2], [2], [1], [1], [0, 0, 0, 1, 1, 1], [0], [0]>} : vector<2x1x8xf32>, vector<2x4x8xf32>, vector<2x1x4xf32> -> vector<2x1x4xf32>
    "tpu.trace_stop"() : () -> ()
    %cst_101 = arith.constant 0.353553385 : f32
    %276 = vector.broadcast %cst_101 : f32 to vector<2x1x4xf32>
    %277 = arith.mulf %275, %276 : vector<2x1x4xf32>
    %cst_102 = arith.constant dense<0xFF800000> : vector<2x1xf32>
    %278 = vector.multi_reduction <maximumf>, %277, %cst_102 [2] : vector<2x1x4xf32> to vector<2x1xf32>
    %279 = vector.shape_cast %278 : vector<2x1xf32> to vector<2x1x1xf32>
    %280 = vector.broadcast %279 : vector<2x1x1xf32> to vector<2x1x4xf32>
    %281 = arith.subf %277, %280 : vector<2x1x4xf32>
    %282 = math.exp %281 : vector<2x1x4xf32>
    %cst_103 = arith.constant dense<0.000000e+00> : vector<2x1xf32>
    %283 = vector.multi_reduction <add>, %282, %cst_103 [2] : vector<2x1x4xf32> to vector<2x1xf32>
    %284 = vector.shape_cast %283 : vector<2x1xf32> to vector<2x1x1xf32>
    %285 = tpu.reciprocal %284 : vector<2x1x1xf32> -> vector<2x1x1xf32>
    %286 = vector.broadcast %285 : vector<2x1x1xf32> to vector<2x1x4xf32>
    %287 = arith.mulf %282, %286 : vector<2x1x4xf32>
    %288 = vector.extract_strided_slice %1 {offsets = [1, 0, 0, 0], sizes = [1, 2, 4, 8], strides = [1, 1, 1, 1]} : vector<4x2x4x8xf32> to vector<1x2x4x8xf32>
    %289 = vector.shape_cast %288 : vector<1x2x4x8xf32> to vector<2x4x8xf32>
    "tpu.trace_start"() <{level = 10 : i32, message = "bqk,bkd->bqd"}> : () -> ()
    %cst_104 = arith.constant dense<0.000000e+00> : vector<2x1x8xf32>
    %290 = tpu.matmul %287, %289, %cst_104 {dimension_numbers = #tpu.dot_dimension_numbers<[2], [1], [1], [2], [0, 0, 0, 1, 1, 2], [0], [0]>} : vector<2x1x4xf32>, vector<2x4x8xf32>, vector<2x1x8xf32> -> vector<2x1x8xf32>
    "tpu.trace_stop"() : () -> ()
    %291 = vector.shape_cast %290 : vector<2x1x8xf32> to vector<2x8xf32>
    %292 = vector.shape_cast %287 : vector<2x1x4xf32> to vector<2x4xf32>
    %c4_i32_105 = arith.constant 4 : i32
    %293 = arith.muli %c1_i32_84, %c4_i32_105 : i32
    %c1_i32_106 = arith.constant 1 : i32
    %294 = arith.addi %293, %c1_i32_106 : i32
    %295 = arith.index_cast %294 : i32 to index
    %c0_107 = arith.constant 0 : index
    %c0_108 = arith.constant 0 : index
    %296 = vector.load %arg15[%295, %c0_107, %c0_108] : memref<16x2x4xf32, #tpu.memory_space<vmem>>, vector<1x2x4xf32>
    %297 = vector.shape_cast %296 : vector<1x2x4xf32> to vector<2x4xf32>
    %298 = vector.shape_cast %292 : vector<2x4xf32> to vector<1x2x4xf32>
    tpu.vector_store %arg15[%295, %c0_107, %c0_108], %298 {strides = array<i32>} : memref<16x2x4xf32, #tpu.memory_space<vmem>>, vector<1x2x4xf32>,
    %299 = vector.extract_strided_slice %242 {offsets = [0, 16], sizes = [2, 8], strides = [1, 1]} : vector<2x32xf32> to vector<2x8xf32>
    %300 = vector.shape_cast %299 : vector<2x8xf32> to vector<2x1x8xf32>
    %301 = vector.extract_strided_slice %0 {offsets = [2, 0, 0, 0], sizes = [1, 2, 4, 8], strides = [1, 1, 1, 1]} : vector<4x2x4x8xf32> to vector<1x2x4x8xf32>
    %302 = vector.shape_cast %301 : vector<1x2x4x8xf32> to vector<2x4x8xf32>
    "tpu.trace_start"() <{level = 10 : i32, message = "bqd,bkd->bqk"}> : () -> ()
    %cst_109 = arith.constant dense<0.000000e+00> : vector<2x1x4xf32>
    %303 = tpu.matmul %300, %302, %cst_109 {dimension_numbers = #tpu.dot_dimension_numbers<[2], [2], [1], [1], [0, 0, 0, 1, 1, 1], [0], [0]>} : vector<2x1x8xf32>, vector<2x4x8xf32>, vector<2x1x4xf32> -> vector<2x1x4xf32>
    "tpu.trace_stop"() : () -> ()
    %cst_110 = arith.constant 0.353553385 : f32
    %304 = vector.broadcast %cst_110 : f32 to vector<2x1x4xf32>
    %305 = arith.mulf %303, %304 : vector<2x1x4xf32>
    %cst_111 = arith.constant dense<0xFF800000> : vector<2x1xf32>
    %306 = vector.multi_reduction <maximumf>, %305, %cst_111 [2] : vector<2x1x4xf32> to vector<2x1xf32>
    %307 = vector.shape_cast %306 : vector<2x1xf32> to vector<2x1x1xf32>
    %308 = vector.broadcast %307 : vector<2x1x1xf32> to vector<2x1x4xf32>
    %309 = arith.subf %305, %308 : vector<2x1x4xf32>
    %310 = math.exp %309 : vector<2x1x4xf32>
    %cst_112 = arith.constant dense<0.000000e+00> : vector<2x1xf32>
    %311 = vector.multi_reduction <add>, %310, %cst_112 [2] : vector<2x1x4xf32> to vector<2x1xf32>
    %312 = vector.shape_cast %311 : vector<2x1xf32> to vector<2x1x1xf32>
    %313 = tpu.reciprocal %312 : vector<2x1x1xf32> -> vector<2x1x1xf32>
    %314 = vector.broadcast %313 : vector<2x1x1xf32> to vector<2x1x4xf32>
    %315 = arith.mulf %310, %314 : vector<2x1x4xf32>
    %316 = vector.extract_strided_slice %1 {offsets = [2, 0, 0, 0], sizes = [1, 2, 4, 8], strides = [1, 1, 1, 1]} : vector<4x2x4x8xf32> to vector<1x2x4x8xf32>
    %317 = vector.shape_cast %316 : vector<1x2x4x8xf32> to vector<2x4x8xf32>
    "tpu.trace_start"() <{level = 10 : i32, message = "bqk,bkd->bqd"}> : () -> ()
    %cst_113 = arith.constant dense<0.000000e+00> : vector<2x1x8xf32>
    %318 = tpu.matmul %315, %317, %cst_113 {dimension_numbers = #tpu.dot_dimension_numbers<[2], [1], [1], [2], [0, 0, 0, 1, 1, 2], [0], [0]>} : vector<2x1x4xf32>, vector<2x4x8xf32>, vector<2x1x8xf32> -> vector<2x1x8xf32>
    "tpu.trace_stop"() : () -> ()
    %319 = vector.shape_cast %318 : vector<2x1x8xf32> to vector<2x8xf32>
    %320 = vector.shape_cast %315 : vector<2x1x4xf32> to vector<2x4xf32>
    %c4_i32_114 = arith.constant 4 : i32
    %321 = arith.muli %c1_i32_84, %c4_i32_114 : i32
    %c2_i32_115 = arith.constant 2 : i32
    %322 = arith.addi %321, %c2_i32_115 : i32
    %323 = arith.index_cast %322 : i32 to index
    %c0_116 = arith.constant 0 : index
    %c0_117 = arith.constant 0 : index
    %324 = vector.load %arg15[%323, %c0_116, %c0_117] : memref<16x2x4xf32, #tpu.memory_space<vmem>>, vector<1x2x4xf32>
    %325 = vector.shape_cast %324 : vector<1x2x4xf32> to vector<2x4xf32>
    %326 = vector.shape_cast %320 : vector<2x4xf32> to vector<1x2x4xf32>
    tpu.vector_store %arg15[%323, %c0_116, %c0_117], %326 {strides = array<i32>} : memref<16x2x4xf32, #tpu.memory_space<vmem>>, vector<1x2x4xf32>,
    %327 = vector.extract_strided_slice %242 {offsets = [0, 24], sizes = [2, 8], strides = [1, 1]} : vector<2x32xf32> to vector<2x8xf32>
    %328 = vector.shape_cast %327 : vector<2x8xf32> to vector<2x1x8xf32>
    %329 = vector.extract_strided_slice %0 {offsets = [3, 0, 0, 0], sizes = [1, 2, 4, 8], strides = [1, 1, 1, 1]} : vector<4x2x4x8xf32> to vector<1x2x4x8xf32>
    %330 = vector.shape_cast %329 : vector<1x2x4x8xf32> to vector<2x4x8xf32>
    "tpu.trace_start"() <{level = 10 : i32, message = "bqd,bkd->bqk"}> : () -> ()
    %cst_118 = arith.constant dense<0.000000e+00> : vector<2x1x4xf32>
    %331 = tpu.matmul %328, %330, %cst_118 {dimension_numbers = #tpu.dot_dimension_numbers<[2], [2], [1], [1], [0, 0, 0, 1, 1, 1], [0], [0]>} : vector<2x1x8xf32>, vector<2x4x8xf32>, vector<2x1x4xf32> -> vector<2x1x4xf32>
    "tpu.trace_stop"() : () -> ()
    %cst_119 = arith.constant 0.353553385 : f32
    %332 = vector.broadcast %cst_119 : f32 to vector<2x1x4xf32>
    %333 = arith.mulf %331, %332 : vector<2x1x4xf32>
    %cst_120 = arith.constant dense<0xFF800000> : vector<2x1xf32>
    %334 = vector.multi_reduction <maximumf>, %333, %cst_120 [2] : vector<2x1x4xf32> to vector<2x1xf32>
    %335 = vector.shape_cast %334 : vector<2x1xf32> to vector<2x1x1xf32>
    %336 = vector.broadcast %335 : vector<2x1x1xf32> to vector<2x1x4xf32>
    %337 = arith.subf %333, %336 : vector<2x1x4xf32>
    %338 = math.exp %337 : vector<2x1x4xf32>
    %cst_121 = arith.constant dense<0.000000e+00> : vector<2x1xf32>
    %339 = vector.multi_reduction <add>, %338, %cst_121 [2] : vector<2x1x4xf32> to vector<2x1xf32>
    %340 = vector.shape_cast %339 : vector<2x1xf32> to vector<2x1x1xf32>
    %341 = tpu.reciprocal %340 : vector<2x1x1xf32> -> vector<2x1x1xf32>
    %342 = vector.broadcast %341 : vector<2x1x1xf32> to vector<2x1x4xf32>
    %343 = arith.mulf %338, %342 : vector<2x1x4xf32>
    %344 = vector.extract_strided_slice %1 {offsets = [3, 0, 0, 0], sizes = [1, 2, 4, 8], strides = [1, 1, 1, 1]} : vector<4x2x4x8xf32> to vector<1x2x4x8xf32>
    %345 = vector.shape_cast %344 : vector<1x2x4x8xf32> to vector<2x4x8xf32>
    "tpu.trace_start"() <{level = 10 : i32, message = "bqk,bkd->bqd"}> : () -> ()
    %cst_122 = arith.constant dense<0.000000e+00> : vector<2x1x8xf32>
    %346 = tpu.matmul %343, %345, %cst_122 {dimension_numbers = #tpu.dot_dimension_numbers<[2], [1], [1], [2], [0, 0, 0, 1, 1, 2], [0], [0]>} : vector<2x1x4xf32>, vector<2x4x8xf32>, vector<2x1x8xf32> -> vector<2x1x8xf32>
    "tpu.trace_stop"() : () -> ()
    %347 = vector.shape_cast %346 : vector<2x1x8xf32> to vector<2x8xf32>
    %348 = vector.shape_cast %343 : vector<2x1x4xf32> to vector<2x4xf32>
    %c4_i32_123 = arith.constant 4 : i32
    %349 = arith.muli %c1_i32_84, %c4_i32_123 : i32
    %c3_i32_124 = arith.constant 3 : i32
    %350 = arith.addi %349, %c3_i32_124 : i32
    %351 = arith.index_cast %350 : i32 to index
    %c0_125 = arith.constant 0 : index
    %c0_126 = arith.constant 0 : index
    %352 = vector.load %arg15[%351, %c0_125, %c0_126] : memref<16x2x4xf32, #tpu.memory_space<vmem>>, vector<1x2x4xf32>
    %353 = vector.shape_cast %352 : vector<1x2x4xf32> to vector<2x4xf32>
    %354 = vector.shape_cast %348 : vector<2x4xf32> to vector<1x2x4xf32>
    tpu.vector_store %arg15[%351, %c0_125, %c0_126], %354 {strides = array<i32>} : memref<16x2x4xf32, #tpu.memory_space<vmem>>, vector<1x2x4xf32>,
    %355 = tpu.concatenate %263, %291, %319, %347 in 1 : vector<2x8xf32>, vector<2x8xf32>, vector<2x8xf32>, vector<2x8xf32> -> vector<2x32xf32>
    %cst_127 = arith.constant dense<0.000000e+00> : vector<2x32xf32>
    %356 = tpu.matmul %355, %6, %cst_127 {dimension_numbers = #tpu.dot_dimension_numbers<[1], [0], [0], [1], [0, 0, 1, 1], [], []>} : vector<2x32xf32>, vector<32x32xf32>, vector<2x32xf32> -> vector<2x32xf32>
    %cst_128 = arith.constant dense<0.000000e+00> : vector<2x256xf32>
    %357 = tpu.matmul %241, %7, %cst_128 {dimension_numbers = #tpu.dot_dimension_numbers<[1], [0], [0], [1], [0, 0, 1, 1], [], []>} : vector<2x32xf32>, vector<32x256xf32>, vector<2x256xf32> -> vector<2x256xf32>
    %cst_129 = arith.constant dense<0.000000e+00> : vector<2x256xf32>
    %358 = tpu.matmul %356, %8, %cst_129 {dimension_numbers = #tpu.dot_dimension_numbers<[1], [0], [0], [1], [0, 0, 1, 1], [], []>} : vector<2x32xf32>, vector<32x256xf32>, vector<2x256xf32> -> vector<2x256xf32>
    %359 = arith.addf %357, %358 : vector<2x256xf32>
    %cst_130 = arith.constant dense<0.000000e+00> : vector<2x256xf32>
    %360 = tpu.matmul %194, %9, %cst_130 {dimension_numbers = #tpu.dot_dimension_numbers<[1], [0], [0], [1], [0, 0, 1, 1], [], []>} : vector<2x64xf32>, vector<64x256xf32>, vector<2x256xf32> -> vector<2x256xf32>
    %361 = arith.addf %359, %360 : vector<2x256xf32>
    %362 = vector.broadcast %10 : vector<1x256xf32> to vector<2x256xf32>
    %363 = arith.addf %361, %362 : vector<2x256xf32>
    %364 = vector.extract_strided_slice %363 {offsets = [0, 0], sizes = [2, 64], strides = [1, 1]} : vector<2x256xf32> to vector<2x64xf32>
    %365 = arith.negf %364 : vector<2x64xf32>
    %366 = math.exp %365 : vector<2x64xf32>
    %cst_131 = arith.constant 1.000000e+00 : f32
    %367 = vector.broadcast %cst_131 : f32 to vector<2x64xf32>
    %368 = arith.addf %367, %366 : vector<2x64xf32>
    %369 = arith.divf %367, %368 : vector<2x64xf32>
    %370 = vector.extract_strided_slice %363 {offsets = [0, 64], sizes = [2, 64], strides = [1, 1]} : vector<2x256xf32> to vector<2x64xf32>
    %371 = arith.negf %370 : vector<2x64xf32>
    %372 = math.exp %371 : vector<2x64xf32>
    %cst_132 = arith.constant 1.000000e+00 : f32
    %373 = vector.broadcast %cst_132 : f32 to vector<2x64xf32>
    %374 = arith.addf %373, %372 : vector<2x64xf32>
    %375 = arith.divf %373, %374 : vector<2x64xf32>
    %376 = vector.extract_strided_slice %363 {offsets = [0, 128], sizes = [2, 64], strides = [1, 1]} : vector<2x256xf32> to vector<2x64xf32>
    %377 = math.tanh %376 : vector<2x64xf32>
    %378 = vector.extract_strided_slice %363 {offsets = [0, 192], sizes = [2, 64], strides = [1, 1]} : vector<2x256xf32> to vector<2x64xf32>
    %379 = arith.negf %378 : vector<2x64xf32>
    %380 = math.exp %379 : vector<2x64xf32>
    %cst_133 = arith.constant 1.000000e+00 : f32
    %381 = vector.broadcast %cst_133 : f32 to vector<2x64xf32>
    %382 = arith.addf %381, %380 : vector<2x64xf32>
    %383 = arith.divf %381, %382 : vector<2x64xf32>
    %384 = arith.mulf %375, %192 : vector<2x64xf32>
    %385 = arith.mulf %369, %377 : vector<2x64xf32>
    %386 = arith.addf %384, %385 : vector<2x64xf32>
    %387 = math.tanh %386 : vector<2x64xf32>
    %388 = arith.mulf %383, %387 : vector<2x64xf32>
    %cst_134 = arith.constant dense<0.000000e+00> : vector<2x16xf32>
    %389 = tpu.matmul %388, %11, %cst_134 {dimension_numbers = #tpu.dot_dimension_numbers<[1], [0], [0], [1], [0, 0, 1, 1], [], []>} : vector<2x64xf32>, vector<64x16xf32>, vector<2x16xf32> -> vector<2x16xf32>
    %390 = vector.broadcast %12 : vector<1x16xf32> to vector<2x16xf32>
    %391 = arith.addf %389, %390 : vector<2x16xf32>
    %cst_135 = arith.constant dense<0xFF800000> : vector<2xf32>
    %392 = vector.multi_reduction <maximumf>, %391, %cst_135 [1] : vector<2x16xf32> to vector<2xf32>
    %393 = vector.shape_cast %392 : vector<2xf32> to vector<2x1xf32>
    %394 = vector.broadcast %393 : vector<2x1xf32> to vector<2x16xf32>
    %395 = arith.subf %391, %394 : vector<2x16xf32>
    %396 = math.exp %395 : vector<2x16xf32>
    %cst_136 = arith.constant dense<0.000000e+00> : vector<2xf32>
    %397 = vector.multi_reduction <add>, %396, %cst_136 [1] : vector<2x16xf32> to vector<2xf32>
    %398 = vector.shape_cast %397 : vector<2xf32> to vector<2x1xf32>
    %399 = tpu.reciprocal %398 : vector<2x1xf32> -> vector<2x1xf32>
    %400 = vector.broadcast %399 : vector<2x1xf32> to vector<2x16xf32>
    %401 = arith.mulf %396, %400 : vector<2x16xf32>
    %402 = arith.index_cast %c1_i32_84 : i32 to index
    %c0_137 = arith.constant 0 : index
    %c0_138 = arith.constant 0 : index
    %403 = vector.load %arg14[%402, %c0_137, %c0_138] : memref<4x2x16xf32, #tpu.memory_space<vmem>>, vector<1x2x16xf32>
    %404 = vector.shape_cast %403 : vector<1x2x16xf32> to vector<2x16xf32>
    %405 = vector.shape_cast %401 : vector<2x16xf32> to vector<1x2x16xf32>
    tpu.vector_store %arg14[%402, %c0_137, %c0_138], %405 {strides = array<i32>} : memref<4x2x16xf32, #tpu.memory_space<vmem>>, vector<1x2x16xf32>,
    %c2_i32_139 = arith.constant 2 : i32
    %cst_140 = arith.constant dense<0.000000e+00> : vector<2x128xf32>
    %406 = tpu.matmul %401, %2, %cst_140 {dimension_numbers = #tpu.dot_dimension_numbers<[1], [0], [0], [1], [0, 0, 1, 1], [], []>} : vector<2x16xf32>, vector<16x128xf32>, vector<2x128xf32> -> vector<2x128xf32>
    %cst_141 = arith.constant dense<0.000000e+00> : vector<2x128xf32>
    %407 = tpu.matmul %241, %3, %cst_141 {dimension_numbers = #tpu.dot_dimension_numbers<[1], [0], [0], [1], [0, 0, 1, 1], [], []>} : vector<2x32xf32>, vector<32x128xf32>, vector<2x128xf32> -> vector<2x128xf32>
    %408 = arith.addf %406, %407 : vector<2x128xf32>
    %409 = vector.broadcast %4 : vector<1x128xf32> to vector<2x128xf32>
    %410 = arith.addf %408, %409 : vector<2x128xf32>
    %411 = vector.extract_strided_slice %410 {offsets = [0, 0], sizes = [2, 32], strides = [1, 1]} : vector<2x128xf32> to vector<2x32xf32>
    %412 = arith.negf %411 : vector<2x32xf32>
    %413 = math.exp %412 : vector<2x32xf32>
    %cst_142 = arith.constant 1.000000e+00 : f32
    %414 = vector.broadcast %cst_142 : f32 to vector<2x32xf32>
    %415 = arith.addf %414, %413 : vector<2x32xf32>
    %416 = arith.divf %414, %415 : vector<2x32xf32>
    %417 = vector.extract_strided_slice %410 {offsets = [0, 32], sizes = [2, 32], strides = [1, 1]} : vector<2x128xf32> to vector<2x32xf32>
    %418 = arith.negf %417 : vector<2x32xf32>
    %419 = math.exp %418 : vector<2x32xf32>
    %cst_143 = arith.constant 1.000000e+00 : f32
    %420 = vector.broadcast %cst_143 : f32 to vector<2x32xf32>
    %421 = arith.addf %420, %419 : vector<2x32xf32>
    %422 = arith.divf %420, %421 : vector<2x32xf32>
    %423 = vector.extract_strided_slice %410 {offsets = [0, 64], sizes = [2, 32], strides = [1, 1]} : vector<2x128xf32> to vector<2x32xf32>
    %424 = math.tanh %423 : vector<2x32xf32>
    %425 = vector.extract_strided_slice %410 {offsets = [0, 96], sizes = [2, 32], strides = [1, 1]} : vector<2x128xf32> to vector<2x32xf32>
    %426 = arith.negf %425 : vector<2x32xf32>
    %427 = math.exp %426 : vector<2x32xf32>
    %cst_144 = arith.constant 1.000000e+00 : f32
    %428 = vector.broadcast %cst_144 : f32 to vector<2x32xf32>
    %429 = arith.addf %428, %427 : vector<2x32xf32>
    %430 = arith.divf %428, %429 : vector<2x32xf32>
    %431 = arith.mulf %422, %239 : vector<2x32xf32>
    %432 = arith.mulf %416, %424 : vector<2x32xf32>
    %433 = arith.addf %431, %432 : vector<2x32xf32>
    %434 = math.tanh %433 : vector<2x32xf32>
    %435 = arith.mulf %430, %434 : vector<2x32xf32>
    %cst_145 = arith.constant dense<0.000000e+00> : vector<2x32xf32>
    %436 = tpu.matmul %435, %5, %cst_145 {dimension_numbers = #tpu.dot_dimension_numbers<[1], [0], [0], [1], [0, 0, 1, 1], [], []>} : vector<2x32xf32>, vector<32x32xf32>, vector<2x32xf32> -> vector<2x32xf32>
    %437 = vector.extract_strided_slice %436 {offsets = [0, 0], sizes = [2, 8], strides = [1, 1]} : vector<2x32xf32> to vector<2x8xf32>
    %438 = vector.shape_cast %437 : vector<2x8xf32> to vector<2x1x8xf32>
    %439 = vector.extract_strided_slice %0 {offsets = [0, 0, 0, 0], sizes = [1, 2, 4, 8], strides = [1, 1, 1, 1]} : vector<4x2x4x8xf32> to vector<1x2x4x8xf32>
    %440 = vector.shape_cast %439 : vector<1x2x4x8xf32> to vector<2x4x8xf32>
    "tpu.trace_start"() <{level = 10 : i32, message = "bqd,bkd->bqk"}> : () -> ()
    %cst_146 = arith.constant dense<0.000000e+00> : vector<2x1x4xf32>
    %441 = tpu.matmul %438, %440, %cst_146 {dimension_numbers = #tpu.dot_dimension_numbers<[2], [2], [1], [1], [0, 0, 0, 1, 1, 1], [0], [0]>} : vector<2x1x8xf32>, vector<2x4x8xf32>, vector<2x1x4xf32> -> vector<2x1x4xf32>
    "tpu.trace_stop"() : () -> ()
    %cst_147 = arith.constant 0.353553385 : f32
    %442 = vector.broadcast %cst_147 : f32 to vector<2x1x4xf32>
    %443 = arith.mulf %441, %442 : vector<2x1x4xf32>
    %cst_148 = arith.constant dense<0xFF800000> : vector<2x1xf32>
    %444 = vector.multi_reduction <maximumf>, %443, %cst_148 [2] : vector<2x1x4xf32> to vector<2x1xf32>
    %445 = vector.shape_cast %444 : vector<2x1xf32> to vector<2x1x1xf32>
    %446 = vector.broadcast %445 : vector<2x1x1xf32> to vector<2x1x4xf32>
    %447 = arith.subf %443, %446 : vector<2x1x4xf32>
    %448 = math.exp %447 : vector<2x1x4xf32>
    %cst_149 = arith.constant dense<0.000000e+00> : vector<2x1xf32>
    %449 = vector.multi_reduction <add>, %448, %cst_149 [2] : vector<2x1x4xf32> to vector<2x1xf32>
    %450 = vector.shape_cast %449 : vector<2x1xf32> to vector<2x1x1xf32>
    %451 = tpu.reciprocal %450 : vector<2x1x1xf32> -> vector<2x1x1xf32>
    %452 = vector.broadcast %451 : vector<2x1x1xf32> to vector<2x1x4xf32>
    %453 = arith.mulf %448, %452 : vector<2x1x4xf32>
    %454 = vector.extract_strided_slice %1 {offsets = [0, 0, 0, 0], sizes = [1, 2, 4, 8], strides = [1, 1, 1, 1]} : vector<4x2x4x8xf32> to vector<1x2x4x8xf32>
    %455 = vector.shape_cast %454 : vector<1x2x4x8xf32> to vector<2x4x8xf32>
    "tpu.trace_start"() <{level = 10 : i32, message = "bqk,bkd->bqd"}> : () -> ()
    %cst_150 = arith.constant dense<0.000000e+00> : vector<2x1x8xf32>
    %456 = tpu.matmul %453, %455, %cst_150 {dimension_numbers = #tpu.dot_dimension_numbers<[2], [1], [1], [2], [0, 0, 0, 1, 1, 2], [0], [0]>} : vector<2x1x4xf32>, vector<2x4x8xf32>, vector<2x1x8xf32> -> vector<2x1x8xf32>
    "tpu.trace_stop"() : () -> ()
    %457 = vector.shape_cast %456 : vector<2x1x8xf32> to vector<2x8xf32>
    %458 = vector.shape_cast %453 : vector<2x1x4xf32> to vector<2x4xf32>
    %c4_i32_151 = arith.constant 4 : i32
    %459 = arith.muli %c2_i32_139, %c4_i32_151 : i32
    %c0_i32_152 = arith.constant 0 : i32
    %460 = arith.addi %459, %c0_i32_152 : i32
    %461 = arith.index_cast %460 : i32 to index
    %c0_153 = arith.constant 0 : index
    %c0_154 = arith.constant 0 : index
    %462 = vector.load %arg15[%461, %c0_153, %c0_154] : memref<16x2x4xf32, #tpu.memory_space<vmem>>, vector<1x2x4xf32>
    %463 = vector.shape_cast %462 : vector<1x2x4xf32> to vector<2x4xf32>
    %464 = vector.shape_cast %458 : vector<2x4xf32> to vector<1x2x4xf32>
    tpu.vector_store %arg15[%461, %c0_153, %c0_154], %464 {strides = array<i32>} : memref<16x2x4xf32, #tpu.memory_space<vmem>>, vector<1x2x4xf32>,
    %465 = vector.extract_strided_slice %436 {offsets = [0, 8], sizes = [2, 8], strides = [1, 1]} : vector<2x32xf32> to vector<2x8xf32>
    %466 = vector.shape_cast %465 : vector<2x8xf32> to vector<2x1x8xf32>
    %467 = vector.extract_strided_slice %0 {offsets = [1, 0, 0, 0], sizes = [1, 2, 4, 8], strides = [1, 1, 1, 1]} : vector<4x2x4x8xf32> to vector<1x2x4x8xf32>
    %468 = vector.shape_cast %467 : vector<1x2x4x8xf32> to vector<2x4x8xf32>
    "tpu.trace_start"() <{level = 10 : i32, message = "bqd,bkd->bqk"}> : () -> ()
    %cst_155 = arith.constant dense<0.000000e+00> : vector<2x1x4xf32>
    %469 = tpu.matmul %466, %468, %cst_155 {dimension_numbers = #tpu.dot_dimension_numbers<[2], [2], [1], [1], [0, 0, 0, 1, 1, 1], [0], [0]>} : vector<2x1x8xf32>, vector<2x4x8xf32>, vector<2x1x4xf32> -> vector<2x1x4xf32>
    "tpu.trace_stop"() : () -> ()
    %cst_156 = arith.constant 0.353553385 : f32
    %470 = vector.broadcast %cst_156 : f32 to vector<2x1x4xf32>
    %471 = arith.mulf %469, %470 : vector<2x1x4xf32>
    %cst_157 = arith.constant dense<0xFF800000> : vector<2x1xf32>
    %472 = vector.multi_reduction <maximumf>, %471, %cst_157 [2] : vector<2x1x4xf32> to vector<2x1xf32>
    %473 = vector.shape_cast %472 : vector<2x1xf32> to vector<2x1x1xf32>
    %474 = vector.broadcast %473 : vector<2x1x1xf32> to vector<2x1x4xf32>
    %475 = arith.subf %471, %474 : vector<2x1x4xf32>
    %476 = math.exp %475 : vector<2x1x4xf32>
    %cst_158 = arith.constant dense<0.000000e+00> : vector<2x1xf32>
    %477 = vector.multi_reduction <add>, %476, %cst_158 [2] : vector<2x1x4xf32> to vector<2x1xf32>
    %478 = vector.shape_cast %477 : vector<2x1xf32> to vector<2x1x1xf32>
    %479 = tpu.reciprocal %478 : vector<2x1x1xf32> -> vector<2x1x1xf32>
    %480 = vector.broadcast %479 : vector<2x1x1xf32> to vector<2x1x4xf32>
    %481 = arith.mulf %476, %480 : vector<2x1x4xf32>
    %482 = vector.extract_strided_slice %1 {offsets = [1, 0, 0, 0], sizes = [1, 2, 4, 8], strides = [1, 1, 1, 1]} : vector<4x2x4x8xf32> to vector<1x2x4x8xf32>
    %483 = vector.shape_cast %482 : vector<1x2x4x8xf32> to vector<2x4x8xf32>
    "tpu.trace_start"() <{level = 10 : i32, message = "bqk,bkd->bqd"}> : () -> ()
    %cst_159 = arith.constant dense<0.000000e+00> : vector<2x1x8xf32>
    %484 = tpu.matmul %481, %483, %cst_159 {dimension_numbers = #tpu.dot_dimension_numbers<[2], [1], [1], [2], [0, 0, 0, 1, 1, 2], [0], [0]>} : vector<2x1x4xf32>, vector<2x4x8xf32>, vector<2x1x8xf32> -> vector<2x1x8xf32>
    "tpu.trace_stop"() : () -> ()
    %485 = vector.shape_cast %484 : vector<2x1x8xf32> to vector<2x8xf32>
    %486 = vector.shape_cast %481 : vector<2x1x4xf32> to vector<2x4xf32>
    %c4_i32_160 = arith.constant 4 : i32
    %487 = arith.muli %c2_i32_139, %c4_i32_160 : i32
    %c1_i32_161 = arith.constant 1 : i32
    %488 = arith.addi %487, %c1_i32_161 : i32
    %489 = arith.index_cast %488 : i32 to index
    %c0_162 = arith.constant 0 : index
    %c0_163 = arith.constant 0 : index
    %490 = vector.load %arg15[%489, %c0_162, %c0_163] : memref<16x2x4xf32, #tpu.memory_space<vmem>>, vector<1x2x4xf32>
    %491 = vector.shape_cast %490 : vector<1x2x4xf32> to vector<2x4xf32>
    %492 = vector.shape_cast %486 : vector<2x4xf32> to vector<1x2x4xf32>
    tpu.vector_store %arg15[%489, %c0_162, %c0_163], %492 {strides = array<i32>} : memref<16x2x4xf32, #tpu.memory_space<vmem>>, vector<1x2x4xf32>,
    %493 = vector.extract_strided_slice %436 {offsets = [0, 16], sizes = [2, 8], strides = [1, 1]} : vector<2x32xf32> to vector<2x8xf32>
    %494 = vector.shape_cast %493 : vector<2x8xf32> to vector<2x1x8xf32>
    %495 = vector.extract_strided_slice %0 {offsets = [2, 0, 0, 0], sizes = [1, 2, 4, 8], strides = [1, 1, 1, 1]} : vector<4x2x4x8xf32> to vector<1x2x4x8xf32>
    %496 = vector.shape_cast %495 : vector<1x2x4x8xf32> to vector<2x4x8xf32>
    "tpu.trace_start"() <{level = 10 : i32, message = "bqd,bkd->bqk"}> : () -> ()
    %cst_164 = arith.constant dense<0.000000e+00> : vector<2x1x4xf32>
    %497 = tpu.matmul %494, %496, %cst_164 {dimension_numbers = #tpu.dot_dimension_numbers<[2], [2], [1], [1], [0, 0, 0, 1, 1, 1], [0], [0]>} : vector<2x1x8xf32>, vector<2x4x8xf32>, vector<2x1x4xf32> -> vector<2x1x4xf32>
    "tpu.trace_stop"() : () -> ()
    %cst_165 = arith.constant 0.353553385 : f32
    %498 = vector.broadcast %cst_165 : f32 to vector<2x1x4xf32>
    %499 = arith.mulf %497, %498 : vector<2x1x4xf32>
    %cst_166 = arith.constant dense<0xFF800000> : vector<2x1xf32>
    %500 = vector.multi_reduction <maximumf>, %499, %cst_166 [2] : vector<2x1x4xf32> to vector<2x1xf32>
    %501 = vector.shape_cast %500 : vector<2x1xf32> to vector<2x1x1xf32>
    %502 = vector.broadcast %501 : vector<2x1x1xf32> to vector<2x1x4xf32>
    %503 = arith.subf %499, %502 : vector<2x1x4xf32>
    %504 = math.exp %503 : vector<2x1x4xf32>
    %cst_167 = arith.constant dense<0.000000e+00> : vector<2x1xf32>
    %505 = vector.multi_reduction <add>, %504, %cst_167 [2] : vector<2x1x4xf32> to vector<2x1xf32>
    %506 = vector.shape_cast %505 : vector<2x1xf32> to vector<2x1x1xf32>
    %507 = tpu.reciprocal %506 : vector<2x1x1xf32> -> vector<2x1x1xf32>
    %508 = vector.broadcast %507 : vector<2x1x1xf32> to vector<2x1x4xf32>
    %509 = arith.mulf %504, %508 : vector<2x1x4xf32>
    %510 = vector.extract_strided_slice %1 {offsets = [2, 0, 0, 0], sizes = [1, 2, 4, 8], strides = [1, 1, 1, 1]} : vector<4x2x4x8xf32> to vector<1x2x4x8xf32>
    %511 = vector.shape_cast %510 : vector<1x2x4x8xf32> to vector<2x4x8xf32>
    "tpu.trace_start"() <{level = 10 : i32, message = "bqk,bkd->bqd"}> : () -> ()
    %cst_168 = arith.constant dense<0.000000e+00> : vector<2x1x8xf32>
    %512 = tpu.matmul %509, %511, %cst_168 {dimension_numbers = #tpu.dot_dimension_numbers<[2], [1], [1], [2], [0, 0, 0, 1, 1, 2], [0], [0]>} : vector<2x1x4xf32>, vector<2x4x8xf32>, vector<2x1x8xf32> -> vector<2x1x8xf32>
    "tpu.trace_stop"() : () -> ()
    %513 = vector.shape_cast %512 : vector<2x1x8xf32> to vector<2x8xf32>
    %514 = vector.shape_cast %509 : vector<2x1x4xf32> to vector<2x4xf32>
    %c4_i32_169 = arith.constant 4 : i32
    %515 = arith.muli %c2_i32_139, %c4_i32_169 : i32
    %c2_i32_170 = arith.constant 2 : i32
    %516 = arith.addi %515, %c2_i32_170 : i32
    %517 = arith.index_cast %516 : i32 to index
    %c0_171 = arith.constant 0 : index
    %c0_172 = arith.constant 0 : index
    %518 = vector.load %arg15[%517, %c0_171, %c0_172] : memref<16x2x4xf32, #tpu.memory_space<vmem>>, vector<1x2x4xf32>
    %519 = vector.shape_cast %518 : vector<1x2x4xf32> to vector<2x4xf32>
    %520 = vector.shape_cast %514 : vector<2x4xf32> to vector<1x2x4xf32>
    tpu.vector_store %arg15[%517, %c0_171, %c0_172], %520 {strides = array<i32>} : memref<16x2x4xf32, #tpu.memory_space<vmem>>, vector<1x2x4xf32>,
    %521 = vector.extract_strided_slice %436 {offsets = [0, 24], sizes = [2, 8], strides = [1, 1]} : vector<2x32xf32> to vector<2x8xf32>
    %522 = vector.shape_cast %521 : vector<2x8xf32> to vector<2x1x8xf32>
    %523 = vector.extract_strided_slice %0 {offsets = [3, 0, 0, 0], sizes = [1, 2, 4, 8], strides = [1, 1, 1, 1]} : vector<4x2x4x8xf32> to vector<1x2x4x8xf32>
    %524 = vector.shape_cast %523 : vector<1x2x4x8xf32> to vector<2x4x8xf32>
    "tpu.trace_start"() <{level = 10 : i32, message = "bqd,bkd->bqk"}> : () -> ()
    %cst_173 = arith.constant dense<0.000000e+00> : vector<2x1x4xf32>
    %525 = tpu.matmul %522, %524, %cst_173 {dimension_numbers = #tpu.dot_dimension_numbers<[2], [2], [1], [1], [0, 0, 0, 1, 1, 1], [0], [0]>} : vector<2x1x8xf32>, vector<2x4x8xf32>, vector<2x1x4xf32> -> vector<2x1x4xf32>
    "tpu.trace_stop"() : () -> ()
    %cst_174 = arith.constant 0.353553385 : f32
    %526 = vector.broadcast %cst_174 : f32 to vector<2x1x4xf32>
    %527 = arith.mulf %525, %526 : vector<2x1x4xf32>
    %cst_175 = arith.constant dense<0xFF800000> : vector<2x1xf32>
    %528 = vector.multi_reduction <maximumf>, %527, %cst_175 [2] : vector<2x1x4xf32> to vector<2x1xf32>
    %529 = vector.shape_cast %528 : vector<2x1xf32> to vector<2x1x1xf32>
    %530 = vector.broadcast %529 : vector<2x1x1xf32> to vector<2x1x4xf32>
    %531 = arith.subf %527, %530 : vector<2x1x4xf32>
    %532 = math.exp %531 : vector<2x1x4xf32>
    %cst_176 = arith.constant dense<0.000000e+00> : vector<2x1xf32>
    %533 = vector.multi_reduction <add>, %532, %cst_176 [2] : vector<2x1x4xf32> to vector<2x1xf32>
    %534 = vector.shape_cast %533 : vector<2x1xf32> to vector<2x1x1xf32>
    %535 = tpu.reciprocal %534 : vector<2x1x1xf32> -> vector<2x1x1xf32>
    %536 = vector.broadcast %535 : vector<2x1x1xf32> to vector<2x1x4xf32>
    %537 = arith.mulf %532, %536 : vector<2x1x4xf32>
    %538 = vector.extract_strided_slice %1 {offsets = [3, 0, 0, 0], sizes = [1, 2, 4, 8], strides = [1, 1, 1, 1]} : vector<4x2x4x8xf32> to vector<1x2x4x8xf32>
    %539 = vector.shape_cast %538 : vector<1x2x4x8xf32> to vector<2x4x8xf32>
    "tpu.trace_start"() <{level = 10 : i32, message = "bqk,bkd->bqd"}> : () -> ()
    %cst_177 = arith.constant dense<0.000000e+00> : vector<2x1x8xf32>
    %540 = tpu.matmul %537, %539, %cst_177 {dimension_numbers = #tpu.dot_dimension_numbers<[2], [1], [1], [2], [0, 0, 0, 1, 1, 2], [0], [0]>} : vector<2x1x4xf32>, vector<2x4x8xf32>, vector<2x1x8xf32> -> vector<2x1x8xf32>
    "tpu.trace_stop"() : () -> ()
    %541 = vector.shape_cast %540 : vector<2x1x8xf32> to vector<2x8xf32>
    %542 = vector.shape_cast %537 : vector<2x1x4xf32> to vector<2x4xf32>
    %c4_i32_178 = arith.constant 4 : i32
    %543 = arith.muli %c2_i32_139, %c4_i32_178 : i32
    %c3_i32_179 = arith.constant 3 : i32
    %544 = arith.addi %543, %c3_i32_179 : i32
    %545 = arith.index_cast %544 : i32 to index
    %c0_180 = arith.constant 0 : index
    %c0_181 = arith.constant 0 : index
    %546 = vector.load %arg15[%545, %c0_180, %c0_181] : memref<16x2x4xf32, #tpu.memory_space<vmem>>, vector<1x2x4xf32>
    %547 = vector.shape_cast %546 : vector<1x2x4xf32> to vector<2x4xf32>
    %548 = vector.shape_cast %542 : vector<2x4xf32> to vector<1x2x4xf32>
    tpu.vector_store %arg15[%545, %c0_180, %c0_181], %548 {strides = array<i32>} : memref<16x2x4xf32, #tpu.memory_space<vmem>>, vector<1x2x4xf32>,
    %549 = tpu.concatenate %457, %485, %513, %541 in 1 : vector<2x8xf32>, vector<2x8xf32>, vector<2x8xf32>, vector<2x8xf32> -> vector<2x32xf32>
    %cst_182 = arith.constant dense<0.000000e+00> : vector<2x32xf32>
    %550 = tpu.matmul %549, %6, %cst_182 {dimension_numbers = #tpu.dot_dimension_numbers<[1], [0], [0], [1], [0, 0, 1, 1], [], []>} : vector<2x32xf32>, vector<32x32xf32>, vector<2x32xf32> -> vector<2x32xf32>
    %cst_183 = arith.constant dense<0.000000e+00> : vector<2x256xf32>
    %551 = tpu.matmul %435, %7, %cst_183 {dimension_numbers = #tpu.dot_dimension_numbers<[1], [0], [0], [1], [0, 0, 1, 1], [], []>} : vector<2x32xf32>, vector<32x256xf32>, vector<2x256xf32> -> vector<2x256xf32>
    %cst_184 = arith.constant dense<0.000000e+00> : vector<2x256xf32>
    %552 = tpu.matmul %550, %8, %cst_184 {dimension_numbers = #tpu.dot_dimension_numbers<[1], [0], [0], [1], [0, 0, 1, 1], [], []>} : vector<2x32xf32>, vector<32x256xf32>, vector<2x256xf32> -> vector<2x256xf32>
    %553 = arith.addf %551, %552 : vector<2x256xf32>
    %cst_185 = arith.constant dense<0.000000e+00> : vector<2x256xf32>
    %554 = tpu.matmul %388, %9, %cst_185 {dimension_numbers = #tpu.dot_dimension_numbers<[1], [0], [0], [1], [0, 0, 1, 1], [], []>} : vector<2x64xf32>, vector<64x256xf32>, vector<2x256xf32> -> vector<2x256xf32>
    %555 = arith.addf %553, %554 : vector<2x256xf32>
    %556 = vector.broadcast %10 : vector<1x256xf32> to vector<2x256xf32>
    %557 = arith.addf %555, %556 : vector<2x256xf32>
    %558 = vector.extract_strided_slice %557 {offsets = [0, 0], sizes = [2, 64], strides = [1, 1]} : vector<2x256xf32> to vector<2x64xf32>
    %559 = arith.negf %558 : vector<2x64xf32>
    %560 = math.exp %559 : vector<2x64xf32>
    %cst_186 = arith.constant 1.000000e+00 : f32
    %561 = vector.broadcast %cst_186 : f32 to vector<2x64xf32>
    %562 = arith.addf %561, %560 : vector<2x64xf32>
    %563 = arith.divf %561, %562 : vector<2x64xf32>
    %564 = vector.extract_strided_slice %557 {offsets = [0, 64], sizes = [2, 64], strides = [1, 1]} : vector<2x256xf32> to vector<2x64xf32>
    %565 = arith.negf %564 : vector<2x64xf32>
    %566 = math.exp %565 : vector<2x64xf32>
    %cst_187 = arith.constant 1.000000e+00 : f32
    %567 = vector.broadcast %cst_187 : f32 to vector<2x64xf32>
    %568 = arith.addf %567, %566 : vector<2x64xf32>
    %569 = arith.divf %567, %568 : vector<2x64xf32>
    %570 = vector.extract_strided_slice %557 {offsets = [0, 128], sizes = [2, 64], strides = [1, 1]} : vector<2x256xf32> to vector<2x64xf32>
    %571 = math.tanh %570 : vector<2x64xf32>
    %572 = vector.extract_strided_slice %557 {offsets = [0, 192], sizes = [2, 64], strides = [1, 1]} : vector<2x256xf32> to vector<2x64xf32>
    %573 = arith.negf %572 : vector<2x64xf32>
    %574 = math.exp %573 : vector<2x64xf32>
    %cst_188 = arith.constant 1.000000e+00 : f32
    %575 = vector.broadcast %cst_188 : f32 to vector<2x64xf32>
    %576 = arith.addf %575, %574 : vector<2x64xf32>
    %577 = arith.divf %575, %576 : vector<2x64xf32>
    %578 = arith.mulf %569, %386 : vector<2x64xf32>
    %579 = arith.mulf %563, %571 : vector<2x64xf32>
    %580 = arith.addf %578, %579 : vector<2x64xf32>
    %581 = math.tanh %580 : vector<2x64xf32>
    %582 = arith.mulf %577, %581 : vector<2x64xf32>
    %cst_189 = arith.constant dense<0.000000e+00> : vector<2x16xf32>
    %583 = tpu.matmul %582, %11, %cst_189 {dimension_numbers = #tpu.dot_dimension_numbers<[1], [0], [0], [1], [0, 0, 1, 1], [], []>} : vector<2x64xf32>, vector<64x16xf32>, vector<2x16xf32> -> vector<2x16xf32>
    %584 = vector.broadcast %12 : vector<1x16xf32> to vector<2x16xf32>
    %585 = arith.addf %583, %584 : vector<2x16xf32>
    %cst_190 = arith.constant dense<0xFF800000> : vector<2xf32>
    %586 = vector.multi_reduction <maximumf>, %585, %cst_190 [1] : vector<2x16xf32> to vector<2xf32>
    %587 = vector.shape_cast %586 : vector<2xf32> to vector<2x1xf32>
    %588 = vector.broadcast %587 : vector<2x1xf32> to vector<2x16xf32>
    %589 = arith.subf %585, %588 : vector<2x16xf32>
    %590 = math.exp %589 : vector<2x16xf32>
    %cst_191 = arith.constant dense<0.000000e+00> : vector<2xf32>
    %591 = vector.multi_reduction <add>, %590, %cst_191 [1] : vector<2x16xf32> to vector<2xf32>
    %592 = vector.shape_cast %591 : vector<2xf32> to vector<2x1xf32>
    %593 = tpu.reciprocal %592 : vector<2x1xf32> -> vector<2x1xf32>
    %594 = vector.broadcast %593 : vector<2x1xf32> to vector<2x16xf32>
    %595 = arith.mulf %590, %594 : vector<2x16xf32>
    %596 = arith.index_cast %c2_i32_139 : i32 to index
    %c0_192 = arith.constant 0 : index
    %c0_193 = arith.constant 0 : index
    %597 = vector.load %arg14[%596, %c0_192, %c0_193] : memref<4x2x16xf32, #tpu.memory_space<vmem>>, vector<1x2x16xf32>
    %598 = vector.shape_cast %597 : vector<1x2x16xf32> to vector<2x16xf32>
    %599 = vector.shape_cast %595 : vector<2x16xf32> to vector<1x2x16xf32>
    tpu.vector_store %arg14[%596, %c0_192, %c0_193], %599 {strides = array<i32>} : memref<4x2x16xf32, #tpu.memory_space<vmem>>, vector<1x2x16xf32>,
    %c3_i32_194 = arith.constant 3 : i32
    %cst_195 = arith.constant dense<0.000000e+00> : vector<2x128xf32>
    %600 = tpu.matmul %595, %2, %cst_195 {dimension_numbers = #tpu.dot_dimension_numbers<[1], [0], [0], [1], [0, 0, 1, 1], [], []>} : vector<2x16xf32>, vector<16x128xf32>, vector<2x128xf32> -> vector<2x128xf32>
    %cst_196 = arith.constant dense<0.000000e+00> : vector<2x128xf32>
    %601 = tpu.matmul %435, %3, %cst_196 {dimension_numbers = #tpu.dot_dimension_numbers<[1], [0], [0], [1], [0, 0, 1, 1], [], []>} : vector<2x32xf32>, vector<32x128xf32>, vector<2x128xf32> -> vector<2x128xf32>
    %602 = arith.addf %600, %601 : vector<2x128xf32>
    %603 = vector.broadcast %4 : vector<1x128xf32> to vector<2x128xf32>
    %604 = arith.addf %602, %603 : vector<2x128xf32>
    %605 = vector.extract_strided_slice %604 {offsets = [0, 0], sizes = [2, 32], strides = [1, 1]} : vector<2x128xf32> to vector<2x32xf32>
    %606 = arith.negf %605 : vector<2x32xf32>
    %607 = math.exp %606 : vector<2x32xf32>
    %cst_197 = arith.constant 1.000000e+00 : f32
    %608 = vector.broadcast %cst_197 : f32 to vector<2x32xf32>
    %609 = arith.addf %608, %607 : vector<2x32xf32>
    %610 = arith.divf %608, %609 : vector<2x32xf32>
    %611 = vector.extract_strided_slice %604 {offsets = [0, 32], sizes = [2, 32], strides = [1, 1]} : vector<2x128xf32> to vector<2x32xf32>
    %612 = arith.negf %611 : vector<2x32xf32>
    %613 = math.exp %612 : vector<2x32xf32>
    %cst_198 = arith.constant 1.000000e+00 : f32
    %614 = vector.broadcast %cst_198 : f32 to vector<2x32xf32>
    %615 = arith.addf %614, %613 : vector<2x32xf32>
    %616 = arith.divf %614, %615 : vector<2x32xf32>
    %617 = vector.extract_strided_slice %604 {offsets = [0, 64], sizes = [2, 32], strides = [1, 1]} : vector<2x128xf32> to vector<2x32xf32>
    %618 = math.tanh %617 : vector<2x32xf32>
    %619 = vector.extract_strided_slice %604 {offsets = [0, 96], sizes = [2, 32], strides = [1, 1]} : vector<2x128xf32> to vector<2x32xf32>
    %620 = arith.negf %619 : vector<2x32xf32>
    %621 = math.exp %620 : vector<2x32xf32>
    %cst_199 = arith.constant 1.000000e+00 : f32
    %622 = vector.broadcast %cst_199 : f32 to vector<2x32xf32>
    %623 = arith.addf %622, %621 : vector<2x32xf32>
    %624 = arith.divf %622, %623 : vector<2x32xf32>
    %625 = arith.mulf %616, %433 : vector<2x32xf32>
    %626 = arith.mulf %610, %618 : vector<2x32xf32>
    %627 = arith.addf %625, %626 : vector<2x32xf32>
    %628 = math.tanh %627 : vector<2x32xf32>
    %629 = arith.mulf %624, %628 : vector<2x32xf32>
    %cst_200 = arith.constant dense<0.000000e+00> : vector<2x32xf32>
    %630 = tpu.matmul %629, %5, %cst_200 {dimension_numbers = #tpu.dot_dimension_numbers<[1], [0], [0], [1], [0, 0, 1, 1], [], []>} : vector<2x32xf32>, vector<32x32xf32>, vector<2x32xf32> -> vector<2x32xf32>
    %631 = vector.extract_strided_slice %630 {offsets = [0, 0], sizes = [2, 8], strides = [1, 1]} : vector<2x32xf32> to vector<2x8xf32>
    %632 = vector.shape_cast %631 : vector<2x8xf32> to vector<2x1x8xf32>
    %633 = vector.extract_strided_slice %0 {offsets = [0, 0, 0, 0], sizes = [1, 2, 4, 8], strides = [1, 1, 1, 1]} : vector<4x2x4x8xf32> to vector<1x2x4x8xf32>
    %634 = vector.shape_cast %633 : vector<1x2x4x8xf32> to vector<2x4x8xf32>
    "tpu.trace_start"() <{level = 10 : i32, message = "bqd,bkd->bqk"}> : () -> ()
    %cst_201 = arith.constant dense<0.000000e+00> : vector<2x1x4xf32>
    %635 = tpu.matmul %632, %634, %cst_201 {dimension_numbers = #tpu.dot_dimension_numbers<[2], [2], [1], [1], [0, 0, 0, 1, 1, 1], [0], [0]>} : vector<2x1x8xf32>, vector<2x4x8xf32>, vector<2x1x4xf32> -> vector<2x1x4xf32>
    "tpu.trace_stop"() : () -> ()
    %cst_202 = arith.constant 0.353553385 : f32
    %636 = vector.broadcast %cst_202 : f32 to vector<2x1x4xf32>
    %637 = arith.mulf %635, %636 : vector<2x1x4xf32>
    %cst_203 = arith.constant dense<0xFF800000> : vector<2x1xf32>
    %638 = vector.multi_reduction <maximumf>, %637, %cst_203 [2] : vector<2x1x4xf32> to vector<2x1xf32>
    %639 = vector.shape_cast %638 : vector<2x1xf32> to vector<2x1x1xf32>
    %640 = vector.broadcast %639 : vector<2x1x1xf32> to vector<2x1x4xf32>
    %641 = arith.subf %637, %640 : vector<2x1x4xf32>
    %642 = math.exp %641 : vector<2x1x4xf32>
    %cst_204 = arith.constant dense<0.000000e+00> : vector<2x1xf32>
    %643 = vector.multi_reduction <add>, %642, %cst_204 [2] : vector<2x1x4xf32> to vector<2x1xf32>
    %644 = vector.shape_cast %643 : vector<2x1xf32> to vector<2x1x1xf32>
    %645 = tpu.reciprocal %644 : vector<2x1x1xf32> -> vector<2x1x1xf32>
    %646 = vector.broadcast %645 : vector<2x1x1xf32> to vector<2x1x4xf32>
    %647 = arith.mulf %642, %646 : vector<2x1x4xf32>
    %648 = vector.extract_strided_slice %1 {offsets = [0, 0, 0, 0], sizes = [1, 2, 4, 8], strides = [1, 1, 1, 1]} : vector<4x2x4x8xf32> to vector<1x2x4x8xf32>
    %649 = vector.shape_cast %648 : vector<1x2x4x8xf32> to vector<2x4x8xf32>
    "tpu.trace_start"() <{level = 10 : i32, message = "bqk,bkd->bqd"}> : () -> ()
    %cst_205 = arith.constant dense<0.000000e+00> : vector<2x1x8xf32>
    %650 = tpu.matmul %647, %649, %cst_205 {dimension_numbers = #tpu.dot_dimension_numbers<[2], [1], [1], [2], [0, 0, 0, 1, 1, 2], [0], [0]>} : vector<2x1x4xf32>, vector<2x4x8xf32>, vector<2x1x8xf32> -> vector<2x1x8xf32>
    "tpu.trace_stop"() : () -> ()
    %651 = vector.shape_cast %650 : vector<2x1x8xf32> to vector<2x8xf32>
    %652 = vector.shape_cast %647 : vector<2x1x4xf32> to vector<2x4xf32>
    %c4_i32_206 = arith.constant 4 : i32
    %653 = arith.muli %c3_i32_194, %c4_i32_206 : i32
    %c0_i32_207 = arith.constant 0 : i32
    %654 = arith.addi %653, %c0_i32_207 : i32
    %655 = arith.index_cast %654 : i32 to index
    %c0_208 = arith.constant 0 : index
    %c0_209 = arith.constant 0 : index
    %656 = vector.load %arg15[%655, %c0_208, %c0_209] : memref<16x2x4xf32, #tpu.memory_space<vmem>>, vector<1x2x4xf32>
    %657 = vector.shape_cast %656 : vector<1x2x4xf32> to vector<2x4xf32>
    %658 = vector.shape_cast %652 : vector<2x4xf32> to vector<1x2x4xf32>
    tpu.vector_store %arg15[%655, %c0_208, %c0_209], %658 {strides = array<i32>} : memref<16x2x4xf32, #tpu.memory_space<vmem>>, vector<1x2x4xf32>,
    %659 = vector.extract_strided_slice %630 {offsets = [0, 8], sizes = [2, 8], strides = [1, 1]} : vector<2x32xf32> to vector<2x8xf32>
    %660 = vector.shape_cast %659 : vector<2x8xf32> to vector<2x1x8xf32>
    %661 = vector.extract_strided_slice %0 {offsets = [1, 0, 0, 0], sizes = [1, 2, 4, 8], strides = [1, 1, 1, 1]} : vector<4x2x4x8xf32> to vector<1x2x4x8xf32>
    %662 = vector.shape_cast %661 : vector<1x2x4x8xf32> to vector<2x4x8xf32>
    "tpu.trace_start"() <{level = 10 : i32, message = "bqd,bkd->bqk"}> : () -> ()
    %cst_210 = arith.constant dense<0.000000e+00> : vector<2x1x4xf32>
    %663 = tpu.matmul %660, %662, %cst_210 {dimension_numbers = #tpu.dot_dimension_numbers<[2], [2], [1], [1], [0, 0, 0, 1, 1, 1], [0], [0]>} : vector<2x1x8xf32>, vector<2x4x8xf32>, vector<2x1x4xf32> -> vector<2x1x4xf32>
    "tpu.trace_stop"() : () -> ()
    %cst_211 = arith.constant 0.353553385 : f32
    %664 = vector.broadcast %cst_211 : f32 to vector<2x1x4xf32>
    %665 = arith.mulf %663, %664 : vector<2x1x4xf32>
    %cst_212 = arith.constant dense<0xFF800000> : vector<2x1xf32>
    %666 = vector.multi_reduction <maximumf>, %665, %cst_212 [2] : vector<2x1x4xf32> to vector<2x1xf32>
    %667 = vector.shape_cast %666 : vector<2x1xf32> to vector<2x1x1xf32>
    %668 = vector.broadcast %667 : vector<2x1x1xf32> to vector<2x1x4xf32>
    %669 = arith.subf %665, %668 : vector<2x1x4xf32>
    %670 = math.exp %669 : vector<2x1x4xf32>
    %cst_213 = arith.constant dense<0.000000e+00> : vector<2x1xf32>
    %671 = vector.multi_reduction <add>, %670, %cst_213 [2] : vector<2x1x4xf32> to vector<2x1xf32>
    %672 = vector.shape_cast %671 : vector<2x1xf32> to vector<2x1x1xf32>
    %673 = tpu.reciprocal %672 : vector<2x1x1xf32> -> vector<2x1x1xf32>
    %674 = vector.broadcast %673 : vector<2x1x1xf32> to vector<2x1x4xf32>
    %675 = arith.mulf %670, %674 : vector<2x1x4xf32>
    %676 = vector.extract_strided_slice %1 {offsets = [1, 0, 0, 0], sizes = [1, 2, 4, 8], strides = [1, 1, 1, 1]} : vector<4x2x4x8xf32> to vector<1x2x4x8xf32>
    %677 = vector.shape_cast %676 : vector<1x2x4x8xf32> to vector<2x4x8xf32>
    "tpu.trace_start"() <{level = 10 : i32, message = "bqk,bkd->bqd"}> : () -> ()
    %cst_214 = arith.constant dense<0.000000e+00> : vector<2x1x8xf32>
    %678 = tpu.matmul %675, %677, %cst_214 {dimension_numbers = #tpu.dot_dimension_numbers<[2], [1], [1], [2], [0, 0, 0, 1, 1, 2], [0], [0]>} : vector<2x1x4xf32>, vector<2x4x8xf32>, vector<2x1x8xf32> -> vector<2x1x8xf32>
    "tpu.trace_stop"() : () -> ()
    %679 = vector.shape_cast %678 : vector<2x1x8xf32> to vector<2x8xf32>
    %680 = vector.shape_cast %675 : vector<2x1x4xf32> to vector<2x4xf32>
    %c4_i32_215 = arith.constant 4 : i32
    %681 = arith.muli %c3_i32_194, %c4_i32_215 : i32
    %c1_i32_216 = arith.constant 1 : i32
    %682 = arith.addi %681, %c1_i32_216 : i32
    %683 = arith.index_cast %682 : i32 to index
    %c0_217 = arith.constant 0 : index
    %c0_218 = arith.constant 0 : index
    %684 = vector.load %arg15[%683, %c0_217, %c0_218] : memref<16x2x4xf32, #tpu.memory_space<vmem>>, vector<1x2x4xf32>
    %685 = vector.shape_cast %684 : vector<1x2x4xf32> to vector<2x4xf32>
    %686 = vector.shape_cast %680 : vector<2x4xf32> to vector<1x2x4xf32>
    tpu.vector_store %arg15[%683, %c0_217, %c0_218], %686 {strides = array<i32>} : memref<16x2x4xf32, #tpu.memory_space<vmem>>, vector<1x2x4xf32>,
    %687 = vector.extract_strided_slice %630 {offsets = [0, 16], sizes = [2, 8], strides = [1, 1]} : vector<2x32xf32> to vector<2x8xf32>
    %688 = vector.shape_cast %687 : vector<2x8xf32> to vector<2x1x8xf32>
    %689 = vector.extract_strided_slice %0 {offsets = [2, 0, 0, 0], sizes = [1, 2, 4, 8], strides = [1, 1, 1, 1]} : vector<4x2x4x8xf32> to vector<1x2x4x8xf32>
    %690 = vector.shape_cast %689 : vector<1x2x4x8xf32> to vector<2x4x8xf32>
    "tpu.trace_start"() <{level = 10 : i32, message = "bqd,bkd->bqk"}> : () -> ()
    %cst_219 = arith.constant dense<0.000000e+00> : vector<2x1x4xf32>
    %691 = tpu.matmul %688, %690, %cst_219 {dimension_numbers = #tpu.dot_dimension_numbers<[2], [2], [1], [1], [0, 0, 0, 1, 1, 1], [0], [0]>} : vector<2x1x8xf32>, vector<2x4x8xf32>, vector<2x1x4xf32> -> vector<2x1x4xf32>
    "tpu.trace_stop"() : () -> ()
    %cst_220 = arith.constant 0.353553385 : f32
    %692 = vector.broadcast %cst_220 : f32 to vector<2x1x4xf32>
    %693 = arith.mulf %691, %692 : vector<2x1x4xf32>
    %cst_221 = arith.constant dense<0xFF800000> : vector<2x1xf32>
    %694 = vector.multi_reduction <maximumf>, %693, %cst_221 [2] : vector<2x1x4xf32> to vector<2x1xf32>
    %695 = vector.shape_cast %694 : vector<2x1xf32> to vector<2x1x1xf32>
    %696 = vector.broadcast %695 : vector<2x1x1xf32> to vector<2x1x4xf32>
    %697 = arith.subf %693, %696 : vector<2x1x4xf32>
    %698 = math.exp %697 : vector<2x1x4xf32>
    %cst_222 = arith.constant dense<0.000000e+00> : vector<2x1xf32>
    %699 = vector.multi_reduction <add>, %698, %cst_222 [2] : vector<2x1x4xf32> to vector<2x1xf32>
    %700 = vector.shape_cast %699 : vector<2x1xf32> to vector<2x1x1xf32>
    %701 = tpu.reciprocal %700 : vector<2x1x1xf32> -> vector<2x1x1xf32>
    %702 = vector.broadcast %701 : vector<2x1x1xf32> to vector<2x1x4xf32>
    %703 = arith.mulf %698, %702 : vector<2x1x4xf32>
    %704 = vector.extract_strided_slice %1 {offsets = [2, 0, 0, 0], sizes = [1, 2, 4, 8], strides = [1, 1, 1, 1]} : vector<4x2x4x8xf32> to vector<1x2x4x8xf32>
    %705 = vector.shape_cast %704 : vector<1x2x4x8xf32> to vector<2x4x8xf32>
    "tpu.trace_start"() <{level = 10 : i32, message = "bqk,bkd->bqd"}> : () -> ()
    %cst_223 = arith.constant dense<0.000000e+00> : vector<2x1x8xf32>
    %706 = tpu.matmul %703, %705, %cst_223 {dimension_numbers = #tpu.dot_dimension_numbers<[2], [1], [1], [2], [0, 0, 0, 1, 1, 2], [0], [0]>} : vector<2x1x4xf32>, vector<2x4x8xf32>, vector<2x1x8xf32> -> vector<2x1x8xf32>
    "tpu.trace_stop"() : () -> ()
    %707 = vector.shape_cast %706 : vector<2x1x8xf32> to vector<2x8xf32>
    %708 = vector.shape_cast %703 : vector<2x1x4xf32> to vector<2x4xf32>
    %c4_i32_224 = arith.constant 4 : i32
    %709 = arith.muli %c3_i32_194, %c4_i32_224 : i32
    %c2_i32_225 = arith.constant 2 : i32
    %710 = arith.addi %709, %c2_i32_225 : i32
    %711 = arith.index_cast %710 : i32 to index
    %c0_226 = arith.constant 0 : index
    %c0_227 = arith.constant 0 : index
    %712 = vector.load %arg15[%711, %c0_226, %c0_227] : memref<16x2x4xf32, #tpu.memory_space<vmem>>, vector<1x2x4xf32>
    %713 = vector.shape_cast %712 : vector<1x2x4xf32> to vector<2x4xf32>
    %714 = vector.shape_cast %708 : vector<2x4xf32> to vector<1x2x4xf32>
    tpu.vector_store %arg15[%711, %c0_226, %c0_227], %714 {strides = array<i32>} : memref<16x2x4xf32, #tpu.memory_space<vmem>>, vector<1x2x4xf32>,
    %715 = vector.extract_strided_slice %630 {offsets = [0, 24], sizes = [2, 8], strides = [1, 1]} : vector<2x32xf32> to vector<2x8xf32>
    %716 = vector.shape_cast %715 : vector<2x8xf32> to vector<2x1x8xf32>
    %717 = vector.extract_strided_slice %0 {offsets = [3, 0, 0, 0], sizes = [1, 2, 4, 8], strides = [1, 1, 1, 1]} : vector<4x2x4x8xf32> to vector<1x2x4x8xf32>
    %718 = vector.shape_cast %717 : vector<1x2x4x8xf32> to vector<2x4x8xf32>
    "tpu.trace_start"() <{level = 10 : i32, message = "bqd,bkd->bqk"}> : () -> ()
    %cst_228 = arith.constant dense<0.000000e+00> : vector<2x1x4xf32>
    %719 = tpu.matmul %716, %718, %cst_228 {dimension_numbers = #tpu.dot_dimension_numbers<[2], [2], [1], [1], [0, 0, 0, 1, 1, 1], [0], [0]>} : vector<2x1x8xf32>, vector<2x4x8xf32>, vector<2x1x4xf32> -> vector<2x1x4xf32>
    "tpu.trace_stop"() : () -> ()
    %cst_229 = arith.constant 0.353553385 : f32
    %720 = vector.broadcast %cst_229 : f32 to vector<2x1x4xf32>
    %721 = arith.mulf %719, %720 : vector<2x1x4xf32>
    %cst_230 = arith.constant dense<0xFF800000> : vector<2x1xf32>
    %722 = vector.multi_reduction <maximumf>, %721, %cst_230 [2] : vector<2x1x4xf32> to vector<2x1xf32>
    %723 = vector.shape_cast %722 : vector<2x1xf32> to vector<2x1x1xf32>
    %724 = vector.broadcast %723 : vector<2x1x1xf32> to vector<2x1x4xf32>
    %725 = arith.subf %721, %724 : vector<2x1x4xf32>
    %726 = math.exp %725 : vector<2x1x4xf32>
    %cst_231 = arith.constant dense<0.000000e+00> : vector<2x1xf32>
    %727 = vector.multi_reduction <add>, %726, %cst_231 [2] : vector<2x1x4xf32> to vector<2x1xf32>
    %728 = vector.shape_cast %727 : vector<2x1xf32> to vector<2x1x1xf32>
    %729 = tpu.reciprocal %728 : vector<2x1x1xf32> -> vector<2x1x1xf32>
    %730 = vector.broadcast %729 : vector<2x1x1xf32> to vector<2x1x4xf32>
    %731 = arith.mulf %726, %730 : vector<2x1x4xf32>
    %732 = vector.extract_strided_slice %1 {offsets = [3, 0, 0, 0], sizes = [1, 2, 4, 8], strides = [1, 1, 1, 1]} : vector<4x2x4x8xf32> to vector<1x2x4x8xf32>
    %733 = vector.shape_cast %732 : vector<1x2x4x8xf32> to vector<2x4x8xf32>
    "tpu.trace_start"() <{level = 10 : i32, message = "bqk,bkd->bqd"}> : () -> ()
    %cst_232 = arith.constant dense<0.000000e+00> : vector<2x1x8xf32>
    %734 = tpu.matmul %731, %733, %cst_232 {dimension_numbers = #tpu.dot_dimension_numbers<[2], [1], [1], [2], [0, 0, 0, 1, 1, 2], [0], [0]>} : vector<2x1x4xf32>, vector<2x4x8xf32>, vector<2x1x8xf32> -> vector<2x1x8xf32>
    "tpu.trace_stop"() : () -> ()
    %735 = vector.shape_cast %734 : vector<2x1x8xf32> to vector<2x8xf32>
    %736 = vector.shape_cast %731 : vector<2x1x4xf32> to vector<2x4xf32>
    %c4_i32_233 = arith.constant 4 : i32
    %737 = arith.muli %c3_i32_194, %c4_i32_233 : i32
    %c3_i32_234 = arith.constant 3 : i32
    %738 = arith.addi %737, %c3_i32_234 : i32
    %739 = arith.index_cast %738 : i32 to index
    %c0_235 = arith.constant 0 : index
    %c0_236 = arith.constant 0 : index
    %740 = vector.load %arg15[%739, %c0_235, %c0_236] : memref<16x2x4xf32, #tpu.memory_space<vmem>>, vector<1x2x4xf32>
    %741 = vector.shape_cast %740 : vector<1x2x4xf32> to vector<2x4xf32>
    %742 = vector.shape_cast %736 : vector<2x4xf32> to vector<1x2x4xf32>
    tpu.vector_store %arg15[%739, %c0_235, %c0_236], %742 {strides = array<i32>} : memref<16x2x4xf32, #tpu.memory_space<vmem>>, vector<1x2x4xf32>,
    %743 = tpu.concatenate %651, %679, %707, %735 in 1 : vector<2x8xf32>, vector<2x8xf32>, vector<2x8xf32>, vector<2x8xf32> -> vector<2x32xf32>
    %cst_237 = arith.constant dense<0.000000e+00> : vector<2x32xf32>
    %744 = tpu.matmul %743, %6, %cst_237 {dimension_numbers = #tpu.dot_dimension_numbers<[1], [0], [0], [1], [0, 0, 1, 1], [], []>} : vector<2x32xf32>, vector<32x32xf32>, vector<2x32xf32> -> vector<2x32xf32>
    %cst_238 = arith.constant dense<0.000000e+00> : vector<2x256xf32>
    %745 = tpu.matmul %629, %7, %cst_238 {dimension_numbers = #tpu.dot_dimension_numbers<[1], [0], [0], [1], [0, 0, 1, 1], [], []>} : vector<2x32xf32>, vector<32x256xf32>, vector<2x256xf32> -> vector<2x256xf32>
    %cst_239 = arith.constant dense<0.000000e+00> : vector<2x256xf32>
    %746 = tpu.matmul %744, %8, %cst_239 {dimension_numbers = #tpu.dot_dimension_numbers<[1], [0], [0], [1], [0, 0, 1, 1], [], []>} : vector<2x32xf32>, vector<32x256xf32>, vector<2x256xf32> -> vector<2x256xf32>
    %747 = arith.addf %745, %746 : vector<2x256xf32>
    %cst_240 = arith.constant dense<0.000000e+00> : vector<2x256xf32>
    %748 = tpu.matmul %582, %9, %cst_240 {dimension_numbers = #tpu.dot_dimension_numbers<[1], [0], [0], [1], [0, 0, 1, 1], [], []>} : vector<2x64xf32>, vector<64x256xf32>, vector<2x256xf32> -> vector<2x256xf32>
    %749 = arith.addf %747, %748 : vector<2x256xf32>
    %750 = vector.broadcast %10 : vector<1x256xf32> to vector<2x256xf32>
    %751 = arith.addf %749, %750 : vector<2x256xf32>
    %752 = vector.extract_strided_slice %751 {offsets = [0, 0], sizes = [2, 64], strides = [1, 1]} : vector<2x256xf32> to vector<2x64xf32>
    %753 = arith.negf %752 : vector<2x64xf32>
    %754 = math.exp %753 : vector<2x64xf32>
    %cst_241 = arith.constant 1.000000e+00 : f32
    %755 = vector.broadcast %cst_241 : f32 to vector<2x64xf32>
    %756 = arith.addf %755, %754 : vector<2x64xf32>
    %757 = arith.divf %755, %756 : vector<2x64xf32>
    %758 = vector.extract_strided_slice %751 {offsets = [0, 64], sizes = [2, 64], strides = [1, 1]} : vector<2x256xf32> to vector<2x64xf32>
    %759 = arith.negf %758 : vector<2x64xf32>
    %760 = math.exp %759 : vector<2x64xf32>
    %cst_242 = arith.constant 1.000000e+00 : f32
    %761 = vector.broadcast %cst_242 : f32 to vector<2x64xf32>
    %762 = arith.addf %761, %760 : vector<2x64xf32>
    %763 = arith.divf %761, %762 : vector<2x64xf32>
    %764 = vector.extract_strided_slice %751 {offsets = [0, 128], sizes = [2, 64], strides = [1, 1]} : vector<2x256xf32> to vector<2x64xf32>
    %765 = math.tanh %764 : vector<2x64xf32>
    %766 = vector.extract_strided_slice %751 {offsets = [0, 192], sizes = [2, 64], strides = [1, 1]} : vector<2x256xf32> to vector<2x64xf32>
    %767 = arith.negf %766 : vector<2x64xf32>
    %768 = math.exp %767 : vector<2x64xf32>
    %cst_243 = arith.constant 1.000000e+00 : f32
    %769 = vector.broadcast %cst_243 : f32 to vector<2x64xf32>
    %770 = arith.addf %769, %768 : vector<2x64xf32>
    %771 = arith.divf %769, %770 : vector<2x64xf32>
    %772 = arith.mulf %763, %580 : vector<2x64xf32>
    %773 = arith.mulf %757, %765 : vector<2x64xf32>
    %774 = arith.addf %772, %773 : vector<2x64xf32>
    %775 = math.tanh %774 : vector<2x64xf32>
    %776 = arith.mulf %771, %775 : vector<2x64xf32>
    %cst_244 = arith.constant dense<0.000000e+00> : vector<2x16xf32>
    %777 = tpu.matmul %776, %11, %cst_244 {dimension_numbers = #tpu.dot_dimension_numbers<[1], [0], [0], [1], [0, 0, 1, 1], [], []>} : vector<2x64xf32>, vector<64x16xf32>, vector<2x16xf32> -> vector<2x16xf32>
    %778 = vector.broadcast %12 : vector<1x16xf32> to vector<2x16xf32>
    %779 = arith.addf %777, %778 : vector<2x16xf32>
    %cst_245 = arith.constant dense<0xFF800000> : vector<2xf32>
    %780 = vector.multi_reduction <maximumf>, %779, %cst_245 [1] : vector<2x16xf32> to vector<2xf32>
    %781 = vector.shape_cast %780 : vector<2xf32> to vector<2x1xf32>
    %782 = vector.broadcast %781 : vector<2x1xf32> to vector<2x16xf32>
    %783 = arith.subf %779, %782 : vector<2x16xf32>
    %784 = math.exp %783 : vector<2x16xf32>
    %cst_246 = arith.constant dense<0.000000e+00> : vector<2xf32>
    %785 = vector.multi_reduction <add>, %784, %cst_246 [1] : vector<2x16xf32> to vector<2xf32>
    %786 = vector.shape_cast %785 : vector<2xf32> to vector<2x1xf32>
    %787 = tpu.reciprocal %786 : vector<2x1xf32> -> vector<2x1xf32>
    %788 = vector.broadcast %787 : vector<2x1xf32> to vector<2x16xf32>
    %789 = arith.mulf %784, %788 : vector<2x16xf32>
    %790 = arith.index_cast %c3_i32_194 : i32 to index
    %c0_247 = arith.constant 0 : index
    %c0_248 = arith.constant 0 : index
    %791 = vector.load %arg14[%790, %c0_247, %c0_248] : memref<4x2x16xf32, #tpu.memory_space<vmem>>, vector<1x2x16xf32>
    %792 = vector.shape_cast %791 : vector<1x2x16xf32> to vector<2x16xf32>
    %793 = vector.shape_cast %789 : vector<2x16xf32> to vector<1x2x16xf32>
    tpu.vector_store %arg14[%790, %c0_247, %c0_248], %793 {strides = array<i32>} : memref<4x2x16xf32, #tpu.memory_space<vmem>>, vector<1x2x16xf32>,
    %c4_i32_249 = arith.constant 4 : i32
    return
  }
}

</mosaic_0001>

<bundles_post_ra>
// kernel: tpu_custom_call.1
= control target key start
LH: loop header
LB: loop body
LE: loop exit
PB: predicated region body
PF: predicated region fallthrough
CT: control target
= control target key end

     0   :  { %s11554_s0 = inlined_call_operand.vmem [shape: f32[2,16], index: 0, kind: input, shape index: {}]   ;;  %s11555_s1 = inlined_call_operand.vmem [shape: f32[4,2,4,8], index: 1, kind: input, shape index: {}]   ;;  %s11556_s2 = inlined_call_operand.hbm [shape: f32[4,2,4,8], index: 2, kind: input, shape index: {}]   ;;  %s11557_s3 = inlined_call_operand.hbm [shape: f32[16,128], index: 3, kind: input, shape index: {}]   ;;  %s11558_s4 = inlined_call_operand.hbm [shape: f32[32,128], index: 4, kind: input, shape index: {}]   ;;  %s11559_s5 = inlined_call_operand.hbm [shape: f32[1,128], index: 5, kind: input, shape index: {}]   ;;  %s11560_s6 = inlined_call_operand.hbm [shape: f32[32,32], index: 6, kind: input, shape index: {}]   ;;  %s11561_s7 = inlined_call_operand.hbm [shape: f32[32,32], index: 7, kind: input, shape index: {}]   ;;  %s11562_s8 = inlined_call_operand.vmem [shape: f32[32,256], index: 8, kind: input, shape index: {}]   ;;  %s11563_s9 = inlined_call_operand.hbm [shape: f32[32,256], index: 9, kind: input, shape index: {}]   ;;  %s11564_s10 = inlined_call_operand.hbm [shape: f32[64,256], index: 10, kind: input, shape index: {}]   ;;  %s11565_s11 = inlined_call_operand.vmem [shape: f32[1,256], index: 11, kind: input, shape index: {}]   ;;  %s11566_s12 = inlined_call_operand.vmem [shape: f32[64,16], index: 12, kind: input, shape index: {}]   ;;  %s11567_s13 = inlined_call_operand.vmem [shape: f32[1,16], index: 13, kind: input, shape index: {}]   ;;  %s11568_s14 = inlined_call_operand.hbm [shape: f32[4,2,16], index: 14, kind: output, shape index: {0}]   ;;  %s11569_s15 = inlined_call_operand.vmem [shape: f32[16,2,4], index: 15, kind: output, shape index: {1}]  }
   0x1   :  { %11588 = sst [smem:[#allocation32_spill]] %s11568_s14 }
   0x2   :  { %21 = vsyncpa [#allocation3], 0 }
   0x3   :  { %22 = vsyncpa [#allocation6], 0 }
   0x4   :  { %23 = vsyncpa [#allocation9], 0 }
   0x5   :  { %24 = vsyncpa [#allocation12], 0 }
   0x6   :  { %25 = vsyncpa [#allocation15], 0 }
   0x7   :  { %26 = vsyncpa [#allocation4], 0  ;;  %s10049_s18 = smov [#allocation5]   ;;  %s9839_s22 = scalar_lea.hbm %s11557_s3, 256 }
   0x8   :  { %s48_s19 = sshll.u32 %s10049_s18, 4  ;;  %p9840_p0 = scmp.ne.s32.totalorder %s11557_s3, %s9839_s22  ;;  %s49_s19 = int_to_ptr.vmem [resolvable:$true] %s48_s19 }
   0x9   :  { %p9843_p1 = scmp.lt.u32.totalorder %s9839_s22, %s11557_s3 }
   0xb   :  { %p9845_p2 = pnand %p9843_p1, %p9840_p0 }
   0xd   :  { %9848 = shalt.err (!%p9845_p2)
}
   0xe   :  { %s9849_s27 = scalar_lea.vmem %s49_s19, 256  ;;  %p9854_p4 = scmp.lt.s32.totalorder %s49_s19, %s49_s19 }
   0xf   :  { %p9850_p3 = scmp.ne.s32.totalorder %s49_s19, %s9849_s27  ;;  %p9855_p5 = scmp.lt.s32.totalorder %s9849_s27, %s9849_s27 }
  0x11   :  { %p9856_p6 = por %p9855_p5, %p9854_p4 }
  0x13   :  { %p9857_p7 = pnand %p9856_p6, %p9850_p3 }
  0x15   :  { %9860 = shalt.err (!%p9857_p7)
}
  0x16   :  { %s10050_s28 = smov 128   ;;  %s10051_s29 = smov 8  }
  0x17   :  { %54 = dma.hbm_to_vmem [thread:$0]  %s11557_s3, 256, %s49_s19, [#allocation6], %s10050_s28, %s10050_s28, %s10051_s29  }
  0x18   :  { %s10052_s17 = smov [#allocation8]   ;;  %s10053_s20 = smov [#allocation11]  }
  0x19   :  { %s73_s18 = sshll.u32 %s10052_s17, 4  ;;  %s94_s21 = sshll.u32 %s10053_s20, 4  ;;  %s74_s18 = int_to_ptr.vmem [resolvable:$true] %s73_s18  ;;  %s95_s21 = int_to_ptr.vmem [resolvable:$true] %s94_s21 }
  0x1a   :  { %s9861_s24 = scalar_lea.hbm %s11559_s5, 16 }
  0x1b   :  { %p9862_p8 = scmp.ne.s32.totalorder %s11559_s5, %s9861_s24  ;;  %p9865_p9 = scmp.lt.u32.totalorder %s9861_s24, %s11559_s5 }
  0x1d   :  { %p9867_p10 = pnand %p9865_p9, %p9862_p8 }
  0x1f   :  { %9870 = shalt.err (!%p9867_p10)
}
  0x20   :  { %s9871_s3 = scalar_lea.vmem %s74_s18, 16  ;;  %s9875_s19 = scalar_lea.vmem %s74_s18, 32 }
  0x21   :  { %p9872_p11 = scmp.ne.s32.totalorder %s74_s18, %s9871_s3  ;;  %p9876_p12 = scmp.lt.s32.totalorder %s74_s18, %s74_s18 }
  0x22   :  { %p9877_p13 = scmp.lt.s32.totalorder %s9875_s19, %s9871_s3 }
  0x24   :  { %p9878_p0 = por %p9877_p13, %p9876_p12 }
  0x26   :  { %p9879_p1 = pnand %p9878_p0, %p9872_p11 }
  0x28   :  { %9882 = shalt.err (!%p9879_p1)
}
  0x29   :  { %76 = dma.hbm_to_vmem [thread:$0]  %s11559_s5, 16, %s74_s18, [#allocation9]  }
  0x2a   :  { %s9883_s14 = scalar_lea.hbm %s11561_s7, 512 }
  0x2b   :  { %p9884_p2 = scmp.ne.s32.totalorder %s11561_s7, %s9883_s14  ;;  %p9887_p3 = scmp.lt.u32.totalorder %s9883_s14, %s11561_s7 }
  0x2d   :  { %p9889_p4 = pnand %p9887_p3, %p9884_p2 }
  0x2f   :  { %9892 = shalt.err (!%p9889_p4)
}
  0x30   :  { %s9893_s26 = scalar_lea.vmem %s95_s21, 512  ;;  %p9898_p6 = scmp.lt.s32.totalorder %s95_s21, %s95_s21 }
  0x31   :  { %p9894_p5 = scmp.ne.s32.totalorder %s95_s21, %s9893_s26  ;;  %p9899_p7 = scmp.lt.s32.totalorder %s9893_s26, %s9893_s26 }
  0x33   :  { %p9900_p8 = por %p9899_p7, %p9898_p6 }
  0x35   :  { %p9901_p9 = pnand %p9900_p8, %p9894_p5 }
  0x37   :  { %9904 = shalt.err (!%p9901_p9)
}
  0x38   :  { %100 = dma.hbm_to_vmem [thread:$0]  %s11561_s7, 512, %s95_s21, [#allocation12], %s10050_s28, %s10050_s28, %s10051_s29  }
  0x39   :  { %s10054_s27 = smov [#allocation2]   ;;  %s9905_s16 = scalar_lea.hbm %s11556_s2, 512 }
  0x3a   :  { %s36_s3 = sshll.u32 %s10054_s27, 4  ;;  %p9906_p10 = scmp.ne.s32.totalorder %s11556_s2, %s9905_s16  ;;  %s37_s3 = int_to_ptr.vmem [resolvable:$true] %s36_s3 }
  0x3b   :  { %p9909_p11 = scmp.lt.u32.totalorder %s9905_s16, %s11556_s2 }
  0x3d   :  { %p9911_p12 = pnand %p9909_p11, %p9906_p10 }
  0x3f   :  { %9914 = shalt.err (!%p9911_p12)
}
  0x40   :  { %s9915_s23 = scalar_lea.vmem %s37_s3, 512  ;;  %p9920_p0 = scmp.lt.s32.totalorder %s37_s3, %s37_s3 }
  0x41   :  { %p9916_p13 = scmp.ne.s32.totalorder %s37_s3, %s9915_s23  ;;  %p9921_p1 = scmp.lt.s32.totalorder %s9915_s23, %s9915_s23 }
  0x43   :  { %p9922_p2 = por %p9921_p1, %p9920_p0 }
  0x45   :  { %p9923_p3 = pnand %p9922_p2, %p9916_p13 }
  0x47   :  { %9926 = shalt.err (!%p9923_p3)
}
  0x48   :  { %s10055_s7 = smov 64   ;;  %s10056_s21 = smov 4  }
  0x49   :  { %42 = dma.hbm_to_vmem [thread:$0]  %s11556_s2, 512, %s37_s3, [#allocation3], %s10055_s7, %s10055_s7, %s10056_s21  }
  0x4a   :  { %s10057_s26 = smov [#allocation7]   ;;  %s10058_s18 = smov [#allocation10]  }
  0x4b   :  { %s60_s5 = sshll.u32 %s10057_s26, 4  ;;  %s82_s27 = sshll.u32 %s10058_s18, 4  ;;  %s61_s5 = int_to_ptr.vmem [resolvable:$true] %s60_s5  ;;  %s10210_s27 = int_to_ptr.vmem [resolvable:$true] %s82_s27 }
  0x4c   :  { %s9927_s16 = scalar_lea.hbm %s11558_s4, 512 }
  0x4d   :  { %p9928_p4 = scmp.ne.s32.totalorder %s11558_s4, %s9927_s16  ;;  %p9931_p5 = scmp.lt.u32.totalorder %s9927_s16, %s11558_s4 }
  0x4f   :  { %p9933_p6 = pnand %p9931_p5, %p9928_p4 }
  0x51   :  { %9936 = shalt.err (!%p9933_p6)
}
  0x52   :  { %s9937_s2 = scalar_lea.vmem %s61_s5, 512  ;;  %p9942_p8 = scmp.lt.s32.totalorder %s61_s5, %s61_s5 }
  0x53   :  { %p9938_p7 = scmp.ne.s32.totalorder %s61_s5, %s9937_s2  ;;  %p9943_p9 = scmp.lt.s32.totalorder %s9937_s2, %s9937_s2 }
  0x55   :  { %p9944_p10 = por %p9943_p9, %p9942_p8 }
  0x57   :  { %p9945_p11 = pnand %p9944_p10, %p9938_p7 }
  0x59   :  { %9948 = shalt.err (!%p9945_p11)
}
  0x5a   :  { %66 = dma.hbm_to_vmem [thread:$0]  %s11558_s4, 512, %s61_s5, [#allocation6], %s10050_s28, %s10050_s28, %s10051_s29  }
  0x5b   :  { %s9949_s25 = scalar_lea.hbm %s11560_s6, 512 }
  0x5c   :  { %p9950_p12 = scmp.ne.s32.totalorder %s11560_s6, %s9949_s25  ;;  %p9953_p13 = scmp.lt.u32.totalorder %s9949_s25, %s11560_s6 }
  0x5e   :  { %p9955_p0 = pnand %p9953_p13, %p9950_p12 }
  0x60   :  { %9958 = shalt.err (!%p9955_p0)
}
  0x61   :  { %s9959_s16 = scalar_lea.vmem %s10210_s27, 512  ;;  %p9964_p2 = scmp.lt.s32.totalorder %s10210_s27, %s10210_s27 }
  0x62   :  { %p9960_p1 = scmp.ne.s32.totalorder %s10210_s27, %s9959_s16  ;;  %p9965_p3 = scmp.lt.s32.totalorder %s9959_s16, %s9959_s16 }
  0x64   :  { %p9966_p4 = por %p9965_p3, %p9964_p2 }
  0x66   :  { %p9967_p5 = pnand %p9966_p4, %p9960_p1 }
  0x68   :  { %9970 = shalt.err (!%p9967_p5)
}
  0x69   :  { %88 = dma.hbm_to_vmem [thread:$0]  %s11560_s6, 512, %s10210_s27, [#allocation9], %s10050_s28, %s10050_s28, %s10051_s29  }
  0x6a   :  { %s10059_s17 = smov [#allocation13]   ;;  %s9971_s2 = scalar_lea.hbm %s11563_s9, 1024 }
  0x6b   :  { %s108_s20 = sshll.u32 %s10059_s17, 4  ;;  %p9972_p6 = scmp.ne.s32.totalorder %s11563_s9, %s9971_s2  ;;  %s109_s20 = int_to_ptr.vmem [resolvable:$true] %s108_s20 }
  0x6c   :  { %p9975_p7 = scmp.lt.u32.totalorder %s9971_s2, %s11563_s9 }
  0x6e   :  { %p9977_p8 = pnand %p9975_p7, %p9972_p6 }
  0x70   :  { %9980 = shalt.err (!%p9977_p8)
}
  0x71   :  { %s9981_s25 = scalar_lea.vmem %s109_s20, 1024  ;;  %p9986_p10 = scmp.lt.s32.totalorder %s109_s20, %s109_s20 }
  0x72   :  { %p9982_p9 = scmp.ne.s32.totalorder %s109_s20, %s9981_s25  ;;  %p9987_p11 = scmp.lt.s32.totalorder %s9981_s25, %s9981_s25 }
  0x74   :  { %p9988_p12 = por %p9987_p11, %p9986_p10 }
  0x76   :  { %p9989_p13 = pnand %p9988_p12, %p9982_p9 }
  0x78   :  { %9992 = shalt.err (!%p9989_p13)
}
  0x79   :  { %s10060_s6 = smov 256   ;;  %s10061_s28 = smov 16  }
  0x7a   :  { %114 = dma.hbm_to_vmem [thread:$0]  %s11563_s9, 1024, %s109_s20, [#allocation12], %s10060_s6, %s10060_s6, %s10061_s28  }
  0x7b   :  { %s10062_s18 = smov [#allocation14]   ;;  %s9993_s4 = scalar_lea.hbm %s11564_s10, 2048 }
  0x7c   :  { %s120_s19 = sshll.u32 %s10062_s18, 4  ;;  %p9994_p0 = scmp.ne.s32.totalorder %s11564_s10, %s9993_s4  ;;  %s121_s19 = int_to_ptr.vmem [resolvable:$true] %s120_s19 }
  0x7d   :  { %p9997_p1 = scmp.lt.u32.totalorder %s9993_s4, %s11564_s10 }
  0x7f   :  { %p9999_p2 = pnand %p9997_p1, %p9994_p0 }
  0x81   :  { %10002 = shalt.err (!%p9999_p2)
}
  0x82   :  { %s10003_s2 = scalar_lea.vmem %s121_s19, 2048  ;;  %p10008_p4 = scmp.lt.s32.totalorder %s121_s19, %s121_s19 }
  0x83   :  { %p10004_p3 = scmp.ne.s32.totalorder %s121_s19, %s10003_s2  ;;  %p10009_p5 = scmp.lt.s32.totalorder %s10003_s2, %s10003_s2 }
  0x85   :  { %p10010_p6 = por %p10009_p5, %p10008_p4 }
  0x87   :  { %p10011_p7 = pnand %p10010_p6, %p10004_p3 }
  0x89   :  { %10014 = shalt.err (!%p10011_p7)
}
  0x8a   :  { %126 = dma.hbm_to_vmem [thread:$0]  %s11564_s10, 2048, %s121_s19, [#allocation15], %s10060_s6, %s10060_s6, %s10061_s28  }
  0x8b   :  { %10037 = dma.done.wait [#allocation3], 512  }
  0x8c   :  { %10038 = vsyncadd [#allocation3], 4294966784 }
  0x8d   :  { %10039 = dma.done.wait [#allocation6], 768  }
  0x8e   :  { %10040 = vsyncadd [#allocation6], 4294966528 }
  0x8f   :  { %10041 = dma.done.wait [#allocation9], 528  }
  0x90   :  { %10042 = vsyncadd [#allocation9], 4294966768 }
  0x91   :  { %10043 = dma.done.wait [#allocation12], 1536  }
  0x92   :  { %10044 = vsyncadd [#allocation12], 4294965760 }
  0x93   :  { %10045 = dma.done.wait [#allocation15], 2048  }
  0x94   :  { %10046 = vsyncadd [#allocation15], 4294965248  ;;  %v11571_v0 = vmov 0.0|0.0   ;;  %vm10064_vm0 = vmmov 0   ;;  %v11573_v1 = vmov 0.0   ;;  %v175_v2 = vld [vmem:[#allocation7] sm:$0xff]  ;;  %v489_v42 = vlaneseq }
  0x95   :  { %9296 = vmatprep.subr.bf16.mxu0 %v11571_v0  ;;  %8748 = vmatprep.mubr.msk.f32.mxu0 %vm10064_vm0, %v11573_v1  ;;  %v176_v3 = vld [vmem:[#allocation7 + $0x8] sm:$0xff]  ;;  %v177_v4 = vld [vmem:[#allocation7 + $0x10] sm:$0xff]  ;;  %v178_v6 = vld [vmem:[#allocation7 + $0x18] sm:$0xff]  ;;  %vm305_vm1 = vcmask 130048   ;;  %vm231_vm2 = vcmask 261120   ;;  %vm508_vm3 = vcmask 64512  }
  0x96   :  { %9305 = vmatprep.subr.bf16.mxu1 %v11571_v0  ;;  %8766 = vmatprep.mubr.msk.f32.mxu1 %vm10064_vm0, %v11573_v1  ;;  %v10279_v5 = vpack.c.bf16 %v176_v3, %v175_v2  ;;  %v10282_v7 = vpack.c.bf16 %v178_v6, %v177_v4  ;;  %v173_v8 = vld [vmem:[#allocation5] sm:$0xff]  ;;  %v174_v9 = vld [vmem:[#allocation5 + $0x8] sm:$0xff]  ;;  %v10300_v14 = vld [vmem:[#allocation8] ss:$0 sm:$0xff]  ;;  %v10067_v40 = vmov 1966171168  }
  0x97   :  { %v10286_v10 = vpack.c.bf16 %v174_v9, %v173_v8  ;;  %v230_v11 = vld [vmem:[%s11554_s0] sm:$0x3]  ;;  %s10066_s0 = smov 32   ;;  %v180_v29 = vld [vmem:[#allocation10] sm:$0xff]  ;;  %v182_v31 = vld [vmem:[#allocation10 + $0x10] sm:$0xff]  ;;  %v487_v41 = vunpack.c.l.s4 %v10067_v40  ;;  %v10332_v44 = vshrl.u32 %v489_v42, 7 }
  0x98   :  { %9298 = vmatpush3.bf16.msra.mxu0 %v10279_v5  ;;  %11589 = vst [vmem:[#allocation23_spill] sm:$0xff] %v10282_v7  ;;  %v181_v30 = vld [vmem:[#allocation10 + $0x8] sm:$0xff]  ;;  %v183_v33 = vld [vmem:[#allocation10 + $0x18] sm:$0xff]  ;;  %v10342_v51 = vld [vmem:[%s11555_s1 + $0x4] sm:$0xf]  ;;  %vm661_vm4 = vcmask 24576  }
  0x99   :  { %9299 = vmatprep.subr.bf16.mxu0 %v11571_v0  ;;  %11590 = vst [vmem:[#allocation24_spill] sm:$0xff] %v10286_v10  ;;  %v10308_v32 = vpack.c.bf16 %v181_v30, %v180_v29  ;;  %v10311_v34 = vpack.c.bf16 %v183_v33, %v182_v31  ;;  %v10327_v39 = vld [vmem:[%s11555_s1] sm:$0xf]  ;;  %v488_v43 = vunpack.c.0.s8 %v487_v41  ;;  %v10357_v61 = vsub.s32 0, %v10332_v44  ;;  %s10068_s6 = smov 120   ;;  %s10069_s4 = smov 112  }
  0x9a   :  { %vm688_vm5 = vcmask 1043456   ;;  %vm684_vm6 = vcmask 31744   ;;  %vm839_vm7 = vcmask 1041409   ;;  %vm842_vm8 = vcmask 25600   ;;  %s10070_s20 = smov 104   ;;  %s10071_s18 = smov 24  }
  0x9b   :  { %9307 = vmatpush3.bf16.msra.mxu1 %v10308_v32  ;;  %v10335_v45 = vsub.s32 %v488_v43, %v10332_v44  ;;  %vm1885_vm9 = vcmask 195584   ;;  %vm2105_vm10 = vcmask 523264   ;;  %vm2297_vm11 = vcmask 123904  }
  0x9c   :  { %9301 = vmatpush3.bf16.msra.mxu0 %v10282_v7  ;;  %9308 = vmatprep.subr.bf16.mxu1 %v11571_v0 }
  0x9d   :  { %9302 = vmatprep.subr.bf16.mxu0 %v11571_v0 }
  0x9f   :  { %8749 = vmatmul.mubr.f32.vlgmr.msra.gmra.mrb[0].mxu0 %v11573_v1  ;;  %9310 = vmatpush3.bf16.msra.mxu1 %v10311_v34 }
  0xa0   :  { %9304 = vmatpush3.bf16.msra.mxu0 %v10286_v10  ;;  %8755 = vmatprep.mubr.msk.f32.mxu0 %vm10064_vm0, %v11573_v1 }
  0xa1   :  { %8769 = vmatprep.subr.mxu0 %v11573_v1  ;;  %8779 = vmatprep.subr.mxu1 %v11573_v1 }
  0xa3   :  { %8756 = vmatmul.mubr.msk.f32.vlgmr.msra.gmra.mrb[2].mxu0 %vm305_vm1, %v230_v11 }
  0xa4   :  { %8771 = vmatprep.mubr.msk.f32.mxu0 %vm10064_vm0, %v11573_v1 }
  0xa9   :  { %8770 = vmatpush3.xpose.msk.msra.mxu0 %vm508_vm3, %v10327_v39 }
  0xaa   :  { %8774 = vmatprep.subr.mxu0 %v11573_v1 }
 0x172   :  { %v301_v12 = vpop.f32.mrb[0].mxu0 }
 0x173   :  { %v8750_v13 = vpop.f32.mrb[1].mxu0 }
 0x176   :  { %v375_v15 = vpop.f32.mrb[2].mxu0 }
 0x177   :  { %v376_v16 = vadd.f32 %v375_v15, %v301_v12  ;;  %v8757_v17 = vpop.f32.mrb[3].mxu0  ;;  %v10366_v15 = vld [vmem:[#allocation2 + $0x4] sm:$0xf] }
 0x179   :  { %v385_v18 = vadd.f32 %v10300_v14, %v376_v16  ;;  %v10371_v16 = vld [vmem:[#allocation2] sm:$0xf] }
 0x17b   :  { %9597 = vtanh.f32 %v385_v18  ;;  %v8319_v20 = vmul.f32 -1.442695, %v385_v18 }
 0x17d   :  { %9599 = vpow2.f32 %v8319_v20 }
 0x185   :  { %v9598_v19 = vpop.eup %9597 }
 0x186   :  { %395 = vrot.lane.b32.xlu0 %v9598_v19, %s10055_s7 }
 0x187   :  { %v9600_v21 = vpop.eup %9599 }
 0x188   :  { %v389_v22 = vadd.f32 1.0, %v9600_v21 }
 0x18a   :  { %9601 = vrcp.f32 %v389_v22  ;;  %v10384_v22 = vld [vmem:[%s11555_s1 + $0xc] sm:$0xf] }
 0x194   :  { %v9602_v23 = vpop.eup %9601 }
 0x195   :  { %v393_v26 = vmul.f32 0.0, %v9602_v23 }
 0x1f8   :  { %v396_v24 = vpop.permute.xlu0 %395 }
 0x1f9   :  { %v398_v25 = vmul.f32 %v9602_v23, %v396_v24 }
 0x1fb   :  { %400 = vrot.lane.b32.xlu0 %v398_v25, %s10066_s0 }
 0x26d   :  { %v401_v27 = vpop.permute.xlu0 %400 }
 0x26e   :  { %v10305_v28 = vadd.f32 %v401_v27, %v393_v26  ;;  %v10394_v26 = vld [vmem:[%s11555_s1 + $0x8] sm:$0xf] }
 0x270   :  { %9603 = vtanh.f32 %v10305_v28 }
 0x27a   :  { %v9604_v35 = vpop.eup %9603 }
 0x27b   :  { %406 = vrot.lane.b32.xlu1 %v9604_v35, %s10055_s7 }
 0x2ed   :  { %v407_v36 = vpop.permute.xlu1 %406 }
 0x2ee   :  { %v409_v37 = vmul.f32 %v9602_v23, %v407_v36 }
 0x2f0   :  { %411 = vrot.lane.b32.xlu1 %v409_v37, %s10066_s0 }
 0x362   :  { %v10318_v38 = vpop.permute.xlu1 %411 }
 0x363   :  { %8767 = vmatmul.mubr.msk.f32.vlgmr.msra.gmra.mrb[0].mxu1 %vm231_vm2, %v10318_v38 }
 0x364   :  { %8781 = vmatprep.mubr.msk.f32.mxu1 %vm10064_vm0, %v11573_v1  ;;  %8780 = vmatpush3.msk.msra.mxu1 %vm688_vm5, %v10371_v16 }
 0x365   :  { %8789 = vmatprep.subr.mxu1 %v11573_v1 }
 0x436   :  { %v481_v46 = vpop.f32.mrb[0].mxu1 }
 0x437   :  { %v492_v47 = vrot.slane %v481_v46, %v10335_v45  ;;  %v8768_v48 = vpop.f32.mrb[1].mxu1 }
 0x439   :  { %v493_v49 = vcombine.high %v492_v47, %v492_v47  ;;  %v500_v50 = vrot.slane %v492_v47, %v10335_v45 }
 0x43b   :  { %8772 = vmatmul.mubr.msk.f32.vlgmr.msra.gmra.mrb[4].mxu0 %vm508_vm3, %v500_v50  ;;  %v507_v52 = vrot.slane %v493_v49, %v10335_v45  ;;  %v10377_v17 = vrot.slane %v500_v50, %v10357_v61 }
 0x43c   :  { %8775 = vmatpush3.xpose.msk.msra.mxu0 %vm508_vm3, %v10342_v51  ;;  %8776 = vmatprep.mubr.msk.f32.mxu0 %vm10064_vm0, %v11573_v1 }
 0x43d   :  { %8784 = vmatprep.subr.mxu0 %v11573_v1  ;;  %v10360_v62 = vrot.slane %v507_v52, %v10357_v61 }
 0x43f   :  { %8777 = vmatmul.mubr.msk.f32.vlgmr.msra.gmra.mrb[6].mxu0 %vm508_vm3, %v507_v52 }
 0x440   :  { %8786 = vmatprep.mubr.msk.f32.mxu0 %vm10064_vm0, %v11573_v1  ;;  %8785 = vmatpush3.msk.msra.mxu0 %vm688_vm5, %v10366_v15 }
 0x441   :  { %8794 = vmatprep.subr.mxu0 %v11573_v1 }
 0x50e   :  { %v580_v53 = vpop.f32.mrb[4].mxu0 }
 0x50f   :  { %v659_v54 = vmul.f32 0.35355338, %v580_v53  ;;  %v8773_v55 = vpop.f32.mrb[5].mxu0 }
 0x511   :  { %v662_v56 = vsel %vm661_vm4, %v659_v54, -inf }
 0x512   :  { %663 = vmax.xlane.f32.xlu1 %v662_v56  ;;  %v655_v57 = vpop.f32.mrb[6].mxu0 }
 0x513   :  { %v660_v58 = vmul.f32 0.35355338, %v655_v57  ;;  %v8778_v59 = vpop.f32.mrb[7].mxu0 }
 0x515   :  { %v665_v60 = vsel %vm661_vm4, %v660_v58, -inf }
 0x516   :  { %666 = vmax.xlane.f32.xlu0 %v665_v60 }
 0x523   :  { %929 = vrot.lane.b32.xlu1 %v10360_v62, %s10068_s6 }
 0x59f   :  { %v664_v63 = vpop.xlane.xlu1 %663 }
 0x5a0   :  { %v668_v2 = vsub.f32 %v659_v54, %v664_v63 }
 0x5a2   :  { %v670_v6 = vmul.f32 1.442695, %v668_v2  ;;  %v10423_v2 = vld [vmem:[#allocation2 + $0xc] sm:$0xf] }
 0x5a3   :  { %v667_v3 = vpop.xlane.xlu0 %666  ;;  %v930_v27 = vpop.permute.xlu1 %929 }
 0x5a4   :  { %v669_v4 = vsub.f32 %v660_v58, %v667_v3  ;;  %v10428_v3 = vld [vmem:[#allocation2 + $0x8] sm:$0xf] }
 0x5a6   :  { %v672_v8 = vmul.f32 1.442695, %v669_v4 }
 0x5a8   :  { %9605 = vpow2.f32 %v672_v8 }
 0x5a9   :  { %9607 = vpow2.f32 %v670_v6 }
 0x5b2   :  { %v9606_v9 = vpop.eup %9605 }
 0x5b3   :  { %v677_v11 = vsel %vm661_vm4, %v9606_v9, 0.0  ;;  %v9608_v12 = vpop.eup %9607 }
 0x5b4   :  { %678 = vadd.xlane.f32.xlu0 %v677_v11  ;;  %v674_v13 = vsel %vm661_vm4, %v9608_v12, 0.0  ;;  %v10438_v11 = vld [vmem:[%s11555_s1 + $0x14] sm:$0xf] }
 0x5b8   :  { %675 = vadd.xlane.f32.xlu0 %v674_v13 }
 0x5ce   :  { %848 = vrot.lane.b32.xlu0 %v10377_v17, %s10068_s6 }
 0x641   :  { %v679_v18 = vpop.xlane.xlu0 %678 }
 0x642   :  { %9609 = vrcp.f32 %v679_v18 }
 0x645   :  { %v676_v19 = vpop.xlane.xlu0 %675 }
 0x646   :  { %9611 = vrcp.f32 %v676_v19  ;;  %v10448_v19 = vld [vmem:[%s11555_s1 + $0x10] sm:$0xf] }
 0x649   :  { %v849_v30 = vpop.permute.xlu0 %848 }
 0x64c   :  { %v9610_v20 = vpop.eup %9609 }
 0x64d   :  { %v683_v21 = vmul.f32 %v9610_v20, %v9606_v9 }
 0x64f   :  { %8787 = vmatmul.mubr.msk.f32.vlgmr.msra.gmra.mrb[8].mxu0 %vm684_vm6, %v683_v21  ;;  %v838_v24 = vrot.slane %v683_v21, 7 }
 0x650   :  { %v9612_v23 = vpop.eup %9611  ;;  %8795 = vmatpush3.xpose.msk.msra.mxu0 %vm508_vm3, %v10384_v22  ;;  %8796 = vmatprep.mubr.msk.f32.mxu0 %vm10064_vm0, %v11573_v1 }
 0x651   :  { %v682_v25 = vmul.f32 %v9612_v23, %v9608_v12  ;;  %8804 = vmatprep.subr.mxu0 %v11573_v1 }
 0x653   :  { %8782 = vmatmul.mubr.msk.f32.vlgmr.msra.gmra.mrb[2].mxu1 %vm684_vm6, %v682_v25  ;;  %v840_v29 = vsel %vm839_vm7, %v838_v24, %v682_v25  ;;  %8797 = vmatmul.mubr.msk.f32.vlgmr.msra.gmra.mrb[10].mxu0 %vm508_vm3, %v930_v27 }
 0x654   :  { %843 = vst.msk [vmem:[%s11569_s15] sm:$0x3] %vm842_vm8, %v840_v29  ;;  %8790 = vmatpush3.xpose.msk.msra.mxu1 %vm508_vm3, %v10394_v26  ;;  %8791 = vmatprep.mubr.msk.f32.mxu1 %vm10064_vm0, %v11573_v1 }
 0x655   :  { %8799 = vmatprep.subr.mxu1 %v11573_v1  ;;  %8806 = vmatprep.mubr.msk.f32.mxu0 %vm10064_vm0, %v11573_v1 }
 0x656   :  { %8805 = vmatpush3.msk.msra.mxu0 %vm688_vm5, %v10423_v2 }
 0x657   :  { %8792 = vmatmul.mubr.msk.f32.vlgmr.msra.gmra.mrb[4].mxu1 %vm508_vm3, %v849_v30  ;;  %8814 = vmatprep.subr.mxu0 %v11573_v1 }
 0x658   :  { %8801 = vmatprep.mubr.msk.f32.mxu1 %vm10064_vm0, %v11573_v1  ;;  %8800 = vmatpush3.msk.msra.mxu1 %vm688_vm5, %v10428_v3 }
 0x659   :  { %8809 = vmatprep.subr.mxu1 %v11573_v1 }
 0x722   :  { %v834_v31 = vpop.f32.mrb[8].mxu0 }
 0x723   :  { %v8788_v33 = vpop.f32.mrb[9].mxu0  ;;  %v1859_v35 = vrot.slane %v834_v31, 7 }
 0x726   :  { %v758_v36 = vpop.f32.mrb[2].mxu1  ;;  %v1002_v37 = vpop.f32.mrb[10].mxu0 }
 0x727   :  { %v10415_v40 = vsel %vm839_vm7, %v1859_v35, %v758_v36  ;;  %v1007_v41 = vmul.f32 0.35355338, %v1002_v37  ;;  %v8783_v42 = vpop.f32.mrb[3].mxu1  ;;  %v8798_v43 = vpop.f32.mrb[11].mxu0 }
 0x729   :  { %v1011_v46 = vsel %vm661_vm4, %v1007_v41, -inf }
 0x72a   :  { %v921_v47 = vpop.f32.mrb[4].mxu1  ;;  %1012 = vmax.xlane.f32.xlu1 %v1011_v46 }
 0x72b   :  { %v1006_v48 = vmul.f32 0.35355338, %v921_v47  ;;  %v8793_v49 = vpop.f32.mrb[5].mxu1 }
 0x72d   :  { %v1008_v50 = vsel %vm661_vm4, %v1006_v48, -inf }
 0x72e   :  { %1009 = vmax.xlane.f32.xlu0 %v1008_v50 }
 0x7b7   :  { %v1013_v52 = vpop.xlane.xlu1 %1012 }
 0x7b8   :  { %v1015_v53 = vsub.f32 %v1007_v41, %v1013_v52 }
 0x7ba   :  { %v1018_v54 = vmul.f32 1.442695, %v1015_v53 }
 0x7bb   :  { %v1010_v55 = vpop.xlane.xlu0 %1009 }
 0x7bc   :  { %9613 = vpow2.f32 %v1018_v54  ;;  %v1014_v56 = vsub.f32 %v1006_v48, %v1010_v55 }
 0x7be   :  { %v1016_v57 = vmul.f32 1.442695, %v1014_v56 }
 0x7c0   :  { %9615 = vpow2.f32 %v1016_v57 }
 0x7c6   :  { %v9614_v58 = vpop.eup %9613 }
 0x7c7   :  { %v1023_v59 = vsel %vm661_vm4, %v9614_v58, 0.0 }
 0x7c8   :  { %1024 = vadd.xlane.f32.xlu1 %v1023_v59  ;;  %v10481_v59 = vld [vmem:[#allocation2 + $0x10] sm:$0xf] }
 0x7ca   :  { %v9616_v60 = vpop.eup %9615 }
 0x7cb   :  { %v1020_v63 = vsel %vm661_vm4, %v9616_v60, 0.0 }
 0x7cc   :  { %1021 = vadd.xlane.f32.xlu0 %v1020_v63 }
 0x7d9   :  { %1264 = vrot.lane.b32.xlu1 %v10360_v62, %s10069_s4 }
 0x7e2   :  { %1187 = vrot.lane.b32.xlu0 %v10377_v17, %s10069_s4 }
 0x855   :  { %v1025_v4 = vpop.xlane.xlu1 %1024 }
 0x856   :  { %9617 = vrcp.f32 %v1025_v4 }
 0x859   :  { %v1022_v6 = vpop.xlane.xlu0 %1021  ;;  %v1265_v20 = vpop.permute.xlu1 %1264 }
 0x85a   :  { %9619 = vrcp.f32 %v1022_v6  ;;  %v10492_v6 = vld [vmem:[%s11555_s1 + $0x1c] sm:$0xf] }
 0x85d   :  { %v1188_v23 = vpop.permute.xlu0 %1187 }
 0x860   :  { %v9618_v8 = vpop.eup %9617 }
 0x861   :  { %v1029_v9 = vmul.f32 %v9618_v8, %v9614_v58  ;;  %v10477_v58 = vld [vmem:[#allocation2 + $0x14] sm:$0xf] }
 0x863   :  { %8807 = vmatmul.mubr.msk.f32.vlgmr.msra.gmra.mrb[12].mxu0 %vm684_vm6, %v1029_v9  ;;  %v1182_v13 = vrot.slane %v1029_v9, 7 }
 0x864   :  { %v9620_v12 = vpop.eup %9619  ;;  %8815 = vmatpush3.xpose.msk.msra.mxu0 %vm508_vm3, %v10438_v11  ;;  %8816 = vmatprep.mubr.msk.f32.mxu0 %vm10064_vm0, %v11573_v1 }
 0x865   :  { %v1028_v18 = vmul.f32 %v9620_v12, %v9616_v60  ;;  %8824 = vmatprep.subr.mxu0 %v11573_v1  ;;  %v10502_v12 = vld [vmem:[%s11555_s1 + $0x18] sm:$0xf] }
 0x867   :  { %8802 = vmatmul.mubr.msk.f32.vlgmr.msra.gmra.mrb[6].mxu1 %vm684_vm6, %v1028_v18  ;;  %v1183_v21 = vsel %vm839_vm7, %v1182_v13, %v1028_v18  ;;  %8817 = vmatmul.mubr.msk.f32.vlgmr.msra.gmra.mrb[14].mxu0 %vm508_vm3, %v1265_v20 }
 0x868   :  { %8337 = vst.msk [vmem:[%s11569_s15 + $0x2] sm:$0x3] %vm842_vm8, %v1183_v21  ;;  %8810 = vmatpush3.xpose.msk.msra.mxu1 %vm508_vm3, %v10448_v19  ;;  %8811 = vmatprep.mubr.msk.f32.mxu1 %vm10064_vm0, %v11573_v1 }
 0x869   :  { %8819 = vmatprep.subr.mxu1 %v11573_v1  ;;  %8826 = vmatprep.mubr.msk.f32.mxu0 %vm10064_vm0, %v11573_v1 }
 0x86a   :  { %8825 = vmatpush3.msk.msra.mxu0 %vm688_vm5, %v10477_v58 }
 0x86b   :  { %8812 = vmatmul.mubr.msk.f32.vlgmr.msra.gmra.mrb[8].mxu1 %vm508_vm3, %v1188_v23  ;;  %8834 = vmatprep.subr.mxu0 %v11573_v1 }
 0x86c   :  { %8821 = vmatprep.mubr.msk.f32.mxu1 %vm10064_vm0, %v11573_v1  ;;  %8820 = vmatpush3.msk.msra.mxu1 %vm688_vm5, %v10481_v59 }
 0x86d   :  { %8829 = vmatprep.subr.mxu1 %v11573_v1 }
 0x936   :  { %v1178_v24 = vpop.f32.mrb[12].mxu0 }
 0x937   :  { %v8808_v25 = vpop.f32.mrb[13].mxu0  ;;  %v1864_v27 = vrot.slane %v1178_v24, 7 }
 0x93a   :  { %v1102_v29 = vpop.f32.mrb[6].mxu1  ;;  %v1337_v30 = vpop.f32.mrb[14].mxu0 }
 0x93b   :  { %v1342_v31 = vmul.f32 0.35355338, %v1337_v30  ;;  %v8803_v33 = vpop.f32.mrb[7].mxu1  ;;  %v8818_v35 = vpop.f32.mrb[15].mxu0  ;;  %v10469_v36 = vsel %vm839_vm7, %v1864_v27, %v1102_v29 }
 0x93d   :  { %v1346_v37 = vsel %vm661_vm4, %v1342_v31, -inf }
 0x93e   :  { %v1260_v41 = vpop.f32.mrb[8].mxu1  ;;  %1347 = vmax.xlane.f32.xlu1 %v1346_v37 }
 0x93f   :  { %v1341_v42 = vmul.f32 0.35355338, %v1260_v41  ;;  %v8813_v43 = vpop.f32.mrb[9].mxu1 }
 0x941   :  { %v1343_v46 = vsel %vm661_vm4, %v1341_v42, -inf }
 0x942   :  { %1344 = vmax.xlane.f32.xlu0 %v1343_v46 }
 0x9cb   :  { %v1348_v47 = vpop.xlane.xlu1 %1347 }
 0x9cc   :  { %v1350_v48 = vsub.f32 %v1342_v31, %v1348_v47 }
 0x9ce   :  { %v1353_v49 = vmul.f32 1.442695, %v1350_v48 }
 0x9cf   :  { %v1345_v50 = vpop.xlane.xlu0 %1344 }
 0x9d0   :  { %9621 = vpow2.f32 %v1353_v49  ;;  %v1349_v52 = vsub.f32 %v1341_v42, %v1345_v50 }
 0x9d2   :  { %v1351_v53 = vmul.f32 1.442695, %v1349_v52 }
 0x9d4   :  { %9623 = vpow2.f32 %v1351_v53 }
 0x9da   :  { %v9622_v54 = vpop.eup %9621 }
 0x9db   :  { %v1358_v55 = vsel %vm661_vm4, %v9622_v54, 0.0 }
 0x9dc   :  { %1359 = vadd.xlane.f32.xlu1 %v1358_v55 }
 0x9de   :  { %v9624_v56 = vpop.eup %9623 }
 0x9df   :  { %v1355_v57 = vsel %vm661_vm4, %v9624_v56, 0.0 }
 0x9e0   :  { %1356 = vadd.xlane.f32.xlu0 %v1355_v57  ;;  %v10529_v57 = vld [vmem:[#allocation2 + $0x1c] sm:$0xf] }
 0x9ed   :  { %1599 = vrot.lane.b32.xlu1 %v10360_v62, %s10070_s20 }
 0x9f6   :  { %1522 = vrot.lane.b32.xlu0 %v10377_v17, %s10070_s20 }
 0xa69   :  { %v1360_v60 = vpop.xlane.xlu1 %1359 }
 0xa6a   :  { %9625 = vrcp.f32 %v1360_v60  ;;  %v10534_v60 = vld [vmem:[#allocation2 + $0x18] sm:$0xf] }
 0xa6d   :  { %v1357_v62 = vpop.xlane.xlu0 %1356  ;;  %v1600_v13 = vpop.permute.xlu1 %1599 }
 0xa6e   :  { %9627 = vrcp.f32 %v1357_v62 }
 0xa71   :  { %v1523_v20 = vpop.permute.xlu0 %1522 }
 0xa74   :  { %v9626_v63 = vpop.eup %9625 }
 0xa75   :  { %v1364_v4 = vmul.f32 %v9626_v63, %v9622_v54 }
 0xa77   :  { %8827 = vmatmul.mubr.msk.f32.vlgmr.msra.gmra.mrb[16].mxu0 %vm684_vm6, %v1364_v4  ;;  %v1517_v17 = vrot.slane %v1364_v4, 7 }
 0xa78   :  { %v9628_v8 = vpop.eup %9627  ;;  %8835 = vmatpush3.xpose.msk.msra.mxu0 %vm508_vm3, %v10492_v6  ;;  %8836 = vmatprep.mubr.msk.f32.mxu0 %vm10064_vm0, %v11573_v1 }
 0xa79   :  { %v1363_v9 = vmul.f32 %v9628_v8, %v9624_v56  ;;  %8844 = vmatprep.subr.mxu0 %v11573_v1 }
 0xa7b   :  { %8822 = vmatmul.mubr.msk.f32.vlgmr.msra.gmra.mrb[10].mxu1 %vm684_vm6, %v1363_v9  ;;  %v1518_v18 = vsel %vm839_vm7, %v1517_v17, %v1363_v9  ;;  %8837 = vmatmul.mubr.msk.f32.vlgmr.msra.gmra.mrb[18].mxu0 %vm508_vm3, %v1600_v13 }
 0xa7c   :  { %8346 = vst.msk [vmem:[%s11569_s15 + $0x4] sm:$0x3] %vm842_vm8, %v1518_v18  ;;  %8830 = vmatpush3.xpose.msk.msra.mxu1 %vm508_vm3, %v10502_v12  ;;  %8831 = vmatprep.mubr.msk.f32.mxu1 %vm10064_vm0, %v11573_v1  ;;  %v184_v18 = vld [vmem:[#allocation11] sm:$0xff] }
 0xa7d   :  { %8846 = vmatprep.mubr.msk.f32.mxu0 %vm10064_vm0, %v11573_v1  ;;  %8839 = vmatprep.subr.mxu1 %v11573_v1 }
 0xa7e   :  { %8845 = vmatpush3.msk.msra.mxu0 %vm688_vm5, %v10529_v57 }
 0xa7f   :  { %8832 = vmatmul.mubr.msk.f32.vlgmr.msra.gmra.mrb[12].mxu1 %vm508_vm3, %v1523_v20  ;;  %v185_v20 = vld [vmem:[#allocation11 + $0x8] sm:$0xff] }
 0xa80   :  { %8841 = vmatprep.mubr.msk.f32.mxu1 %vm10064_vm0, %v11573_v1  ;;  %8840 = vmatpush3.msk.msra.mxu1 %vm688_vm5, %v10534_v60 }
 0xa81   :  { %9311 = vmatprep.subr.bf16.mxu1 %v11571_v0 }
 0xb4a   :  { %v1513_v21 = vpop.f32.mrb[16].mxu0 }
 0xb4b   :  { %v8828_v23 = vpop.f32.mrb[17].mxu0  ;;  %v1871_v24 = vrot.slane %v1513_v21, 7  ;;  %v186_v21 = vld [vmem:[#allocation11 + $0x10] sm:$0xff] }
 0xb4c   :  { %v10549_v23 = vpack.c.bf16 %v185_v20, %v184_v18  ;;  %v193_v18 = vld [vmem:[%s11562_s8 + $0x28] sm:$0xff]  ;;  %v195_v20 = vld [vmem:[%s11562_s8 + $0x38] sm:$0xff] }
 0xb4e   :  { %v1437_v25 = vpop.f32.mrb[10].mxu1  ;;  %v1672_v27 = vpop.f32.mrb[18].mxu0 }
 0xb4f   :  { %v1677_v29 = vmul.f32 0.35355338, %v1672_v27  ;;  %v8823_v30 = vpop.f32.mrb[11].mxu1  ;;  %v8838_v31 = vpop.f32.mrb[19].mxu0  ;;  %v1872_v33 = vsel %vm839_vm7, %v1871_v24, %v1437_v25  ;;  %v187_v24 = vld [vmem:[#allocation11 + $0x18] sm:$0xff]  ;;  %v197_v27 = vld [vmem:[#allocation13 + $0x8] sm:$0xff] }
 0xb50   :  { %v10552_v25 = vpack.c.bf16 %v187_v24, %v186_v21  ;;  %v196_v30 = vld [vmem:[#allocation13] sm:$0xff]  ;;  %v10601_v24 = vpack.c.bf16 %v195_v20, %v193_v18 }
 0xb51   :  { %v1681_v35 = vsel %vm661_vm4, %v1677_v29, -inf }
 0xb52   :  { %v1595_v37 = vpop.f32.mrb[12].mxu1  ;;  %1682 = vmax.xlane.f32.xlu1 %v1681_v35  ;;  %v201_v35 = vld [vmem:[#allocation13 + $0x28] sm:$0xff] }
 0xb53   :  { %v1676_v41 = vmul.f32 0.35355338, %v1595_v37  ;;  %v8833_v42 = vpop.f32.mrb[13].mxu1  ;;  %v203_v37 = vld [vmem:[#allocation13 + $0x38] sm:$0xff] }
 0xb54   :  { %v10561_v42 = vpack.c.bf16 %v203_v37, %v201_v35  ;;  %v207_v35 = vld [vmem:[#allocation14 + $0x18] sm:$0xff] }
 0xb55   :  { %v1678_v43 = vsel %vm661_vm4, %v1676_v41, -inf }
 0xb56   :  { %1679 = vmax.xlane.f32.xlu0 %v1678_v43  ;;  %v200_v43 = vld [vmem:[#allocation13 + $0x20] sm:$0xff] }
 0xbdf   :  { %v1683_v46 = vpop.xlane.xlu1 %1682 }
 0xbe0   :  { %v1685_v47 = vsub.f32 %v1677_v29, %v1683_v46  ;;  %v199_v29 = vld [vmem:[#allocation13 + $0x18] sm:$0xff]  ;;  %v202_v46 = vld [vmem:[#allocation13 + $0x30] sm:$0xff] }
 0xbe1   :  { %v10557_v31 = vpack.c.bf16 %v199_v29, %v197_v27  ;;  %v192_v27 = vld [vmem:[%s11562_s8 + $0x20] sm:$0xff]  ;;  %v194_v29 = vld [vmem:[%s11562_s8 + $0x30] sm:$0xff] }
 0xbe2   :  { %v1688_v48 = vmul.f32 1.442695, %v1685_v47  ;;  %v10565_v47 = vpack.c.bf16 %v202_v46, %v200_v43  ;;  %v10611_v43 = vpack.c.bf16 %v194_v29, %v192_v27  ;;  %v216_v27 = vld [vmem:[#allocation14 + $0x60] sm:$0xff]  ;;  %v218_v29 = vld [vmem:[#allocation14 + $0x70] sm:$0xff] }
 0xbe3   :  { %v1680_v49 = vpop.xlane.xlu0 %1679  ;;  %11591 = vst [vmem:[#allocation25_spill] sm:$0xff] %v10557_v31  ;;  %9318 = vmatprep.subr.bf16.mxu0 %v10557_v31 }
 0xbe4   :  { %9629 = vpow2.f32 %v1688_v48  ;;  %v1684_v50 = vsub.f32 %v1676_v41, %v1680_v49 }
 0xbe6   :  { %v1686_v52 = vmul.f32 1.442695, %v1684_v50 }
 0xbe8   :  { %9631 = vpow2.f32 %v1686_v52 }
 0xbee   :  { %v9630_v53 = vpop.eup %9629 }
 0xbef   :  { %v1693_v54 = vsel %vm661_vm4, %v9630_v53, 0.0 }
 0xbf0   :  { %1694 = vadd.xlane.f32.xlu1 %v1693_v54 }
 0xbf2   :  { %v9632_v55 = vpop.eup %9631 }
 0xbf3   :  { %v1690_v56 = vsel %vm661_vm4, %v9632_v55, 0.0 }
 0xbf4   :  { %1691 = vadd.xlane.f32.xlu0 %v1690_v56 }
 0xc01   :  { %1866 = vrot.lane.b32.xlu1 %v10469_v36, %s10051_s29 }
 0xc0a   :  { %1873 = vrot.lane.b32.xlu0 %v1872_v33, %s10061_s28  ;;  %v198_v33 = vld [vmem:[#allocation13 + $0x10] sm:$0xff] }
 0xc0b   :  { %v10559_v41 = vpack.c.bf16 %v198_v33, %v196_v30  ;;  %v205_v33 = vld [vmem:[#allocation14 + $0x8] sm:$0xff] }
 0xc0c   :  { %v10615_v46 = vpack.c.bf16 %v207_v35, %v205_v33  ;;  %v220_v33 = vld [vmem:[%s11565_s11] sm:$0x3] }
 0xc0d   :  { %v10655_v35 = vrot.slane %v220_v33, %v10357_v61 }
 0xc7d   :  { %v1695_v62 = vpop.xlane.xlu1 %1694 }
 0xc7e   :  { %9633 = vrcp.f32 %v1695_v62 }
 0xc81   :  { %v1692_v63 = vpop.xlane.xlu0 %1691 }
 0xc82   :  { %9635 = vrcp.f32 %v1692_v63 }
 0xc85   :  { %v1874_v56 = vpop.permute.xlu0 %1873 }
 0xc88   :  { %v9634_v4 = vpop.eup %9633 }
 0xc89   :  { %v1699_v36 = vmul.f32 %v9634_v4, %v9630_v53 }
 0xc8b   :  { %8847 = vmatmul.mubr.msk.f32.vlgmr.msra.gmra.mrb[20].mxu0 %vm684_vm6, %v1699_v36  ;;  %v1852_v17 = vrot.slane %v1699_v36, 7 }
 0xc8c   :  { %v9636_v8 = vpop.eup %9635  ;;  %2027 = vmatprep.mubr.f32.mxu0 %v11573_v1  ;;  %9320 = vmatpush1.bf16.msra.mxu0 %v10559_v41 }
 0xc8d   :  { %v1698_v9 = vmul.f32 %v9636_v8, %v9632_v55  ;;  %9322 = vmatprep.subr.bf16.mxu0 %v10561_v42  ;;  %v1867_v55 = vpop.permute.xlu1 %1866  ;;  %v189_v8 = vld [vmem:[%s11562_s8 + $0x8] sm:$0xff] }
 0xc8e   :  { %v1883_v62 = vsel %vm508_vm3, %v10415_v40, %v1867_v55  ;;  %v188_v40 = vld [vmem:[%s11562_s8] sm:$0xff]  ;;  %v208_v55 = vld [vmem:[#allocation14 + $0x20] sm:$0xff] }
 0xc8f   :  { %8842 = vmatmul.mubr.msk.f32.vlgmr.msra.gmra.mrb[14].mxu1 %vm684_vm6, %v1698_v9  ;;  %v1853_v13 = vsel %vm839_vm7, %v1852_v17, %v1698_v9  ;;  %v1884_v63 = vsel %vm305_vm1, %v1883_v62, %v1874_v56  ;;  %v191_v17 = vld [vmem:[%s11562_s8 + $0x18] sm:$0xff]  ;;  %v210_v56 = vld [vmem:[#allocation14 + $0x30] sm:$0xff] }
 0xc90   :  { %8355 = vst.msk [vmem:[%s11569_s15 + $0x6] sm:$0x3] %vm842_vm8, %v1853_v13  ;;  %8857 = vmatprep.mubr.msk.f32.mxu1 %vm10064_vm0, %v11573_v1  ;;  %9313 = vmatpush3.bf16.msra.mxu1 %v10549_v23  ;;  %v10584_v9 = vpack.c.bf16 %v191_v17, %v189_v8  ;;  %v190_v13 = vld [vmem:[%s11562_s8 + $0x10] sm:$0xff]  ;;  %v213_v62 = vld [vmem:[#allocation14 + $0x48] sm:$0xff]  ;;  %v214_v17 = vld [vmem:[#allocation14 + $0x50] sm:$0xff] }
 0xc91   :  { %9314 = vmatprep.subr.bf16.mxu1 %v11571_v0  ;;  %9324 = vmatpush1.bf16.msra.mxu0 %v10565_v47  ;;  %v10599_v21 = vpack.c.bf16 %v190_v13, %v188_v40  ;;  %v212_v8 = vld [vmem:[#allocation14 + $0x40] sm:$0xff]  ;;  %v217_v40 = vld [vmem:[#allocation14 + $0x68] sm:$0xff]  ;;  %v219_v13 = vld [vmem:[#allocation14 + $0x78] sm:$0xff] }
 0xc92   :  { %9326 = vmatprep.subr.bf16.mxu0 %v10584_v9  ;;  %v10633_v18 = vpack.c.bf16 %v214_v17, %v212_v8  ;;  %v10636_v20 = vpack.c.bf16 %v219_v13, %v217_v40  ;;  %v221_v13 = vld [vmem:[%s11566_s12] sm:$0xff] }
 0xc94   :  { %9316 = vmatpush3.bf16.msra.mxu1 %v10552_v25 }
 0xc95   :  { %9349 = vmatprep.subr.bf16.mxu1 %v11571_v0 }
 0xd5e   :  { %v1848_v48 = vpop.f32.mrb[20].mxu0 }
 0xd5f   :  { %v8848_v49 = vpop.f32.mrb[21].mxu0  ;;  %v1878_v50 = vrot.slane %v1848_v48, 7  ;;  %v204_v48 = vld [vmem:[#allocation14] sm:$0xff] }
 0xd60   :  { %v206_v49 = vld [vmem:[#allocation14 + $0x10] sm:$0xff] }
 0xd62   :  { %v1772_v52 = vpop.f32.mrb[14].mxu1 }
 0xd63   :  { %v8843_v53 = vpop.f32.mrb[15].mxu1  ;;  %v1879_v54 = vsel %vm839_vm7, %v1878_v50, %v1772_v52  ;;  %v209_v50 = vld [vmem:[#allocation14 + $0x28] sm:$0xff]  ;;  %v211_v52 = vld [vmem:[#allocation14 + $0x38] sm:$0xff] }
 0xd64   :  { %1880 = vrot.lane.b32.xlu1 %v1879_v54, %s10071_s18  ;;  %v10618_v53 = vpack.c.bf16 %v206_v49, %v204_v48  ;;  %v10621_v54 = vpack.c.bf16 %v211_v52, %v209_v50  ;;  %v2188_v52 = vsub.s32 1, %v10332_v44  ;;  %v222_v44 = vld [vmem:[%s11566_s12 + $0x8] sm:$0xff] }
 0xdd6   :  { %v1881_v4 = vpop.permute.xlu1 %1880 }
 0xdd7   :  { %v1886_v36 = vsel %vm1885_vm9, %v1884_v63, %v1881_v4  ;;  %v215_v63 = vld [vmem:[#allocation14 + $0x58] sm:$0xff]  ;;  %v10626_v4 = vpack.c.bf16 %v210_v56, %v208_v55  ;;  %v10659_v55 = vrot.slane %v220_v33, %v2188_v52  ;;  %v224_v33 = vld [vmem:[%s11566_s12 + $0x18] sm:$0xff] }
 0xdd8   :  { %8858 = vmatmul.mubr.msk.f32.vlgmr.msra.gmra.mrb[16].mxu1 %vm231_vm2, %v1886_v36  ;;  %v10630_v36 = vpack.c.bf16 %v215_v63, %v213_v62  ;;  %v227_v52 = vld [vmem:[%s11566_s12 + $0x30] sm:$0xff] }
 0xdd9   :  { %8876 = vmatprep.mubr.msk.f32.mxu1 %vm10064_vm0, %v11573_v1 }
 0xeab   :  { %v1956_v30 = vpop.f32.mrb[16].mxu1 }
 0xeac   :  { %v8859_v37 = vpop.f32.mrb[17].mxu1  ;;  %8357 = vmatmul.mubr.msk.f32.vlgmr.msra.gmra.mrb[22].mxu0 %vm231_vm2, %v1956_v30  ;;  %v10639_v30 = vpack.c.bf16 %v218_v29, %v216_v27  ;;  %v223_v27 = vld [vmem:[%s11566_s12 + $0x10] sm:$0xff]  ;;  %v10672_v29 = vpack.c.bf16 %v222_v44, %v221_v13 }
 0xead   :  { %9328 = vmatpush1.bf16.msra.mxu0 %v10599_v21  ;;  %2098 = vmatprep.mubr.f32.mxu0 %v11573_v1 }
 0xeae   :  { %9330 = vmatprep.subr.bf16.mxu0 %v10601_v24  ;;  %9351 = vmatpush3.bf16.msra.mxu1 %v10672_v29 }
 0xeaf   :  { %9352 = vmatprep.subr.bf16.mxu1 %v11571_v0 }
 0xeb1   :  { %9332 = vmatpush1.bf16.msra.mxu0 %v10611_v43 }
 0xeb2   :  { %9334 = vmatprep.subr.bf16.mxu0 %v10615_v46 }
 0xeb4   :  { %8358 = vmatmul.mubr.msk.f32.vlgmr.msra.gmra.mrb[22].mxu0 %vm231_vm2, %v10318_v38 }
 0xeb5   :  { %9336 = vmatpush1.bf16.msra.mxu0 %v10618_v53  ;;  %2172 = vmatprep.mubr.f32.mxu0 %v11573_v1 }
 0xeb6   :  { %9338 = vmatprep.subr.bf16.mxu0 %v10621_v54 }
 0xeb9   :  { %9340 = vmatpush1.bf16.msra.mxu0 %v10626_v4 }
 0xeba   :  { %9342 = vmatprep.subr.bf16.mxu0 %v10630_v36 }
 0xebd   :  { %9344 = vmatpush1.bf16.msra.mxu0 %v10633_v18 }
 0xebe   :  { %9346 = vmatprep.subr.bf16.mxu0 %v10636_v20 }
 0xec1   :  { %9348 = vmatpush1.bf16.msra.mxu0 %v10639_v30 }
 0xec2   :  { %9370 = vmatprep.subr.bf16.mxu0 %v11571_v0 }
 0xec4   :  { %2173 = vmatmul.mubr.f32.vlgmr.msra.gmra.mrb[22].mxu0 %v11573_v1 }
 0xec5   :  { %9372 = vmatpush3.bf16.msra.mxu0 %v10308_v32  ;;  %8905 = vmatprep.mubr.msk.f32.mxu0 %vm10064_vm0, %v11573_v1 }
 0xec6   :  { %9373 = vmatprep.subr.bf16.mxu0 %v11571_v0 }
 0xec9   :  { %9375 = vmatpush3.bf16.msra.mxu0 %v10311_v34 }
 0xeca   :  { %8918 = vmatprep.subr.mxu0 %v11573_v1 }
 0xf97   :  { %v2174_v37 = vpop.f32.mrb[22].mxu0 }
 0xf98   :  { %v2192_v48 = vadd.f32 %v10655_v35, %v2174_v37  ;;  %v2176_v49 = vpop.f32.mrb[23].mxu0  ;;  %v10678_v37 = vpack.c.bf16 %v224_v33, %v223_v27 }
 0xf99   :  { %v2193_v56 = vadd.f32 %v10659_v55, %v2176_v49  ;;  %v226_v49 = vld [vmem:[%s11566_s12 + $0x28] sm:$0xff] }
 0xf9a   :  { %v8359_v50 = vmul.f32 -1.442695, %v2192_v48  ;;  %v225_v48 = vld [vmem:[%s11566_s12 + $0x20] sm:$0xff]  ;;  %9354 = vmatpush3.bf16.msra.mxu1 %v10678_v37 }
 0xf9b   :  { %9355 = vmatprep.subr.bf16.mxu1 %v11571_v0 }
 0xf9c   :  { %9637 = vpow2.f32 %v8359_v50  ;;  %v10688_v50 = vpack.c.bf16 %v226_v49, %v225_v48 }
 0xf9d   :  { %9639 = vtanh.f32 %v2193_v56 }
 0xf9e   :  { %9357 = vmatpush3.bf16.msra.mxu1 %v10688_v50 }
 0xf9f   :  { %9358 = vmatprep.subr.bf16.mxu1 %v11571_v0 }
 0xfa6   :  { %v9638_v62 = vpop.eup %9637 }
 0xfa7   :  { %v2197_v63 = vadd.f32 1.0, %v9638_v62  ;;  %v9640_v8 = vpop.eup %9639  ;;  %v228_v62 = vld [vmem:[%s11566_s12 + $0x38] sm:$0xff] }
 0xfa9   :  { %9641 = vrcp.f32 %v2197_v63  ;;  %v10698_v63 = vpack.c.bf16 %v228_v62, %v227_v52 }
 0xfab   :  { %9360 = vmatpush3.bf16.msra.mxu1 %v10698_v63 }
 0xfac   :  { %9361 = vmatprep.subr.bf16.mxu1 %v11571_v0 }
 0xfb3   :  { %v9642_v17 = vpop.eup %9641 }
 0xfb4   :  { %v2208_v40 = vmul.f32 %v9642_v17, %v9640_v8  ;;  %v8360_v8 = vmul.f32 -1.442695, %v2193_v56  ;;  %v2207_v44 = vmul.f32 0.0, %v9642_v17  ;;  %v10726_v56 = vld [vmem:[%s11567_s13] ss:$0 sm:$0xff] }
 0xfb6   :  { %2210 = vrot.lane.b32.xlu1 %v2208_v40, %s10055_s7  ;;  %9643 = vpow2.f32 %v8360_v8 }
 0xfc0   :  { %v9644_v40 = vpop.eup %9643 }
 0xfc1   :  { %v2204_v13 = vadd.f32 1.0, %v9644_v40 }
 0xfc3   :  { %9645 = vrcp.f32 %v2204_v13 }
 0xfcd   :  { %v9646_v48 = vpop.eup %9645 }
0x1028   :  { %v2211_v27 = vpop.permute.xlu1 %2210 }
0x1029   :  { %v10703_v33 = vadd.f32 %v2211_v27, %v2207_v44 }
0x102b   :  { %9647 = vtanh.f32 %v10703_v33 }
0x1035   :  { %v9648_v49 = vpop.eup %9647 }
0x1036   :  { %v2215_v52 = vmul.f32 %v9648_v49, %v9646_v48 }
0x1038   :  { %2223 = vrot.lane.b32.xlu0 %v2215_v52, %s10055_s7 }
0x10aa   :  { %v10707_v62 = vpop.permute.xlu0 %2223 }
0x10ab   :  { %8877 = vmatmul.mubr.msk.f32.vlgmr.msra.gmra.mrb[18].mxu1 %vm2105_vm10, %v10707_v62 }
0x10ac   :  { %9363 = vmatpush3.bf16.msra.mxu1 %v10279_v5  ;;  %8887 = vmatprep.mubr.msk.f32.mxu1 %vm10064_vm0, %v11573_v1 }
0x10ad   :  { %9364 = vmatprep.subr.bf16.mxu1 %v11571_v0 }
0x10b0   :  { %9366 = vmatpush3.bf16.msra.mxu1 %v10282_v7 }
0x10b1   :  { %9367 = vmatprep.subr.bf16.mxu1 %v11571_v0 }
0x10b3   :  { %8888 = vmatmul.mubr.msk.f32.vlgmr.msra.gmra.mrb[20].mxu1 %vm231_vm2, %v10318_v38 }
0x10b4   :  { %9369 = vmatpush3.bf16.msra.mxu1 %v10286_v10  ;;  %8894 = vmatprep.mubr.msk.f32.mxu1 %vm10064_vm0, %v11573_v1 }
0x10b5   :  { %8908 = vmatprep.subr.mxu1 %v11573_v1 }
0x117e   :  { %v2293_v17 = vpop.f32.mrb[18].mxu1 }
0x117f   :  { %v2294_v8 = vadd.f32 %v10726_v56, %v2293_v17  ;;  %v8878_v40 = vpop.f32.mrb[19].mxu1  ;;  %v11592_v17 = vmov 0.0  }
0x1181   :  { %v2298_v13 = vsel %vm2297_vm11, %v2294_v8, -inf }
0x1182   :  { %2299 = vmax.xlane.f32.xlu1 %v2298_v13 }
0x1186   :  { %v2376_v38 = vpop.f32.mrb[20].mxu1 }
0x1187   :  { %v8889_v44 = vpop.f32.mrb[21].mxu1 }
0x120f   :  { %v2300_v27 = vpop.xlane.xlu1 %2299 }
0x1210   :  { %v2301_v48 = vsub.f32 %v2294_v8, %v2300_v27 }
0x1212   :  { %v2302_v49 = vmul.f32 1.442695, %v2301_v48 }
0x1214   :  { %9649 = vpow2.f32 %v2302_v49 }
0x121e   :  { %v9650_v52 = vpop.eup %9649 }
0x121f   :  { %v2304_v0 = vsel %vm2297_vm11, %v9650_v52, 0.0 }
0x1220   :  { %2305 = vadd.xlane.f32.xlu0 %v2304_v0 }
0x12ad   :  { %v2306_v1 = vpop.xlane.xlu0 %2305 }
0x12ae   :  { %9651 = vrcp.f32 %v2306_v1 }
0x12b8   :  { %v9652_v10 = vpop.eup %9651 }
0x12b9   :  { %v2308_v7 = vmul.f32 %v9652_v10, %v9650_v52 }
0x12bb   :  { %8895 = vmatmul.mubr.msk.f32.vlgmr.msra.gmra.mrb[22].mxu1 %vm305_vm1, %v2308_v7  ;;  %2309 = vst.msk [vmem:[#allocation16] sm:$0x3] %vm2297_vm11, %v2308_v7 }
0x12bc   :  { %8909 = vmatpush3.xpose.msk.msra.mxu1 %vm508_vm3, %v10327_v39  ;;  %8910 = vmatprep.mubr.msk.f32.mxu1 %vm10064_vm0, %v11592_v17 }
0x12bd   :  { %8913 = vmatprep.subr.mxu1 %v11592_v17 }
0x138e   :  { %v2449_v8 = vpop.f32.mrb[22].mxu1 }
0x138f   :  { %v2450_v40 = vadd.f32 %v2449_v8, %v2376_v38  ;;  %v8896_v13 = vpop.f32.mrb[23].mxu1 }
0x1391   :  { %v2453_v0 = vadd.f32 %v10300_v14, %v2450_v40 }
0x1393   :  { %9653 = vtanh.f32 %v2453_v0  ;;  %v8365_v10 = vmul.f32 -1.442695, %v2453_v0 }
0x1395   :  { %9655 = vpow2.f32 %v8365_v10 }
0x139d   :  { %v9654_v1 = vpop.eup %9653 }
0x139e   :  { %2463 = vrot.lane.b32.xlu0 %v9654_v1, %s10055_s7 }
0x139f   :  { %v9656_v7 = vpop.eup %9655 }
0x13a0   :  { %v2457_v44 = vadd.f32 1.0, %v9656_v7 }
0x13a2   :  { %9657 = vrcp.f32 %v2457_v44 }
0x13ac   :  { %v9658_v39 = vpop.eup %9657 }
0x13ad   :  { %v2461_v49 = vmul.f32 %v9658_v39, %v10305_v28 }
0x1410   :  { %v2464_v27 = vpop.permute.xlu0 %2463 }
0x1411   :  { %v2466_v48 = vmul.f32 %v9658_v39, %v2464_v27 }
0x1413   :  { %2468 = vrot.lane.b32.xlu1 %v2466_v48, %s10066_s0 }
0x1485   :  { %v2469_v38 = vpop.permute.xlu1 %2468 }
0x1486   :  { %v10742_v52 = vadd.f32 %v2469_v38, %v2461_v49 }
0x1488   :  { %9659 = vtanh.f32 %v10742_v52 }
0x1492   :  { %v9660_v14 = vpop.eup %9659 }
0x1493   :  { %2474 = vrot.lane.b32.xlu1 %v9660_v14, %s10055_s7 }
0x1505   :  { %v2475_v8 = vpop.permute.xlu1 %2474 }
0x1506   :  { %v2477_v40 = vmul.f32 %v9658_v39, %v2475_v8 }
0x1508   :  { %2479 = vrot.lane.b32.xlu0 %v2477_v40, %s10066_s0 }
0x157a   :  { %v10747_v13 = vpop.permute.xlu0 %2479 }
0x157b   :  { %8906 = vmatmul.mubr.msk.f32.vlgmr.msra.gmra.mrb[24].mxu0 %vm231_vm2, %v10747_v13 }
0x157c   :  { %8919 = vmatpush3.msk.msra.mxu0 %vm688_vm5, %v10371_v16  ;;  %8920 = vmatprep.mubr.msk.f32.mxu0 %vm10064_vm0, %v11592_v17 }
0x157d   :  { %8928 = vmatprep.subr.mxu0 %v11592_v17 }
0x164e   :  { %v2549_v28 = vpop.f32.mrb[24].mxu0 }
0x164f   :  { %v2560_v0 = vrot.slane %v2549_v28, %v10335_v45  ;;  %v8907_v1 = vpop.f32.mrb[25].mxu0 }
0x1651   :  { %v2561_v10 = vcombine.high %v2560_v0, %v2560_v0  ;;  %v2568_v7 = vrot.slane %v2560_v0, %v10335_v45 }
0x1653   :  { %8911 = vmatmul.mubr.msk.f32.vlgmr.msra.gmra.mrb[24].mxu1 %vm508_vm3, %v2568_v7  ;;  %v2575_v16 = vrot.slane %v2561_v10, %v10335_v45 }
0x1654   :  { %8914 = vmatpush3.xpose.msk.msra.mxu1 %vm508_vm3, %v10342_v51  ;;  %8915 = vmatprep.mubr.msk.f32.mxu1 %vm10064_vm0, %v11592_v17 }
0x1655   :  { %8923 = vmatprep.subr.mxu1 %v11592_v17 }
0x1657   :  { %8916 = vmatmul.mubr.msk.f32.vlgmr.msra.gmra.mrb[26].mxu1 %vm508_vm3, %v2575_v16 }
0x1658   :  { %8924 = vmatpush3.msk.msra.mxu1 %vm688_vm5, %v10366_v15  ;;  %8925 = vmatprep.mubr.msk.f32.mxu1 %vm10064_vm0, %v11592_v17 }
0x1659   :  { %8933 = vmatprep.subr.mxu1 %v11592_v17 }
0x1726   :  { %v2644_v44 = vpop.f32.mrb[24].mxu1 }
0x1727   :  { %v2720_v39 = vmul.f32 0.35355338, %v2644_v44  ;;  %v8912_v51 = vpop.f32.mrb[25].mxu1 }
0x1729   :  { %v2722_v27 = vsel %vm661_vm4, %v2720_v39, -inf }
0x172a   :  { %2723 = vmax.xlane.f32.xlu0 %v2722_v27  ;;  %v2716_v48 = vpop.f32.mrb[26].mxu1 }
0x172b   :  { %v2721_v49 = vmul.f32 0.35355338, %v2716_v48  ;;  %v8917_v38 = vpop.f32.mrb[27].mxu1  ;;  %v10776_v48 = vrot.slane %v2568_v7, %v10357_v61 }
0x172d   :  { %v2725_v14 = vsel %vm661_vm4, %v2721_v49, -inf }
0x172e   :  { %2726 = vmax.xlane.f32.xlu1 %v2725_v14 }
0x17b7   :  { %v2724_v8 = vpop.xlane.xlu0 %2723 }
0x17b8   :  { %v2728_v40 = vsub.f32 %v2720_v39, %v2724_v8  ;;  %v10781_v39 = vrot.slane %v2575_v16, %v10357_v61 }
0x17ba   :  { %v2730_v15 = vmul.f32 1.442695, %v2728_v40 }
0x17bb   :  { %v2727_v28 = vpop.xlane.xlu1 %2726 }
0x17bc   :  { %9661 = vpow2.f32 %v2730_v15  ;;  %v2729_v0 = vsub.f32 %v2721_v49, %v2727_v28 }
0x17be   :  { %v2732_v1 = vmul.f32 1.442695, %v2729_v0 }
0x17c0   :  { %9663 = vpow2.f32 %v2732_v1 }
0x17c6   :  { %v9662_v10 = vpop.eup %9661 }
0x17c7   :  { %v2734_v44 = vsel %vm661_vm4, %v9662_v10, 0.0 }
0x17c8   :  { %2735 = vadd.xlane.f32.xlu1 %v2734_v44 }
0x17ca   :  { %v9664_v51 = vpop.eup %9663 }
0x17cb   :  { %v2737_v27 = vsel %vm661_vm4, %v9664_v51, 0.0 }
0x17cc   :  { %2738 = vadd.xlane.f32.xlu0 %v2737_v27 }
0x17d9   :  { %2899 = vrot.lane.b32.xlu1 %v10776_v48, %s10068_s6 }
0x17e2   :  { %2977 = vrot.lane.b32.xlu0 %v10781_v39, %s10068_s6 }
0x1855   :  { %v2736_v49 = vpop.xlane.xlu1 %2735 }
0x1856   :  { %9665 = vrcp.f32 %v2736_v49 }
0x1859   :  { %v2739_v38 = vpop.xlane.xlu0 %2738  ;;  %v2900_v16 = vpop.permute.xlu1 %2899 }
0x185a   :  { %9667 = vrcp.f32 %v2739_v38 }
0x185d   :  { %v2978_v28 = vpop.permute.xlu0 %2977 }
0x1860   :  { %v9666_v14 = vpop.eup %9665 }
0x1861   :  { %v2742_v8 = vmul.f32 %v9666_v14, %v9662_v10 }
0x1863   :  { %8921 = vmatmul.mubr.msk.f32.vlgmr.msra.gmra.mrb[26].mxu0 %vm684_vm6, %v2742_v8 }
0x1864   :  { %v9668_v40 = vpop.eup %9667  ;;  %8929 = vmatpush3.xpose.msk.msra.mxu0 %vm508_vm3, %v10394_v26  ;;  %8930 = vmatprep.mubr.msk.f32.mxu0 %vm10064_vm0, %v11592_v17 }
0x1865   :  { %v2743_v7 = vmul.f32 %v9668_v40, %v9664_v51  ;;  %8938 = vmatprep.subr.mxu0 %v11592_v17 }
0x1867   :  { %v2890_v15 = vrot.slane %v2743_v7, 7  ;;  %8926 = vmatmul.mubr.msk.f32.vlgmr.msra.gmra.mrb[28].mxu1 %vm684_vm6, %v2743_v7  ;;  %8931 = vmatmul.mubr.msk.f32.vlgmr.msra.gmra.mrb[28].mxu0 %vm508_vm3, %v2900_v16 }
0x1868   :  { %8934 = vmatpush3.xpose.msk.msra.mxu1 %vm508_vm3, %v10384_v22  ;;  %8935 = vmatprep.mubr.msk.f32.mxu1 %vm10064_vm0, %v11592_v17 }
0x1869   :  { %v2891_v26 = vsel %vm839_vm7, %v2890_v15, %v2742_v8  ;;  %8939 = vmatpush3.msk.msra.mxu0 %vm688_vm5, %v10428_v3  ;;  %8943 = vmatprep.subr.mxu1 %v11592_v17 }
0x186a   :  { %8375 = vst.msk [vmem:[%s11569_s15 + $0x8] sm:$0x3] %vm842_vm8, %v2891_v26  ;;  %8940 = vmatprep.mubr.msk.f32.mxu0 %vm10064_vm0, %v11592_v17  ;;  %8948 = vmatprep.subr.mxu0 %v11592_v17 }
0x186b   :  { %8936 = vmatmul.mubr.msk.f32.vlgmr.msra.gmra.mrb[30].mxu1 %vm508_vm3, %v2978_v28 }
0x186c   :  { %8944 = vmatpush3.msk.msra.mxu1 %vm688_vm5, %v10423_v2  ;;  %8945 = vmatprep.mubr.msk.f32.mxu1 %vm10064_vm0, %v11592_v17 }
0x186d   :  { %8953 = vmatprep.subr.mxu1 %v11592_v17 }
0x1936   :  { %v2813_v22 = vpop.f32.mrb[26].mxu0 }
0x1937   :  { %v8922_v3 = vpop.f32.mrb[27].mxu0 }
0x193a   :  { %v2886_v0 = vpop.f32.mrb[28].mxu1  ;;  %v2969_v1 = vpop.f32.mrb[28].mxu0 }
0x193b   :  { %v3874_v10 = vrot.slane %v2886_v0, 7  ;;  %v3051_v44 = vmul.f32 0.35355338, %v2969_v1  ;;  %v8927_v51 = vpop.f32.mrb[29].mxu1  ;;  %v8932_v27 = vpop.f32.mrb[29].mxu0 }
0x193d   :  { %v3053_v49 = vsel %vm661_vm4, %v3051_v44, -inf  ;;  %v10816_v38 = vsel %vm839_vm7, %v3874_v10, %v2813_v22 }
0x193e   :  { %3054 = vmax.xlane.f32.xlu0 %v3053_v49  ;;  %v3047_v2 = vpop.f32.mrb[30].mxu1 }
0x193f   :  { %v3052_v14 = vmul.f32 0.35355338, %v3047_v2  ;;  %v8937_v8 = vpop.f32.mrb[31].mxu1 }
0x1941   :  { %v3056_v40 = vsel %vm661_vm4, %v3052_v14, -inf }
0x1942   :  { %3057 = vmax.xlane.f32.xlu1 %v3056_v40 }
0x19cb   :  { %v3055_v7 = vpop.xlane.xlu0 %3054 }
0x19cc   :  { %v3059_v16 = vsub.f32 %v3051_v44, %v3055_v7 }
0x19ce   :  { %v3061_v15 = vmul.f32 1.442695, %v3059_v16 }
0x19cf   :  { %v3058_v26 = vpop.xlane.xlu1 %3057 }
0x19d0   :  { %9669 = vpow2.f32 %v3061_v15  ;;  %v3060_v28 = vsub.f32 %v3052_v14, %v3058_v26 }
0x19d2   :  { %v3063_v3 = vmul.f32 1.442695, %v3060_v28 }
0x19d4   :  { %9671 = vpow2.f32 %v3063_v3 }
0x19da   :  { %v9670_v0 = vpop.eup %9669 }
0x19db   :  { %v3065_v1 = vsel %vm661_vm4, %v9670_v0, 0.0 }
0x19dc   :  { %3066 = vadd.xlane.f32.xlu1 %v3065_v1 }
0x19de   :  { %v9672_v22 = vpop.eup %9671 }
0x19df   :  { %v3068_v10 = vsel %vm661_vm4, %v9672_v22, 0.0 }
0x19e0   :  { %3069 = vadd.xlane.f32.xlu0 %v3068_v10 }
0x19ed   :  { %3226 = vrot.lane.b32.xlu1 %v10776_v48, %s10069_s4 }
0x19f6   :  { %3300 = vrot.lane.b32.xlu0 %v10781_v39, %s10069_s4 }
0x1a69   :  { %v3067_v44 = vpop.xlane.xlu1 %3066 }
0x1a6a   :  { %9673 = vrcp.f32 %v3067_v44 }
0x1a6d   :  { %v3070_v51 = vpop.xlane.xlu0 %3069  ;;  %v3227_v8 = vpop.permute.xlu1 %3226 }
0x1a6e   :  { %9675 = vrcp.f32 %v3070_v51 }
0x1a71   :  { %v3301_v7 = vpop.permute.xlu0 %3300 }
0x1a74   :  { %v9674_v27 = vpop.eup %9673 }
0x1a75   :  { %v3073_v49 = vmul.f32 %v9674_v27, %v9670_v0 }
0x1a77   :  { %8941 = vmatmul.mubr.msk.f32.vlgmr.msra.gmra.mrb[30].mxu0 %vm684_vm6, %v3073_v49 }
0x1a78   :  { %v9676_v2 = vpop.eup %9675  ;;  %8949 = vmatpush3.xpose.msk.msra.mxu0 %vm508_vm3, %v10448_v19  ;;  %8950 = vmatprep.mubr.msk.f32.mxu0 %vm10064_vm0, %v11592_v17 }
0x1a79   :  { %v3074_v14 = vmul.f32 %v9676_v2, %v9672_v22  ;;  %8958 = vmatprep.subr.mxu0 %v11592_v17 }
0x1a7b   :  { %v3221_v40 = vrot.slane %v3074_v14, 7  ;;  %8946 = vmatmul.mubr.msk.f32.vlgmr.msra.gmra.mrb[32].mxu1 %vm684_vm6, %v3074_v14  ;;  %8951 = vmatmul.mubr.msk.f32.vlgmr.msra.gmra.mrb[32].mxu0 %vm508_vm3, %v3227_v8 }
0x1a7c   :  { %8954 = vmatpush3.xpose.msk.msra.mxu1 %vm508_vm3, %v10438_v11  ;;  %8955 = vmatprep.mubr.msk.f32.mxu1 %vm10064_vm0, %v11592_v17 }
0x1a7d   :  { %v3222_v19 = vsel %vm839_vm7, %v3221_v40, %v3073_v49  ;;  %8959 = vmatpush3.msk.msra.mxu0 %vm688_vm5, %v10481_v59  ;;  %8963 = vmatprep.subr.mxu1 %v11592_v17 }
0x1a7e   :  { %8384 = vst.msk [vmem:[%s11569_s15 + $0xa] sm:$0x3] %vm842_vm8, %v3222_v19  ;;  %8960 = vmatprep.mubr.msk.f32.mxu0 %vm10064_vm0, %v11592_v17  ;;  %8968 = vmatprep.subr.mxu0 %v11592_v17 }
0x1a7f   :  { %8956 = vmatmul.mubr.msk.f32.vlgmr.msra.gmra.mrb[34].mxu1 %vm508_vm3, %v3301_v7 }
0x1a80   :  { %8964 = vmatpush3.msk.msra.mxu1 %vm688_vm5, %v10477_v58  ;;  %8965 = vmatprep.mubr.msk.f32.mxu1 %vm10064_vm0, %v11592_v17 }
0x1a81   :  { %8973 = vmatprep.subr.mxu1 %v11592_v17 }
0x1b4a   :  { %v3144_v11 = vpop.f32.mrb[30].mxu0 }
0x1b4b   :  { %v8942_v59 = vpop.f32.mrb[31].mxu0 }
0x1b4e   :  { %v3217_v16 = vpop.f32.mrb[32].mxu1  ;;  %v3296_v15 = vpop.f32.mrb[32].mxu0 }
0x1b4f   :  { %v3879_v26 = vrot.slane %v3217_v16, 7  ;;  %v3374_v28 = vmul.f32 0.35355338, %v3296_v15  ;;  %v8947_v3 = vpop.f32.mrb[33].mxu1  ;;  %v8952_v0 = vpop.f32.mrb[33].mxu0 }
0x1b51   :  { %v3376_v1 = vsel %vm661_vm4, %v3374_v28, -inf  ;;  %v10856_v22 = vsel %vm839_vm7, %v3879_v26, %v3144_v11 }
0x1b52   :  { %3377 = vmax.xlane.f32.xlu0 %v3376_v1  ;;  %v3370_v58 = vpop.f32.mrb[34].mxu1 }
0x1b53   :  { %v3375_v10 = vmul.f32 0.35355338, %v3370_v58  ;;  %v8957_v44 = vpop.f32.mrb[35].mxu1 }
0x1b55   :  { %v3379_v51 = vsel %vm661_vm4, %v3375_v10, -inf }
0x1b56   :  { %3380 = vmax.xlane.f32.xlu1 %v3379_v51 }
0x1bdf   :  { %v3378_v27 = vpop.xlane.xlu0 %3377 }
0x1be0   :  { %v3382_v49 = vsub.f32 %v3374_v28, %v3378_v27 }
0x1be2   :  { %v3384_v2 = vmul.f32 1.442695, %v3382_v49 }
0x1be3   :  { %v3381_v14 = vpop.xlane.xlu1 %3380 }
0x1be4   :  { %9677 = vpow2.f32 %v3384_v2  ;;  %v3383_v8 = vsub.f32 %v3375_v10, %v3381_v14 }
0x1be6   :  { %v3386_v40 = vmul.f32 1.442695, %v3383_v8 }
0x1be8   :  { %9679 = vpow2.f32 %v3386_v40 }
0x1bee   :  { %v9678_v19 = vpop.eup %9677 }
0x1bef   :  { %v3388_v7 = vsel %vm661_vm4, %v9678_v19, 0.0 }
0x1bf0   :  { %3389 = vadd.xlane.f32.xlu1 %v3388_v7 }
0x1bf2   :  { %v9680_v11 = vpop.eup %9679 }
0x1bf3   :  { %v3391_v59 = vsel %vm661_vm4, %v9680_v11, 0.0 }
0x1bf4   :  { %3392 = vadd.xlane.f32.xlu0 %v3391_v59 }
0x1c01   :  { %3549 = vrot.lane.b32.xlu1 %v10776_v48, %s10070_s20 }
0x1c0a   :  { %3623 = vrot.lane.b32.xlu0 %v10781_v39, %s10070_s20 }
0x1c7d   :  { %v3390_v16 = vpop.xlane.xlu1 %3389 }
0x1c7e   :  { %9681 = vrcp.f32 %v3390_v16 }
0x1c81   :  { %v3393_v15 = vpop.xlane.xlu0 %3392  ;;  %v3550_v48 = vpop.permute.xlu1 %3549 }
0x1c82   :  { %9683 = vrcp.f32 %v3393_v15 }
0x1c85   :  { %v3624_v1 = vpop.permute.xlu0 %3623 }
0x1c88   :  { %v9682_v26 = vpop.eup %9681 }
0x1c89   :  { %v3396_v28 = vmul.f32 %v9682_v26, %v9678_v19 }
0x1c8b   :  { %8961 = vmatmul.mubr.msk.f32.vlgmr.msra.gmra.mrb[34].mxu0 %vm684_vm6, %v3396_v28 }
0x1c8c   :  { %v9684_v3 = vpop.eup %9683  ;;  %8969 = vmatpush3.xpose.msk.msra.mxu0 %vm508_vm3, %v10502_v12  ;;  %8970 = vmatprep.mubr.msk.f32.mxu0 %vm10064_vm0, %v11592_v17 }
0x1c8d   :  { %v3397_v0 = vmul.f32 %v9684_v3, %v9680_v11  ;;  %8978 = vmatprep.subr.mxu0 %v11592_v17 }
0x1c8f   :  { %v3544_v39 = vrot.slane %v3397_v0, 7  ;;  %8966 = vmatmul.mubr.msk.f32.vlgmr.msra.gmra.mrb[36].mxu1 %vm684_vm6, %v3397_v0  ;;  %8971 = vmatmul.mubr.msk.f32.vlgmr.msra.gmra.mrb[36].mxu0 %vm508_vm3, %v3550_v48 }
0x1c90   :  { %8974 = vmatpush3.xpose.msk.msra.mxu1 %vm508_vm3, %v10492_v6  ;;  %8975 = vmatprep.mubr.msk.f32.mxu1 %vm10064_vm0, %v11592_v17  ;;  %v11593_v6 = vmov 0.0|0.0  }
0x1c91   :  { %v3545_v12 = vsel %vm839_vm7, %v3544_v39, %v3396_v28  ;;  %8979 = vmatpush3.msk.msra.mxu0 %vm688_vm5, %v10534_v60  ;;  %8980 = vmatprep.mubr.msk.f32.mxu0 %vm10064_vm0, %v11592_v17 }
0x1c92   :  { %8393 = vst.msk [vmem:[%s11569_s15 + $0xc] sm:$0x3] %vm842_vm8, %v3545_v12  ;;  %8983 = vmatprep.subr.mxu1 %v11592_v17  ;;  %9376 = vmatprep.subr.bf16.mxu0 %v11593_v6 }
0x1c93   :  { %8976 = vmatmul.mubr.msk.f32.vlgmr.msra.gmra.mrb[38].mxu1 %vm508_vm3, %v3624_v1 }
0x1c94   :  { %8984 = vmatpush3.msk.msra.mxu1 %vm688_vm5, %v10529_v57  ;;  %8985 = vmatprep.mubr.msk.f32.mxu1 %vm10064_vm0, %v11592_v17 }
0x1c95   :  { %9383 = vmatprep.subr.bf16.mxu1 %v10557_v31 }
0x1d5e   :  { %v3467_v60 = vpop.f32.mrb[34].mxu0 }
0x1d5f   :  { %v8962_v58 = vpop.f32.mrb[35].mxu0 }
0x1d62   :  { %v3540_v10 = vpop.f32.mrb[36].mxu1  ;;  %v3619_v44 = vpop.f32.mrb[36].mxu0 }
0x1d63   :  { %v3886_v51 = vrot.slane %v3540_v10, 7  ;;  %v3697_v27 = vmul.f32 0.35355338, %v3619_v44  ;;  %v8967_v49 = vpop.f32.mrb[37].mxu1  ;;  %v8972_v2 = vpop.f32.mrb[37].mxu0 }
0x1d65   :  { %v3699_v14 = vsel %vm661_vm4, %v3697_v27, -inf  ;;  %v3887_v8 = vsel %vm839_vm7, %v3886_v51, %v3467_v60 }
0x1d66   :  { %3700 = vmax.xlane.f32.xlu0 %v3699_v14  ;;  %v3693_v40 = vpop.f32.mrb[38].mxu1 }
0x1d67   :  { %v3698_v57 = vmul.f32 0.35355338, %v3693_v40  ;;  %v8977_v19 = vpop.f32.mrb[39].mxu1 }
0x1d69   :  { %v3702_v7 = vsel %vm661_vm4, %v3698_v57, -inf }
0x1d6a   :  { %3703 = vmax.xlane.f32.xlu1 %v3702_v7 }
0x1df3   :  { %v3701_v11 = vpop.xlane.xlu0 %3700 }
0x1df4   :  { %v3705_v59 = vsub.f32 %v3697_v27, %v3701_v11 }
0x1df6   :  { %v3707_v16 = vmul.f32 1.442695, %v3705_v59 }
0x1df7   :  { %v3704_v15 = vpop.xlane.xlu1 %3703 }
0x1df8   :  { %9685 = vpow2.f32 %v3707_v16  ;;  %v3706_v26 = vsub.f32 %v3698_v57, %v3704_v15 }
0x1dfa   :  { %v3709_v28 = vmul.f32 1.442695, %v3706_v26 }
0x1dfc   :  { %9687 = vpow2.f32 %v3709_v28 }
0x1e02   :  { %v9686_v3 = vpop.eup %9685 }
0x1e03   :  { %v3711_v0 = vsel %vm661_vm4, %v9686_v3, 0.0 }
0x1e04   :  { %3712 = vadd.xlane.f32.xlu1 %v3711_v0 }
0x1e06   :  { %v9688_v48 = vpop.eup %9687 }
0x1e07   :  { %v3714_v39 = vsel %vm661_vm4, %v9688_v48, 0.0 }
0x1e08   :  { %3715 = vadd.xlane.f32.xlu0 %v3714_v39 }
0x1e15   :  { %3888 = vrot.lane.b32.xlu1 %v3887_v8, %s10061_s28 }
0x1e1e   :  { %3881 = vrot.lane.b32.xlu0 %v10856_v22, %s10051_s29 }
0x1e91   :  { %v3713_v12 = vpop.xlane.xlu1 %3712 }
0x1e92   :  { %9689 = vrcp.f32 %v3713_v12 }
0x1e95   :  { %v3716_v1 = vpop.xlane.xlu0 %3715  ;;  %v3889_v19 = vpop.permute.xlu1 %3888 }
0x1e96   :  { %9691 = vrcp.f32 %v3716_v1 }
0x1e99   :  { %v3882_v57 = vpop.permute.xlu0 %3881 }
0x1e9a   :  { %v3898_v7 = vsel %vm508_vm3, %v10816_v38, %v3882_v57 }
0x1e9b   :  { %v3899_v11 = vsel %vm305_vm1, %v3898_v7, %v3889_v19 }
0x1e9c   :  { %v9690_v60 = vpop.eup %9689 }
0x1e9d   :  { %v3719_v58 = vmul.f32 %v9690_v60, %v9686_v3 }
0x1e9f   :  { %8981 = vmatmul.mubr.msk.f32.vlgmr.msra.gmra.mrb[38].mxu0 %vm684_vm6, %v3719_v58 }
0x1ea0   :  { %v9692_v10 = vpop.eup %9691  ;;  %9378 = vmatpush3.bf16.msra.mxu0 %v10549_v23  ;;  %8996 = vmatprep.mubr.msk.f32.mxu0 %vm10064_vm0, %v11592_v17 }
0x1ea1   :  { %v3720_v44 = vmul.f32 %v9692_v10, %v9688_v48  ;;  %9379 = vmatprep.subr.bf16.mxu0 %v11593_v6 }
0x1ea3   :  { %v3867_v51 = vrot.slane %v3720_v44, 7  ;;  %8986 = vmatmul.mubr.msk.f32.vlgmr.msra.gmra.mrb[40].mxu1 %vm684_vm6, %v3720_v44 }
0x1ea4   :  { %9381 = vmatpush3.bf16.msra.mxu0 %v10552_v25  ;;  %9385 = vmatpush1.bf16.msra.mxu1 %v10559_v41 }
0x1ea5   :  { %v3868_v22 = vsel %vm839_vm7, %v3867_v51, %v3719_v58  ;;  %9387 = vmatprep.subr.bf16.mxu1 %v10561_v42  ;;  %4041 = vmatprep.mubr.f32.mxu1 %v11592_v17 }
0x1ea6   :  { %8402 = vst.msk [vmem:[%s11569_s15 + $0xe] sm:$0x3] %vm842_vm8, %v3868_v22  ;;  %9414 = vmatprep.subr.bf16.mxu0 %v11593_v6 }
0x1ea8   :  { %9389 = vmatpush1.bf16.msra.mxu1 %v10565_v47 }
0x1ea9   :  { %9391 = vmatprep.subr.bf16.mxu1 %v10584_v9 }
0x1f72   :  { %v3790_v27 = vpop.f32.mrb[38].mxu0 }
0x1f73   :  { %v8982_v49 = vpop.f32.mrb[39].mxu0 }
0x1f76   :  { %v3863_v2 = vpop.f32.mrb[40].mxu1 }
0x1f77   :  { %v3893_v14 = vrot.slane %v3863_v2, 7  ;;  %v8987_v8 = vpop.f32.mrb[41].mxu1 }
0x1f79   :  { %v3894_v40 = vsel %vm839_vm7, %v3893_v14, %v3790_v27 }
0x1f7a   :  { %3895 = vrot.lane.b32.xlu1 %v3894_v40, %s10071_s18  ;;  %v11595_v40 = vld [vmem:[#allocation24_spill] sm:$0xff] }
0x1fec   :  { %v3896_v59 = vpop.permute.xlu1 %3895 }
0x1fed   :  { %v3900_v16 = vsel %vm1885_vm9, %v3899_v11, %v3896_v59 }
0x1fee   :  { %8997 = vmatmul.mubr.msk.f32.vlgmr.msra.gmra.mrb[40].mxu0 %vm231_vm2, %v3900_v16 }
0x1fef   :  { %9416 = vmatpush3.bf16.msra.mxu0 %v10672_v29  ;;  %9015 = vmatprep.mubr.msk.f32.mxu0 %vm10064_vm0, %v11592_v17 }
0x1ff0   :  { %9417 = vmatprep.subr.bf16.mxu0 %v11593_v6 }
0x1ff3   :  { %9419 = vmatpush3.bf16.msra.mxu0 %v10678_v37 }
0x1ff4   :  { %9420 = vmatprep.subr.bf16.mxu0 %v11593_v6 }
0x1ff7   :  { %9422 = vmatpush3.bf16.msra.mxu0 %v10688_v50 }
0x1ff8   :  { %9423 = vmatprep.subr.bf16.mxu0 %v11593_v6 }
0x1ffb   :  { %9425 = vmatpush3.bf16.msra.mxu0 %v10698_v63 }
0x1ffc   :  { %9426 = vmatprep.subr.bf16.mxu0 %v11593_v6 }
0x20c1   :  { %v3970_v38 = vpop.f32.mrb[40].mxu0 }
0x20c2   :  { %v8998_v15 = vpop.f32.mrb[41].mxu0  ;;  %8404 = vmatmul.mubr.msk.f32.vlgmr.msra.gmra.mrb[42].mxu1 %vm231_vm2, %v3970_v38 }
0x20c3   :  { %9393 = vmatpush1.bf16.msra.mxu1 %v10599_v21  ;;  %4112 = vmatprep.mubr.f32.mxu1 %v11592_v17 }
0x20c4   :  { %9395 = vmatprep.subr.bf16.mxu1 %v10601_v24 }
0x20c7   :  { %9397 = vmatpush1.bf16.msra.mxu1 %v10611_v43 }
0x20c8   :  { %9399 = vmatprep.subr.bf16.mxu1 %v10615_v46 }
0x20ca   :  { %8405 = vmatmul.mubr.msk.f32.vlgmr.msra.gmra.mrb[42].mxu1 %vm231_vm2, %v10747_v13 }
0x20cb   :  { %9401 = vmatpush1.bf16.msra.mxu1 %v10618_v53  ;;  %4183 = vmatprep.mubr.f32.mxu1 %v11592_v17 }
0x20cc   :  { %9403 = vmatprep.subr.bf16.mxu1 %v10621_v54 }
0x20cf   :  { %9405 = vmatpush1.bf16.msra.mxu1 %v10626_v4 }
0x20d0   :  { %9407 = vmatprep.subr.bf16.mxu1 %v10630_v36 }
0x20d3   :  { %9409 = vmatpush1.bf16.msra.mxu1 %v10633_v18 }
0x20d4   :  { %9411 = vmatprep.subr.bf16.mxu1 %v10636_v20 }
0x20d7   :  { %9413 = vmatpush1.bf16.msra.mxu1 %v10639_v30 }
0x20d8   :  { %9435 = vmatprep.subr.bf16.mxu1 %v11593_v6 }
0x20da   :  { %8406 = vmatmul.mubr.msk.f32.vlgmr.msra.gmra.mrb[42].mxu1 %vm2105_vm10, %v10707_v62 }
0x20db   :  { %9437 = vmatpush3.bf16.msra.mxu1 %v10308_v32  ;;  %9044 = vmatprep.mubr.msk.f32.mxu1 %vm10064_vm0, %v11592_v17 }
0x20dc   :  { %9438 = vmatprep.subr.bf16.mxu1 %v11593_v6 }
0x20df   :  { %9440 = vmatpush3.bf16.msra.mxu1 %v10311_v34 }
0x20e0   :  { %9057 = vmatprep.subr.mxu1 %v11592_v17 }
0x21ad   :  { %v4185_v26 = vpop.f32.mrb[42].mxu1 }
0x21ae   :  { %v4192_v28 = vadd.f32 %v4185_v26, %v10655_v35  ;;  %v4187_v3 = vpop.f32.mrb[43].mxu1 }
0x21af   :  { %v4193_v48 = vadd.f32 %v4187_v3, %v10659_v55 }
0x21b0   :  { %v8407_v0 = vmul.f32 -1.442695, %v4192_v28 }
0x21b1   :  { %v8408_v58 = vmul.f32 -1.442695, %v4193_v48 }
0x21b2   :  { %9693 = vpow2.f32 %v8407_v0 }
0x21b3   :  { %9695 = vtanh.f32 %v4193_v48 }
0x21bc   :  { %v9694_v62 = vpop.eup %9693 }
0x21bd   :  { %v4197_v39 = vadd.f32 1.0, %v9694_v62  ;;  %v9696_v12 = vpop.eup %9695 }
0x21bf   :  { %9697 = vrcp.f32 %v4197_v39 }
0x21c0   :  { %9699 = vpow2.f32 %v8408_v58 }
0x21c9   :  { %v9698_v1 = vpop.eup %9697 }
0x21ca   :  { %v4208_v60 = vmul.f32 %v9698_v1, %v9696_v12  ;;  %v9700_v10 = vpop.eup %9699  ;;  %v4207_v51 = vmul.f32 %v9698_v1, %v10703_v33  ;;  %v11594_v33 = vld [vmem:[#allocation23_spill] sm:$0xff]  ;;  %v11001_v1 = vld [vmem:[#allocation8] ss:$0 sm:$0xff] }
0x21cb   :  { %v4204_v44 = vadd.f32 1.0, %v9700_v10 }
0x21cc   :  { %4210 = vrot.lane.b32.xlu0 %v4208_v60, %s10055_s7 }
0x21cd   :  { %9701 = vrcp.f32 %v4204_v44 }
0x21d7   :  { %v9702_v49 = vpop.eup %9701 }
0x223e   :  { %v4211_v22 = vpop.permute.xlu0 %4210 }
0x223f   :  { %v10966_v27 = vadd.f32 %v4211_v22, %v4207_v51 }
0x2241   :  { %9703 = vtanh.f32 %v10966_v27 }
0x224b   :  { %v9704_v2 = vpop.eup %9703 }
0x224c   :  { %v4215_v14 = vmul.f32 %v9704_v2, %v9702_v49 }
0x224e   :  { %4217 = vrot.lane.b32.xlu1 %v4215_v14, %s10055_s7 }
0x22c0   :  { %v10970_v8 = vpop.permute.xlu1 %4217 }
0x22c1   :  { %9016 = vmatmul.mubr.msk.f32.vlgmr.msra.gmra.mrb[42].mxu0 %vm2105_vm10, %v10970_v8 }
0x22c2   :  { %9428 = vmatpush3.bf16.msra.mxu0 %v10279_v5  ;;  %9026 = vmatprep.mubr.msk.f32.mxu0 %vm10064_vm0, %v11592_v17 }
0x22c3   :  { %9429 = vmatprep.subr.bf16.mxu0 %v11593_v6 }
0x22c6   :  { %9431 = vmatpush3.bf16.msra.mxu0 %v11594_v33 }
0x22c7   :  { %9432 = vmatprep.subr.bf16.mxu0 %v11593_v6 }
0x22c9   :  { %9027 = vmatmul.mubr.msk.f32.vlgmr.msra.gmra.mrb[44].mxu0 %vm231_vm2, %v10747_v13 }
0x22ca   :  { %9434 = vmatpush3.bf16.msra.mxu0 %v11595_v40  ;;  %9033 = vmatprep.mubr.msk.f32.mxu0 %vm10064_vm0, %v11592_v17 }
0x22cb   :  { %9047 = vmatprep.subr.mxu0 %v11592_v17 }
0x2394   :  { %v4287_v57 = vpop.f32.mrb[42].mxu0 }
0x2395   :  { %v4288_v19 = vadd.f32 %v10726_v56, %v4287_v57  ;;  %v9017_v7 = vpop.f32.mrb[43].mxu0  ;;  %v10994_v56 = vld [vmem:[%s11555_s1] sm:$0xf] }
0x2397   :  { %v4291_v11 = vsel %vm2297_vm11, %v4288_v19, -inf }
0x2398   :  { %4292 = vmax.xlane.f32.xlu0 %v4291_v11 }
0x239c   :  { %v4370_v59 = vpop.f32.mrb[44].mxu0 }
0x239d   :  { %v9028_v16 = vpop.f32.mrb[45].mxu0 }
0x2425   :  { %v4293_v38 = vpop.xlane.xlu0 %4292 }
0x2426   :  { %v4294_v15 = vsub.f32 %v4288_v19, %v4293_v38  ;;  %v11016_v38 = vld [vmem:[#allocation2] sm:$0xf] }
0x2428   :  { %v4295_v26 = vmul.f32 1.442695, %v4294_v15 }
0x242a   :  { %9705 = vpow2.f32 %v4295_v26 }
0x2434   :  { %v9706_v13 = vpop.eup %9705 }
0x2435   :  { %v4297_v28 = vsel %vm2297_vm11, %v9706_v13, 0.0 }
0x2436   :  { %4298 = vadd.xlane.f32.xlu1 %v4297_v28 }
0x24c3   :  { %v4299_v3 = vpop.xlane.xlu1 %4298 }
0x24c4   :  { %9707 = vrcp.f32 %v4299_v3  ;;  %v11029_v3 = vld [vmem:[%s11555_s1 + $0x4] sm:$0xf] }
0x24ce   :  { %v9708_v0 = vpop.eup %9707 }
0x24cf   :  { %v4301_v48 = vmul.f32 %v9708_v0, %v9706_v13 }
0x24d1   :  { %4303 = vst.msk [vmem:[#allocation16 + $0x2] sm:$0x3] %vm2297_vm11, %v4301_v48  ;;  %9034 = vmatmul.mubr.msk.f32.vlgmr.msra.gmra.mrb[46].mxu0 %vm305_vm1, %v4301_v48  ;;  %v11038_v48 = vld [vmem:[#allocation2 + $0x4] sm:$0xf] }
0x24d2   :  { %9048 = vmatpush3.xpose.msk.msra.mxu0 %vm508_vm3, %v10994_v56  ;;  %9049 = vmatprep.mubr.msk.f32.mxu0 %vm10064_vm0, %v11592_v17 }
0x24d3   :  { %9052 = vmatprep.subr.mxu0 %v11592_v17 }
0x25a4   :  { %v4443_v62 = vpop.f32.mrb[46].mxu0 }
0x25a5   :  { %v4444_v39 = vadd.f32 %v4443_v62, %v4370_v59  ;;  %v9035_v12 = vpop.f32.mrb[47].mxu0 }
0x25a7   :  { %v4447_v60 = vadd.f32 %v11001_v1, %v4444_v39 }
0x25a9   :  { %9709 = vtanh.f32 %v4447_v60  ;;  %v8412_v10 = vmul.f32 -1.442695, %v4447_v60 }
0x25ab   :  { %9711 = vpow2.f32 %v8412_v10 }
0x25b3   :  { %v9710_v58 = vpop.eup %9709 }
0x25b4   :  { %4457 = vrot.lane.b32.xlu0 %v9710_v58, %s10055_s7 }
0x25b5   :  { %v9712_v44 = vpop.eup %9711 }
0x25b6   :  { %v4451_v51 = vadd.f32 1.0, %v9712_v44 }
0x25b8   :  { %9713 = vrcp.f32 %v4451_v51 }
0x25c2   :  { %v9714_v22 = vpop.eup %9713 }
0x25c3   :  { %v4455_v14 = vmul.f32 %v9714_v22, %v10742_v52 }
0x2626   :  { %v4458_v49 = vpop.permute.xlu0 %4457 }
0x2627   :  { %v4460_v2 = vmul.f32 %v9714_v22, %v4458_v49 }
0x2629   :  { %4462 = vrot.lane.b32.xlu1 %v4460_v2, %s10066_s0 }
0x269b   :  { %v4463_v57 = vpop.permute.xlu1 %4462 }
0x269c   :  { %v11007_v19 = vadd.f32 %v4463_v57, %v4455_v14 }
0x269e   :  { %9715 = vtanh.f32 %v11007_v19 }
0x26a8   :  { %v9716_v7 = vpop.eup %9715 }
0x26a9   :  { %4468 = vrot.lane.b32.xlu0 %v9716_v7, %s10055_s7 }
0x271b   :  { %v4469_v11 = vpop.permute.xlu0 %4468 }
0x271c   :  { %v4471_v59 = vmul.f32 %v9714_v22, %v4469_v11 }
0x271e   :  { %4473 = vrot.lane.b32.xlu1 %v4471_v59, %s10066_s0 }
0x2790   :  { %v11012_v16 = vpop.permute.xlu1 %4473 }
0x2791   :  { %9045 = vmatmul.mubr.msk.f32.vlgmr.msra.gmra.mrb[44].mxu1 %vm231_vm2, %v11012_v16 }
0x2792   :  { %9058 = vmatpush3.msk.msra.mxu1 %vm688_vm5, %v11016_v38  ;;  %9059 = vmatprep.mubr.msk.f32.mxu1 %vm10064_vm0, %v11592_v17 }
0x2793   :  { %9067 = vmatprep.subr.mxu1 %v11592_v17 }
0x2864   :  { %v4543_v52 = vpop.f32.mrb[44].mxu1 }
0x2865   :  { %v4554_v15 = vrot.slane %v4543_v52, %v10335_v45  ;;  %v9046_v26 = vpop.f32.mrb[45].mxu1 }
0x2867   :  { %v4555_v13 = vcombine.high %v4554_v15, %v4554_v15  ;;  %v4562_v28 = vrot.slane %v4554_v15, %v10335_v45 }
0x2869   :  { %9050 = vmatmul.mubr.msk.f32.vlgmr.msra.gmra.mrb[48].mxu0 %vm508_vm3, %v4562_v28  ;;  %v4569_v0 = vrot.slane %v4555_v13, %v10335_v45  ;;  %v11055_v13 = vrot.slane %v4562_v28, %v10357_v61 }
0x286a   :  { %9053 = vmatpush3.xpose.msk.msra.mxu0 %vm508_vm3, %v11029_v3  ;;  %9054 = vmatprep.mubr.msk.f32.mxu0 %vm10064_vm0, %v11592_v17 }
0x286b   :  { %9062 = vmatprep.subr.mxu0 %v11592_v17  ;;  %v11048_v22 = vrot.slane %v4569_v0, %v10357_v61 }
0x286d   :  { %9055 = vmatmul.mubr.msk.f32.vlgmr.msra.gmra.mrb[50].mxu0 %vm508_vm3, %v4569_v0 }
0x286e   :  { %9063 = vmatpush3.msk.msra.mxu0 %vm688_vm5, %v11038_v48  ;;  %9064 = vmatprep.mubr.msk.f32.mxu0 %vm10064_vm0, %v11592_v17 }
0x286f   :  { %9072 = vmatprep.subr.mxu0 %v11592_v17 }
0x293c   :  { %v4638_v62 = vpop.f32.mrb[48].mxu0 }
0x293d   :  { %v4714_v39 = vmul.f32 0.35355338, %v4638_v62  ;;  %v9051_v12 = vpop.f32.mrb[49].mxu0 }
0x293f   :  { %v4716_v60 = vsel %vm661_vm4, %v4714_v39, -inf }
0x2940   :  { %4717 = vmax.xlane.f32.xlu1 %v4716_v60  ;;  %v4710_v58 = vpop.f32.mrb[50].mxu0 }
0x2941   :  { %v4715_v10 = vmul.f32 0.35355338, %v4710_v58  ;;  %v9056_v44 = vpop.f32.mrb[51].mxu0  ;;  %v11063_v58 = vld [vmem:[%s11555_s1 + $0xc] sm:$0xf] }
0x2943   :  { %v4719_v51 = vsel %vm661_vm4, %v4715_v10, -inf }
0x2944   :  { %4720 = vmax.xlane.f32.xlu0 %v4719_v51 }
0x2951   :  { %4971 = vrot.lane.b32.xlu1 %v11048_v22, %s10068_s6 }
0x29cd   :  { %v4718_v49 = vpop.xlane.xlu1 %4717 }
0x29ce   :  { %v4722_v2 = vsub.f32 %v4714_v39, %v4718_v49  ;;  %v11080_v49 = vld [vmem:[%s11555_s1 + $0x8] sm:$0xf] }
0x29d0   :  { %v4724_v7 = vmul.f32 1.442695, %v4722_v2  ;;  %v11086_v2 = vld [vmem:[#allocation2 + $0xc] sm:$0xf] }
0x29d1   :  { %v4721_v14 = vpop.xlane.xlu0 %4720  ;;  %v4972_v44 = vpop.permute.xlu1 %4971  ;;  %11596 = vst [vmem:[#allocation23_spill] sm:$0xff] %v11086_v2 }
0x29d2   :  { %v4723_v57 = vsub.f32 %v4715_v10, %v4721_v14 }
0x29d4   :  { %v4726_v11 = vmul.f32 1.442695, %v4723_v57  ;;  %v11095_v57 = vld [vmem:[#allocation2 + $0x8] sm:$0xf] }
0x29d6   :  { %9717 = vpow2.f32 %v4726_v11 }
0x29d7   :  { %9719 = vpow2.f32 %v4724_v7 }
0x29e0   :  { %v9718_v59 = vpop.eup %9717 }
0x29e1   :  { %v4731_v52 = vsel %vm661_vm4, %v9718_v59, 0.0  ;;  %v9720_v15 = vpop.eup %9719 }
0x29e2   :  { %4732 = vadd.xlane.f32.xlu0 %v4731_v52  ;;  %v4728_v26 = vsel %vm661_vm4, %v9720_v15, 0.0 }
0x29e6   :  { %4729 = vadd.xlane.f32.xlu0 %v4728_v26 }
0x29fc   :  { %4893 = vrot.lane.b32.xlu0 %v11055_v13, %s10068_s6 }
0x2a6f   :  { %v4733_v0 = vpop.xlane.xlu0 %4732 }
0x2a70   :  { %9721 = vrcp.f32 %v4733_v0 }
0x2a73   :  { %v4730_v62 = vpop.xlane.xlu0 %4729 }
0x2a74   :  { %9723 = vrcp.f32 %v4730_v62 }
0x2a77   :  { %v4894_v14 = vpop.permute.xlu0 %4893 }
0x2a7a   :  { %v9722_v39 = vpop.eup %9721 }
0x2a7b   :  { %v4737_v12 = vmul.f32 %v9722_v39, %v9718_v59 }
0x2a7d   :  { %9065 = vmatmul.mubr.msk.f32.vlgmr.msra.gmra.mrb[52].mxu0 %vm684_vm6, %v4737_v12  ;;  %v4884_v28 = vrot.slane %v4737_v12, 7 }
0x2a7e   :  { %v9724_v60 = vpop.eup %9723  ;;  %9073 = vmatpush3.xpose.msk.msra.mxu0 %vm508_vm3, %v11063_v58  ;;  %9074 = vmatprep.mubr.msk.f32.mxu0 %vm10064_vm0, %v11592_v17 }
0x2a7f   :  { %v4736_v10 = vmul.f32 %v9724_v60, %v9720_v15  ;;  %9082 = vmatprep.subr.mxu0 %v11592_v17 }
0x2a81   :  { %v4885_v51 = vsel %vm839_vm7, %v4884_v28, %v4736_v10  ;;  %9060 = vmatmul.mubr.msk.f32.vlgmr.msra.gmra.mrb[46].mxu1 %vm684_vm6, %v4736_v10  ;;  %9075 = vmatmul.mubr.msk.f32.vlgmr.msra.gmra.mrb[54].mxu0 %vm508_vm3, %v4972_v44 }
0x2a82   :  { %8422 = vst.msk [vmem:[%s11569_s15 + $0x10] sm:$0x3] %vm842_vm8, %v4885_v51  ;;  %9068 = vmatpush3.xpose.msk.msra.mxu1 %vm508_vm3, %v11080_v49  ;;  %9069 = vmatprep.mubr.msk.f32.mxu1 %vm10064_vm0, %v11592_v17 }
0x2a83   :  { %9083 = vmatpush3.msk.msra.mxu0 %vm688_vm5, %v11086_v2  ;;  %9077 = vmatprep.subr.mxu1 %v11592_v17 }
0x2a84   :  { %9084 = vmatprep.mubr.msk.f32.mxu0 %vm10064_vm0, %v11592_v17  ;;  %9092 = vmatprep.subr.mxu0 %v11592_v17 }
0x2a85   :  { %9070 = vmatmul.mubr.msk.f32.vlgmr.msra.gmra.mrb[48].mxu1 %vm508_vm3, %v4894_v14 }
0x2a86   :  { %9078 = vmatpush3.msk.msra.mxu1 %vm688_vm5, %v11095_v57  ;;  %9079 = vmatprep.mubr.msk.f32.mxu1 %vm10064_vm0, %v11592_v17 }
0x2a87   :  { %9087 = vmatprep.subr.mxu1 %v11592_v17 }
0x2b50   :  { %v4880_v7 = vpop.f32.mrb[52].mxu0 }
0x2b51   :  { %v9066_v11 = vpop.f32.mrb[53].mxu0  ;;  %v5868_v59 = vrot.slane %v4880_v7, 7 }
0x2b54   :  { %v4807_v52 = vpop.f32.mrb[46].mxu1  ;;  %v5041_v15 = vpop.f32.mrb[54].mxu0 }
0x2b55   :  { %v11103_v26 = vsel %vm839_vm7, %v5868_v59, %v4807_v52  ;;  %v5046_v0 = vmul.f32 0.35355338, %v5041_v15  ;;  %v9061_v62 = vpop.f32.mrb[47].mxu1  ;;  %v9076_v39 = vpop.f32.mrb[55].mxu0 }
0x2b57   :  { %v5050_v12 = vsel %vm661_vm4, %v5046_v0, -inf }
0x2b58   :  { %v4963_v60 = vpop.f32.mrb[48].mxu1  ;;  %5051 = vmax.xlane.f32.xlu1 %v5050_v12 }
0x2b59   :  { %v5045_v28 = vmul.f32 0.35355338, %v4963_v60  ;;  %v9071_v10 = vpop.f32.mrb[49].mxu1 }
0x2b5a   :  { %v11117_v10 = vld [vmem:[%s11555_s1 + $0x14] sm:$0xf] }
0x2b5b   :  { %v5047_v44 = vsel %vm661_vm4, %v5045_v28, -inf  ;;  %11597 = vst [vmem:[#allocation24_spill] sm:$0xff] %v11117_v10 }
0x2b5c   :  { %5048 = vmax.xlane.f32.xlu0 %v5047_v44 }
0x2be5   :  { %v5052_v51 = vpop.xlane.xlu1 %5051 }
0x2be6   :  { %v5054_v14 = vsub.f32 %v5046_v0, %v5052_v51 }
0x2be8   :  { %v5057_v7 = vmul.f32 1.442695, %v5054_v14 }
0x2be9   :  { %v5049_v11 = vpop.xlane.xlu0 %5048 }
0x2bea   :  { %9725 = vpow2.f32 %v5057_v7  ;;  %v5053_v2 = vsub.f32 %v5045_v28, %v5049_v11  ;;  %v11134_v11 = vld [vmem:[%s11555_s1 + $0x10] sm:$0xf] }
0x2beb   :  { %11598 = vst [vmem:[#allocation26_spill] sm:$0xff] %v11134_v11 }
0x2bec   :  { %v5055_v59 = vmul.f32 1.442695, %v5053_v2 }
0x2bee   :  { %9727 = vpow2.f32 %v5055_v59  ;;  %v11140_v59 = vld [vmem:[#allocation2 + $0x14] sm:$0xf] }
0x2bef   :  { %11599 = vst [vmem:[#allocation27_spill] sm:$0xff] %v11140_v59 }
0x2bf4   :  { %v9726_v52 = vpop.eup %9725 }
0x2bf5   :  { %v5062_v15 = vsel %vm661_vm4, %v9726_v52, 0.0 }
0x2bf6   :  { %5063 = vadd.xlane.f32.xlu1 %v5062_v15  ;;  %v11149_v15 = vld [vmem:[#allocation2 + $0x10] sm:$0xf] }
0x2bf7   :  { %11600 = vst [vmem:[#allocation28_spill] sm:$0xff] %v11149_v15 }
0x2bf8   :  { %v9728_v62 = vpop.eup %9727 }
0x2bf9   :  { %v5059_v39 = vsel %vm661_vm4, %v9728_v62, 0.0 }
0x2bfa   :  { %5060 = vadd.xlane.f32.xlu0 %v5059_v39 }
0x2c07   :  { %5294 = vrot.lane.b32.xlu1 %v11048_v22, %s10069_s4 }
0x2c10   :  { %5220 = vrot.lane.b32.xlu0 %v11055_v13, %s10069_s4 }
0x2c83   :  { %v5064_v0 = vpop.xlane.xlu1 %5063 }
0x2c84   :  { %9729 = vrcp.f32 %v5064_v0 }
0x2c87   :  { %v5061_v12 = vpop.xlane.xlu0 %5060  ;;  %v5295_v14 = vpop.permute.xlu1 %5294 }
0x2c88   :  { %9731 = vrcp.f32 %v5061_v12 }
0x2c8e   :  { %v9730_v2 = vpop.eup %9729 }
0x2c8f   :  { %v5068_v60 = vmul.f32 %v9730_v2, %v9726_v52  ;;  %v5221_v52 = vpop.permute.xlu0 %5220 }
0x2c91   :  { %9085 = vmatmul.mubr.msk.f32.vlgmr.msra.gmra.mrb[56].mxu0 %vm684_vm6, %v5068_v60  ;;  %v5215_v44 = vrot.slane %v5068_v60, 7 }
0x2c92   :  { %v9732_v28 = vpop.eup %9731  ;;  %9093 = vmatpush3.xpose.msk.msra.mxu0 %vm508_vm3, %v11117_v10  ;;  %9094 = vmatprep.mubr.msk.f32.mxu0 %vm10064_vm0, %v11592_v17 }
0x2c93   :  { %v5067_v51 = vmul.f32 %v9732_v28, %v9728_v62  ;;  %9102 = vmatprep.subr.mxu0 %v11592_v17 }
0x2c95   :  { %v5216_v7 = vsel %vm839_vm7, %v5215_v44, %v5067_v51  ;;  %9080 = vmatmul.mubr.msk.f32.vlgmr.msra.gmra.mrb[50].mxu1 %vm684_vm6, %v5067_v51  ;;  %9095 = vmatmul.mubr.msk.f32.vlgmr.msra.gmra.mrb[58].mxu0 %vm508_vm3, %v5295_v14 }
0x2c96   :  { %8431 = vst.msk [vmem:[%s11569_s15 + $0x12] sm:$0x3] %vm842_vm8, %v5216_v7  ;;  %9088 = vmatpush3.xpose.msk.msra.mxu1 %vm508_vm3, %v11134_v11  ;;  %9089 = vmatprep.mubr.msk.f32.mxu1 %vm10064_vm0, %v11592_v17 }
0x2c97   :  { %9103 = vmatpush3.msk.msra.mxu0 %vm688_vm5, %v11140_v59  ;;  %9097 = vmatprep.subr.mxu1 %v11592_v17 }
0x2c98   :  { %9104 = vmatprep.mubr.msk.f32.mxu0 %vm10064_vm0, %v11592_v17  ;;  %9112 = vmatprep.subr.mxu0 %v11592_v17 }
0x2c99   :  { %9090 = vmatmul.mubr.msk.f32.vlgmr.msra.gmra.mrb[52].mxu1 %vm508_vm3, %v5221_v52 }
0x2c9a   :  { %9098 = vmatpush3.msk.msra.mxu1 %vm688_vm5, %v11149_v15  ;;  %9099 = vmatprep.mubr.msk.f32.mxu1 %vm10064_vm0, %v11592_v17 }
0x2c9b   :  { %9107 = vmatprep.subr.mxu1 %v11592_v17 }
0x2d64   :  { %v5211_v62 = vpop.f32.mrb[56].mxu0 }
0x2d65   :  { %v9086_v39 = vpop.f32.mrb[57].mxu0  ;;  %v5873_v0 = vrot.slane %v5211_v62, 7 }
0x2d68   :  { %v5138_v12 = vpop.f32.mrb[50].mxu1  ;;  %v5364_v2 = vpop.f32.mrb[58].mxu0 }
0x2d69   :  { %v5369_v60 = vmul.f32 0.35355338, %v5364_v2  ;;  %v9081_v28 = vpop.f32.mrb[51].mxu1  ;;  %v9096_v44 = vpop.f32.mrb[59].mxu0  ;;  %v11157_v51 = vsel %vm839_vm7, %v5873_v0, %v5138_v12 }
0x2d6b   :  { %v5373_v14 = vsel %vm661_vm4, %v5369_v60, -inf }
0x2d6c   :  { %v5290_v7 = vpop.f32.mrb[52].mxu1  ;;  %5374 = vmax.xlane.f32.xlu1 %v5373_v14 }
0x2d6d   :  { %v5368_v52 = vmul.f32 0.35355338, %v5290_v7  ;;  %v9091_v59 = vpop.f32.mrb[53].mxu1  ;;  %v11171_v7 = vld [vmem:[%s11555_s1 + $0x1c] sm:$0xf] }
0x2d6e   :  { %11601 = vst [vmem:[#allocation29_spill] sm:$0xff] %v11171_v7 }
0x2d6f   :  { %v5370_v15 = vsel %vm661_vm4, %v5368_v52, -inf }
0x2d70   :  { %5371 = vmax.xlane.f32.xlu0 %v5370_v15 }
0x2df9   :  { %v5375_v10 = vpop.xlane.xlu1 %5374 }
0x2dfa   :  { %v5377_v39 = vsub.f32 %v5369_v60, %v5375_v10 }
0x2dfc   :  { %v5380_v62 = vmul.f32 1.442695, %v5377_v39 }
0x2dfd   :  { %v5372_v11 = vpop.xlane.xlu0 %5371 }
0x2dfe   :  { %9733 = vpow2.f32 %v5380_v62  ;;  %v5376_v2 = vsub.f32 %v5368_v52, %v5372_v11  ;;  %v11188_v62 = vld [vmem:[%s11555_s1 + $0x18] sm:$0xf] }
0x2e00   :  { %v5378_v28 = vmul.f32 1.442695, %v5376_v2  ;;  %v11194_v2 = vld [vmem:[#allocation2 + $0x1c] sm:$0xf] }
0x2e01   :  { %11602 = vst [vmem:[#allocation30_spill] sm:$0xff] %v11194_v2 }
0x2e02   :  { %9735 = vpow2.f32 %v5378_v28 }
0x2e08   :  { %v9734_v44 = vpop.eup %9733 }
0x2e09   :  { %v5385_v0 = vsel %vm661_vm4, %v9734_v44, 0.0 }
0x2e0a   :  { %5386 = vadd.xlane.f32.xlu1 %v5385_v0 }
0x2e0c   :  { %v9736_v12 = vpop.eup %9735 }
0x2e0d   :  { %v5382_v14 = vsel %vm661_vm4, %v9736_v12, 0.0 }
0x2e0e   :  { %5383 = vadd.xlane.f32.xlu0 %v5382_v14 }
0x2e1b   :  { %5617 = vrot.lane.b32.xlu1 %v11048_v22, %s10070_s20 }
0x2e24   :  { %5543 = vrot.lane.b32.xlu0 %v11055_v13, %s10070_s20 }
0x2e97   :  { %v5387_v10 = vpop.xlane.xlu1 %5386 }
0x2e98   :  { %9737 = vrcp.f32 %v5387_v10 }
0x2e9b   :  { %v5384_v59 = vpop.xlane.xlu0 %5383  ;;  %v5618_v52 = vpop.permute.xlu1 %5617 }
0x2e9c   :  { %9739 = vrcp.f32 %v5384_v59 }
0x2e9f   :  { %v5544_v28 = vpop.permute.xlu0 %5543 }
0x2ea2   :  { %v9738_v11 = vpop.eup %9737 }
0x2ea3   :  { %v5391_v15 = vmul.f32 %v9738_v11, %v9734_v44  ;;  %v11203_v44 = vld [vmem:[#allocation2 + $0x18] sm:$0xf] }
0x2ea4   :  { %11603 = vst [vmem:[#allocation31_spill] sm:$0xff] %v11203_v44 }
0x2ea5   :  { %9105 = vmatmul.mubr.msk.f32.vlgmr.msra.gmra.mrb[60].mxu0 %vm684_vm6, %v5391_v15  ;;  %v5538_v22 = vrot.slane %v5391_v15, 7 }
0x2ea6   :  { %v9740_v60 = vpop.eup %9739  ;;  %9113 = vmatpush3.xpose.msk.msra.mxu0 %vm508_vm3, %v11171_v7  ;;  %9114 = vmatprep.mubr.msk.f32.mxu0 %vm10064_vm0, %v11592_v17 }
0x2ea7   :  { %v5390_v13 = vmul.f32 %v9740_v60, %v9736_v12  ;;  %9122 = vmatprep.subr.mxu0 %v11592_v17 }
0x2ea9   :  { %v5539_v39 = vsel %vm839_vm7, %v5538_v22, %v5390_v13  ;;  %9100 = vmatmul.mubr.msk.f32.vlgmr.msra.gmra.mrb[54].mxu1 %vm684_vm6, %v5390_v13  ;;  %9115 = vmatmul.mubr.msk.f32.vlgmr.msra.gmra.mrb[62].mxu0 %vm508_vm3, %v5618_v52 }
0x2eaa   :  { %8440 = vst.msk [vmem:[%s11569_s15 + $0x14] sm:$0x3] %vm842_vm8, %v5539_v39  ;;  %9108 = vmatpush3.xpose.msk.msra.mxu1 %vm508_vm3, %v11188_v62  ;;  %9109 = vmatprep.mubr.msk.f32.mxu1 %vm10064_vm0, %v11592_v17 }
0x2eab   :  { %9123 = vmatpush3.msk.msra.mxu0 %vm688_vm5, %v11194_v2  ;;  %9124 = vmatprep.mubr.msk.f32.mxu0 %vm10064_vm0, %v11592_v17 }
0x2eac   :  { %9117 = vmatprep.subr.mxu1 %v11592_v17  ;;  %9448 = vmatprep.subr.bf16.mxu0 %v10557_v31 }
0x2ead   :  { %9110 = vmatmul.mubr.msk.f32.vlgmr.msra.gmra.mrb[56].mxu1 %vm508_vm3, %v5544_v28 }
0x2eae   :  { %9118 = vmatpush3.msk.msra.mxu1 %vm688_vm5, %v11203_v44  ;;  %9119 = vmatprep.mubr.msk.f32.mxu1 %vm10064_vm0, %v11592_v17 }
0x2eaf   :  { %9441 = vmatprep.subr.bf16.mxu1 %v11593_v6 }
0x2f78   :  { %v5534_v0 = vpop.f32.mrb[60].mxu0 }
0x2f79   :  { %v9106_v12 = vpop.f32.mrb[61].mxu0  ;;  %v5880_v14 = vrot.slane %v5534_v0, 7 }
0x2f7c   :  { %v5461_v10 = vpop.f32.mrb[54].mxu1  ;;  %v5687_v59 = vpop.f32.mrb[62].mxu0 }
0x2f7d   :  { %v5692_v11 = vmul.f32 0.35355338, %v5687_v59  ;;  %v9101_v15 = vpop.f32.mrb[55].mxu1  ;;  %v9116_v60 = vpop.f32.mrb[63].mxu0  ;;  %v5881_v22 = vsel %vm839_vm7, %v5880_v14, %v5461_v10 }
0x2f7f   :  { %v5696_v13 = vsel %vm661_vm4, %v5692_v11, -inf }
0x2f80   :  { %v5613_v52 = vpop.f32.mrb[56].mxu1  ;;  %5697 = vmax.xlane.f32.xlu1 %v5696_v13 }
0x2f81   :  { %v5691_v39 = vmul.f32 0.35355338, %v5613_v52  ;;  %v9111_v28 = vpop.f32.mrb[57].mxu1 }
0x2f83   :  { %v5693_v31 = vsel %vm661_vm4, %v5691_v39, -inf }
0x2f84   :  { %5694 = vmax.xlane.f32.xlu0 %v5693_v31 }
0x300d   :  { %v5698_v2 = vpop.xlane.xlu1 %5697 }
0x300e   :  { %v5700_v44 = vsub.f32 %v5692_v11, %v5698_v2 }
0x3010   :  { %v5703_v12 = vmul.f32 1.442695, %v5700_v44 }
0x3011   :  { %v5695_v0 = vpop.xlane.xlu0 %5694 }
0x3012   :  { %9741 = vpow2.f32 %v5703_v12  ;;  %v5699_v7 = vsub.f32 %v5691_v39, %v5695_v0 }
0x3014   :  { %v5701_v59 = vmul.f32 1.442695, %v5699_v7 }
0x3016   :  { %9743 = vpow2.f32 %v5701_v59 }
0x301c   :  { %v9742_v15 = vpop.eup %9741 }
0x301d   :  { %v5708_v14 = vsel %vm661_vm4, %v9742_v15, 0.0 }
0x301e   :  { %5709 = vadd.xlane.f32.xlu1 %v5708_v14 }
0x3020   :  { %v9744_v10 = vpop.eup %9743 }
0x3021   :  { %v5705_v60 = vsel %vm661_vm4, %v9744_v10, 0.0 }
0x3022   :  { %5706 = vadd.xlane.f32.xlu0 %v5705_v60 }
0x302f   :  { %5875 = vrot.lane.b32.xlu1 %v11157_v51, %s10051_s29 }
0x3038   :  { %5882 = vrot.lane.b32.xlu0 %v5881_v22, %s10061_s28 }
0x30ab   :  { %v5710_v31 = vpop.xlane.xlu1 %5709 }
0x30ac   :  { %9745 = vrcp.f32 %v5710_v31 }
0x30af   :  { %v5707_v2 = vpop.xlane.xlu0 %5706 }
0x30b0   :  { %9747 = vrcp.f32 %v5707_v2 }
0x30b3   :  { %v5883_v14 = vpop.permute.xlu0 %5882 }
0x30b6   :  { %v9746_v44 = vpop.eup %9745 }
0x30b7   :  { %v5714_v7 = vmul.f32 %v9746_v44, %v9742_v15  ;;  %v5876_v15 = vpop.permute.xlu1 %5875 }
0x30b9   :  { %9125 = vmatmul.mubr.msk.f32.vlgmr.msra.gmra.mrb[64].mxu0 %vm684_vm6, %v5714_v7  ;;  %v5861_v13 = vrot.slane %v5714_v7, 7 }
0x30ba   :  { %v9748_v11 = vpop.eup %9747  ;;  %9450 = vmatpush1.bf16.msra.mxu0 %v10559_v41  ;;  %6035 = vmatprep.mubr.f32.mxu0 %v11592_v17 }
0x30bb   :  { %v5713_v52 = vmul.f32 %v9748_v11, %v9744_v10  ;;  %9452 = vmatprep.subr.bf16.mxu0 %v10561_v42  ;;  %v5892_v10 = vsel %vm508_vm3, %v11103_v26, %v5876_v15 }
0x30bc   :  { %v5893_v60 = vsel %vm305_vm1, %v5892_v10, %v5883_v14 }
0x30bd   :  { %v5862_v51 = vsel %vm839_vm7, %v5861_v13, %v5713_v52  ;;  %9120 = vmatmul.mubr.msk.f32.vlgmr.msra.gmra.mrb[58].mxu1 %vm684_vm6, %v5713_v52 }
0x30be   :  { %8449 = vst.msk [vmem:[%s11569_s15 + $0x16] sm:$0x3] %vm842_vm8, %v5862_v51  ;;  %9443 = vmatpush3.bf16.msra.mxu1 %v10549_v23  ;;  %9135 = vmatprep.mubr.msk.f32.mxu1 %vm10064_vm0, %v11592_v17 }
0x30bf   :  { %9444 = vmatprep.subr.bf16.mxu1 %v11593_v6  ;;  %9454 = vmatpush1.bf16.msra.mxu0 %v10565_v47 }
0x30c0   :  { %9456 = vmatprep.subr.bf16.mxu0 %v10584_v9 }
0x30c2   :  { %9446 = vmatpush3.bf16.msra.mxu1 %v10552_v25 }
0x30c3   :  { %9479 = vmatprep.subr.bf16.mxu1 %v11593_v6 }
0x318c   :  { %v5857_v22 = vpop.f32.mrb[64].mxu0 }
0x318d   :  { %v9126_v39 = vpop.f32.mrb[65].mxu0  ;;  %v5887_v28 = vrot.slane %v5857_v22, 7 }
0x3190   :  { %v5784_v12 = vpop.f32.mrb[58].mxu1 }
0x3191   :  { %v9121_v0 = vpop.f32.mrb[59].mxu1  ;;  %v5888_v59 = vsel %vm839_vm7, %v5887_v28, %v5784_v12 }
0x3192   :  { %5889 = vrot.lane.b32.xlu1 %v5888_v59, %s10071_s18 }
0x3204   :  { %v5890_v31 = vpop.permute.xlu1 %5889 }
0x3205   :  { %v5894_v2 = vsel %vm1885_vm9, %v5893_v60, %v5890_v31 }
0x3206   :  { %9136 = vmatmul.mubr.msk.f32.vlgmr.msra.gmra.mrb[60].mxu1 %vm231_vm2, %v5894_v2 }
0x3207   :  { %9481 = vmatpush3.bf16.msra.mxu1 %v10672_v29  ;;  %9154 = vmatprep.mubr.msk.f32.mxu1 %vm10064_vm0, %v11592_v17 }
0x3208   :  { %9482 = vmatprep.subr.bf16.mxu1 %v11593_v6 }
0x320b   :  { %9484 = vmatpush3.bf16.msra.mxu1 %v10678_v37 }
0x320c   :  { %9485 = vmatprep.subr.bf16.mxu1 %v11593_v6 }
0x320f   :  { %9487 = vmatpush3.bf16.msra.mxu1 %v10688_v50 }
0x3210   :  { %9488 = vmatprep.subr.bf16.mxu1 %v11593_v6 }
0x3213   :  { %9490 = vmatpush3.bf16.msra.mxu1 %v10698_v63 }
0x3214   :  { %9491 = vmatprep.subr.bf16.mxu1 %v11593_v6 }
0x32d9   :  { %v5964_v26 = vpop.f32.mrb[60].mxu1 }
0x32da   :  { %v9137_v44 = vpop.f32.mrb[61].mxu1  ;;  %8451 = vmatmul.mubr.msk.f32.vlgmr.msra.gmra.mrb[66].mxu0 %vm231_vm2, %v5964_v26 }
0x32db   :  { %9458 = vmatpush1.bf16.msra.mxu0 %v10599_v21  ;;  %6106 = vmatprep.mubr.f32.mxu0 %v11592_v17 }
0x32dc   :  { %9460 = vmatprep.subr.bf16.mxu0 %v10601_v24 }
0x32df   :  { %9462 = vmatpush1.bf16.msra.mxu0 %v10611_v43 }
0x32e0   :  { %9464 = vmatprep.subr.bf16.mxu0 %v10615_v46 }
0x32e2   :  { %8452 = vmatmul.mubr.msk.f32.vlgmr.msra.gmra.mrb[66].mxu0 %vm231_vm2, %v11012_v16 }
0x32e3   :  { %9466 = vmatpush1.bf16.msra.mxu0 %v10618_v53  ;;  %6177 = vmatprep.mubr.f32.mxu0 %v11592_v17 }
0x32e4   :  { %9468 = vmatprep.subr.bf16.mxu0 %v10621_v54 }
0x32e7   :  { %9470 = vmatpush1.bf16.msra.mxu0 %v10626_v4 }
0x32e8   :  { %9472 = vmatprep.subr.bf16.mxu0 %v10630_v36 }
0x32eb   :  { %9474 = vmatpush1.bf16.msra.mxu0 %v10633_v18 }
0x32ec   :  { %9476 = vmatprep.subr.bf16.mxu0 %v10636_v20 }
0x32ef   :  { %9478 = vmatpush1.bf16.msra.mxu0 %v10639_v30 }
0x32f0   :  { %9500 = vmatprep.subr.bf16.mxu0 %v11593_v6 }
0x32f2   :  { %8453 = vmatmul.mubr.msk.f32.vlgmr.msra.gmra.mrb[66].mxu0 %vm2105_vm10, %v10970_v8 }
0x32f3   :  { %9502 = vmatpush3.bf16.msra.mxu0 %v10308_v32  ;;  %9183 = vmatprep.mubr.msk.f32.mxu0 %vm10064_vm0, %v11592_v17 }
0x32f4   :  { %9503 = vmatprep.subr.bf16.mxu0 %v11593_v6 }
0x32f7   :  { %9505 = vmatpush3.bf16.msra.mxu0 %v10311_v34 }
0x32f8   :  { %9196 = vmatprep.subr.mxu0 %v11592_v17 }
0x33c5   :  { %v6179_v7 = vpop.f32.mrb[66].mxu0 }
0x33c6   :  { %v6186_v11 = vadd.f32 %v6179_v7, %v10655_v35  ;;  %v6181_v13 = vpop.f32.mrb[67].mxu0 }
0x33c7   :  { %v6187_v51 = vadd.f32 %v6181_v13, %v10659_v55 }
0x33c8   :  { %v8454_v52 = vmul.f32 -1.442695, %v6186_v11 }
0x33c9   :  { %v8455_v34 = vmul.f32 -1.442695, %v6187_v51 }
0x33ca   :  { %9749 = vpow2.f32 %v8454_v52 }
0x33cb   :  { %9751 = vtanh.f32 %v6187_v51 }
0x33d4   :  { %v9750_v8 = vpop.eup %9749 }
0x33d5   :  { %v6191_v22 = vadd.f32 1.0, %v9750_v8  ;;  %v9752_v32 = vpop.eup %9751 }
0x33d7   :  { %9753 = vrcp.f32 %v6191_v22 }
0x33d8   :  { %9755 = vpow2.f32 %v8455_v34 }
0x33e1   :  { %v9754_v39 = vpop.eup %9753 }
0x33e2   :  { %v6202_v28 = vmul.f32 %v9754_v39, %v9752_v32  ;;  %v9756_v12 = vpop.eup %9755  ;;  %v6201_v59 = vmul.f32 %v9754_v39, %v10966_v27  ;;  %v11305_v27 = vld [vmem:[%s11567_s13] ss:$0 sm:$0xff] }
0x33e3   :  { %v6198_v0 = vadd.f32 1.0, %v9756_v12 }
0x33e4   :  { %6204 = vrot.lane.b32.xlu1 %v6202_v28, %s10055_s7 }
0x33e5   :  { %9757 = vrcp.f32 %v6198_v0 }
0x33ef   :  { %v9758_v10 = vpop.eup %9757 }
0x3456   :  { %v6205_v15 = vpop.permute.xlu1 %6204 }
0x3457   :  { %v11282_v14 = vadd.f32 %v6205_v15, %v6201_v59 }
0x3459   :  { %9759 = vtanh.f32 %v11282_v14 }
0x3463   :  { %v9760_v60 = vpop.eup %9759 }
0x3464   :  { %v6209_v31 = vmul.f32 %v9760_v60, %v9758_v10 }
0x3466   :  { %6211 = vrot.lane.b32.xlu0 %v6209_v31, %s10055_s7 }
0x34d8   :  { %v11286_v2 = vpop.permute.xlu0 %6211 }
0x34d9   :  { %9155 = vmatmul.mubr.msk.f32.vlgmr.msra.gmra.mrb[62].mxu1 %vm2105_vm10, %v11286_v2 }
0x34da   :  { %9493 = vmatpush3.bf16.msra.mxu1 %v10279_v5  ;;  %9165 = vmatprep.mubr.msk.f32.mxu1 %vm10064_vm0, %v11592_v17 }
0x34db   :  { %9494 = vmatprep.subr.bf16.mxu1 %v11593_v6 }
0x34de   :  { %9496 = vmatpush3.bf16.msra.mxu1 %v11594_v33 }
0x34df   :  { %9497 = vmatprep.subr.bf16.mxu1 %v11593_v6 }
0x34e1   :  { %9166 = vmatmul.mubr.msk.f32.vlgmr.msra.gmra.mrb[64].mxu1 %vm231_vm2, %v11012_v16 }
0x34e2   :  { %9499 = vmatpush3.bf16.msra.mxu1 %v11595_v40  ;;  %9172 = vmatprep.mubr.msk.f32.mxu1 %vm10064_vm0, %v11592_v17 }
0x34e3   :  { %9186 = vmatprep.subr.mxu1 %v11592_v17 }
0x35ac   :  { %v6281_v5 = vpop.f32.mrb[62].mxu1 }
0x35ad   :  { %v6282_v33 = vadd.f32 %v11305_v27, %v6281_v5  ;;  %v9156_v26 = vpop.f32.mrb[63].mxu1 }
0x35af   :  { %v6285_v44 = vsel %vm2297_vm11, %v6282_v33, -inf }
0x35b0   :  { %6286 = vmax.xlane.f32.xlu1 %v6285_v44 }
0x35b4   :  { %v6364_v16 = vpop.f32.mrb[64].mxu1 }
0x35b5   :  { %v9167_v7 = vpop.f32.mrb[65].mxu1 }
0x363d   :  { %v6287_v40 = vpop.xlane.xlu1 %6286 }
0x363e   :  { %v6288_v11 = vsub.f32 %v6282_v33, %v6287_v40 }
0x3640   :  { %v6289_v13 = vmul.f32 1.442695, %v6288_v11 }
0x3642   :  { %9761 = vpow2.f32 %v6289_v13 }
0x364c   :  { %v9762_v52 = vpop.eup %9761 }
0x364d   :  { %v6291_v51 = vsel %vm2297_vm11, %v9762_v52, 0.0 }
0x364e   :  { %6292 = vadd.xlane.f32.xlu0 %v6291_v51 }
0x36db   :  { %v6293_v8 = vpop.xlane.xlu0 %6292 }
0x36dc   :  { %9763 = vrcp.f32 %v6293_v8 }
0x36e6   :  { %v9764_v22 = vpop.eup %9763 }
0x36e7   :  { %v6295_v32 = vmul.f32 %v9764_v22, %v9762_v52 }
0x36e9   :  { %6297 = vst.msk [vmem:[#allocation16 + $0x4] sm:$0x3] %vm2297_vm11, %v6295_v32  ;;  %9173 = vmatmul.mubr.msk.f32.vlgmr.msra.gmra.mrb[66].mxu1 %vm305_vm1, %v6295_v32 }
0x36ea   :  { %9187 = vmatpush3.xpose.msk.msra.mxu1 %vm508_vm3, %v10994_v56  ;;  %9188 = vmatprep.mubr.msk.f32.mxu1 %vm10064_vm0, %v11592_v17 }
0x36eb   :  { %9191 = vmatprep.subr.mxu1 %v11592_v17 }
0x37bc   :  { %v6437_v39 = vpop.f32.mrb[66].mxu1 }
0x37bd   :  { %v6438_v28 = vadd.f32 %v6437_v39, %v6364_v16  ;;  %v9174_v34 = vpop.f32.mrb[67].mxu1 }
0x37bf   :  { %v6441_v12 = vadd.f32 %v11001_v1, %v6438_v28 }
0x37c1   :  { %9765 = vtanh.f32 %v6441_v12  ;;  %v8459_v59 = vmul.f32 -1.442695, %v6441_v12 }
0x37c3   :  { %9767 = vpow2.f32 %v8459_v59 }
0x37cb   :  { %v9766_v0 = vpop.eup %9765 }
0x37cc   :  { %6451 = vrot.lane.b32.xlu0 %v9766_v0, %s10055_s7 }
0x37cd   :  { %v9768_v15 = vpop.eup %9767 }
0x37ce   :  { %v6445_v10 = vadd.f32 1.0, %v9768_v15 }
0x37d0   :  { %9769 = vrcp.f32 %v6445_v10 }
0x37da   :  { %v9770_v56 = vpop.eup %9769 }
0x37db   :  { %v6449_v5 = vmul.f32 %v9770_v56, %v11007_v19 }
0x383e   :  { %v6452_v60 = vpop.permute.xlu0 %6451 }
0x383f   :  { %v6454_v31 = vmul.f32 %v9770_v56, %v6452_v60 }
0x3841   :  { %6456 = vrot.lane.b32.xlu1 %v6454_v31, %s10066_s0 }
0x38b3   :  { %v6457_v33 = vpop.permute.xlu1 %6456 }
0x38b4   :  { %v6459_v26 = vadd.f32 %v6457_v33, %v6449_v5 }
0x38b6   :  { %9771 = vtanh.f32 %v6459_v26 }
0x38c0   :  { %v9772_v1 = vpop.eup %9771 }
0x38c1   :  { %6462 = vrot.lane.b32.xlu1 %v9772_v1, %s10055_s7 }
0x3933   :  { %v6463_v44 = vpop.permute.xlu1 %6462 }
0x3934   :  { %v6465_v16 = vmul.f32 %v9770_v56, %v6463_v44 }
0x3936   :  { %6467 = vrot.lane.b32.xlu0 %v6465_v16, %s10066_s0 }
0x39a8   :  { %v11323_v7 = vpop.permute.xlu0 %6467 }
0x39a9   :  { %9184 = vmatmul.mubr.msk.f32.vlgmr.msra.gmra.mrb[68].mxu0 %vm231_vm2, %v11323_v7 }
0x39aa   :  { %9197 = vmatpush3.msk.msra.mxu0 %vm688_vm5, %v11016_v38  ;;  %9198 = vmatprep.mubr.msk.f32.mxu0 %vm10064_vm0, %v11592_v17 }
0x39ab   :  { %9206 = vmatprep.subr.mxu0 %v11592_v17 }
0x3a7c   :  { %v6537_v19 = vpop.f32.mrb[68].mxu0 }
0x3a7d   :  { %v6548_v40 = vrot.slane %v6537_v19, %v10335_v45  ;;  %v9185_v11 = vpop.f32.mrb[69].mxu0 }
0x3a7f   :  { %v6549_v13 = vcombine.high %v6548_v40, %v6548_v40  ;;  %v6556_v52 = vrot.slane %v6548_v40, %v10335_v45 }
0x3a81   :  { %9189 = vmatmul.mubr.msk.f32.vlgmr.msra.gmra.mrb[68].mxu1 %vm508_vm3, %v6556_v52  ;;  %v6563_v38 = vrot.slane %v6549_v13, %v10335_v45  ;;  %v11352_v5 = vrot.slane %v6556_v52, %v10357_v61 }
0x3a82   :  { %9192 = vmatpush3.xpose.msk.msra.mxu1 %vm508_vm3, %v11029_v3  ;;  %9193 = vmatprep.mubr.msk.f32.mxu1 %vm10064_vm0, %v11592_v17 }
0x3a83   :  { %9201 = vmatprep.subr.mxu1 %v11592_v17  ;;  %v11357_v33 = vrot.slane %v6563_v38, %v10357_v61 }
0x3a85   :  { %9194 = vmatmul.mubr.msk.f32.vlgmr.msra.gmra.mrb[70].mxu1 %vm508_vm3, %v6563_v38 }
0x3a86   :  { %9202 = vmatpush3.msk.msra.mxu1 %vm688_vm5, %v11038_v48  ;;  %9203 = vmatprep.mubr.msk.f32.mxu1 %vm10064_vm0, %v11592_v17 }
0x3a87   :  { %9211 = vmatprep.subr.mxu1 %v11592_v17 }
0x3b54   :  { %v6632_v51 = vpop.f32.mrb[68].mxu1 }
0x3b55   :  { %v6708_v8 = vmul.f32 0.35355338, %v6632_v51  ;;  %v9190_v3 = vpop.f32.mrb[69].mxu1 }
0x3b57   :  { %v6710_v22 = vsel %vm661_vm4, %v6708_v8, -inf }
0x3b58   :  { %6711 = vmax.xlane.f32.xlu0 %v6710_v22  ;;  %v6704_v32 = vpop.f32.mrb[70].mxu1 }
0x3b59   :  { %v6709_v45 = vmul.f32 0.35355338, %v6704_v32  ;;  %v9195_v39 = vpop.f32.mrb[71].mxu1 }
0x3b5b   :  { %v6713_v28 = vsel %vm661_vm4, %v6709_v45, -inf }
0x3b5c   :  { %6714 = vmax.xlane.f32.xlu1 %v6713_v28 }
0x3be5   :  { %v6712_v34 = vpop.xlane.xlu0 %6711 }
0x3be6   :  { %v6716_v12 = vsub.f32 %v6708_v8, %v6712_v34 }
0x3be8   :  { %v6718_v48 = vmul.f32 1.442695, %v6716_v12 }
0x3be9   :  { %v6715_v0 = vpop.xlane.xlu1 %6714 }
0x3bea   :  { %9773 = vpow2.f32 %v6718_v48  ;;  %v6717_v59 = vsub.f32 %v6709_v45, %v6715_v0 }
0x3bec   :  { %v6720_v15 = vmul.f32 1.442695, %v6717_v59 }
0x3bee   :  { %9775 = vpow2.f32 %v6720_v15 }
0x3bf4   :  { %v9774_v10 = vpop.eup %9773 }
0x3bf5   :  { %v6722_v56 = vsel %vm661_vm4, %v9774_v10, 0.0 }
0x3bf6   :  { %6723 = vadd.xlane.f32.xlu1 %v6722_v56 }
0x3bf8   :  { %v9776_v60 = vpop.eup %9775 }
0x3bf9   :  { %v6725_v31 = vsel %vm661_vm4, %v9776_v60, 0.0 }
0x3bfa   :  { %6726 = vadd.xlane.f32.xlu0 %v6725_v31 }
0x3c07   :  { %6887 = vrot.lane.b32.xlu1 %v11352_v5, %s10068_s6 }
0x3c10   :  { %6965 = vrot.lane.b32.xlu0 %v11357_v33, %s10068_s6 }
0x3c83   :  { %v6724_v26 = vpop.xlane.xlu1 %6723 }
0x3c84   :  { %9777 = vrcp.f32 %v6724_v26 }
0x3c87   :  { %v6727_v1 = vpop.xlane.xlu0 %6726  ;;  %v6888_v40 = vpop.permute.xlu1 %6887 }
0x3c88   :  { %9779 = vrcp.f32 %v6727_v1 }
0x3c8b   :  { %v6966_v13 = vpop.permute.xlu0 %6965 }
0x3c8e   :  { %v9778_v44 = vpop.eup %9777 }
0x3c8f   :  { %v6730_v16 = vmul.f32 %v9778_v44, %v9774_v10 }
0x3c91   :  { %9199 = vmatmul.mubr.msk.f32.vlgmr.msra.gmra.mrb[70].mxu0 %vm684_vm6, %v6730_v16 }
0x3c92   :  { %v9780_v19 = vpop.eup %9779  ;;  %9207 = vmatpush3.xpose.msk.msra.mxu0 %vm508_vm3, %v11080_v49  ;;  %9208 = vmatprep.mubr.msk.f32.mxu0 %vm10064_vm0, %v11592_v17 }
0x3c93   :  { %v6731_v61 = vmul.f32 %v9780_v19, %v9776_v60  ;;  %9216 = vmatprep.subr.mxu0 %v11592_v17 }
0x3c95   :  { %v6878_v11 = vrot.slane %v6731_v61, 7  ;;  %9204 = vmatmul.mubr.msk.f32.vlgmr.msra.gmra.mrb[72].mxu1 %vm684_vm6, %v6731_v61  ;;  %9209 = vmatmul.mubr.msk.f32.vlgmr.msra.gmra.mrb[72].mxu0 %vm508_vm3, %v6888_v40 }
0x3c96   :  { %9212 = vmatpush3.xpose.msk.msra.mxu1 %vm508_vm3, %v11063_v58  ;;  %9213 = vmatprep.mubr.msk.f32.mxu1 %vm10064_vm0, %v11592_v17  ;;  %v11604_v58 = vld [vmem:[#allocation23_spill] sm:$0xff] }
0x3c97   :  { %v6879_v49 = vsel %vm839_vm7, %v6878_v11, %v6730_v16  ;;  %9217 = vmatpush3.msk.msra.mxu0 %vm688_vm5, %v11095_v57  ;;  %9221 = vmatprep.subr.mxu1 %v11592_v17 }
0x3c98   :  { %8469 = vst.msk [vmem:[%s11569_s15 + $0x18] sm:$0x3] %vm842_vm8, %v6879_v49  ;;  %9218 = vmatprep.mubr.msk.f32.mxu0 %vm10064_vm0, %v11592_v17  ;;  %9226 = vmatprep.subr.mxu0 %v11592_v17  ;;  %v11605_v49 = vld [vmem:[#allocation26_spill] sm:$0xff] }
0x3c99   :  { %9214 = vmatmul.mubr.msk.f32.vlgmr.msra.gmra.mrb[74].mxu1 %vm508_vm3, %v6966_v13 }
0x3c9a   :  { %9222 = vmatpush3.msk.msra.mxu1 %vm688_vm5, %v11604_v58  ;;  %9223 = vmatprep.mubr.msk.f32.mxu1 %vm10064_vm0, %v11592_v17 }
0x3c9b   :  { %9231 = vmatprep.subr.mxu1 %v11592_v17 }
0x3d64   :  { %v6801_v57 = vpop.f32.mrb[70].mxu0 }
0x3d65   :  { %v9200_v52 = vpop.f32.mrb[71].mxu0 }
0x3d66   :  { %v11606_v52 = vld [vmem:[#allocation24_spill] sm:$0xff] }
0x3d68   :  { %v6874_v38 = vpop.f32.mrb[72].mxu1  ;;  %v6957_v51 = vpop.f32.mrb[72].mxu0 }
0x3d69   :  { %v7862_v8 = vrot.slane %v6874_v38, 7  ;;  %v7039_v3 = vmul.f32 0.35355338, %v6957_v51  ;;  %v9205_v22 = vpop.f32.mrb[73].mxu1  ;;  %v9210_v32 = vpop.f32.mrb[73].mxu0  ;;  %v11607_v51 = vld [vmem:[#allocation28_spill] sm:$0xff] }
0x3d6b   :  { %v7041_v45 = vsel %vm661_vm4, %v7039_v3, -inf  ;;  %v11392_v39 = vsel %vm839_vm7, %v7862_v8, %v6801_v57 }
0x3d6c   :  { %7042 = vmax.xlane.f32.xlu0 %v7041_v45  ;;  %v7035_v28 = vpop.f32.mrb[74].mxu1 }
0x3d6d   :  { %v7040_v34 = vmul.f32 0.35355338, %v7035_v28  ;;  %v9215_v12 = vpop.f32.mrb[75].mxu1 }
0x3d6f   :  { %v7044_v48 = vsel %vm661_vm4, %v7040_v34, -inf }
0x3d70   :  { %7045 = vmax.xlane.f32.xlu1 %v7044_v48 }
0x3df9   :  { %v7043_v0 = vpop.xlane.xlu0 %7042 }
0x3dfa   :  { %v7047_v59 = vsub.f32 %v7039_v3, %v7043_v0  ;;  %v11608_v3 = vld [vmem:[#allocation27_spill] sm:$0xff] }
0x3dfc   :  { %v7049_v15 = vmul.f32 1.442695, %v7047_v59 }
0x3dfd   :  { %v7046_v10 = vpop.xlane.xlu1 %7045 }
0x3dfe   :  { %9781 = vpow2.f32 %v7049_v15  ;;  %v7048_v56 = vsub.f32 %v7040_v34, %v7046_v10 }
0x3e00   :  { %v7051_v60 = vmul.f32 1.442695, %v7048_v56 }
0x3e02   :  { %9783 = vpow2.f32 %v7051_v60 }
0x3e08   :  { %v9782_v31 = vpop.eup %9781 }
0x3e09   :  { %v7053_v26 = vsel %vm661_vm4, %v9782_v31, 0.0 }
0x3e0a   :  { %7054 = vadd.xlane.f32.xlu1 %v7053_v26 }
0x3e0c   :  { %v9784_v1 = vpop.eup %9783 }
0x3e0d   :  { %v7056_v44 = vsel %vm661_vm4, %v9784_v1, 0.0 }
0x3e0e   :  { %7057 = vadd.xlane.f32.xlu0 %v7056_v44 }
0x3e1b   :  { %7214 = vrot.lane.b32.xlu1 %v11352_v5, %s10069_s4 }
0x3e24   :  { %7288 = vrot.lane.b32.xlu0 %v11357_v33, %s10069_s4 }
0x3e97   :  { %v7055_v16 = vpop.xlane.xlu1 %7054 }
0x3e98   :  { %9785 = vrcp.f32 %v7055_v16 }
0x3e9b   :  { %v7058_v19 = vpop.xlane.xlu0 %7057  ;;  %v7215_v58 = vpop.permute.xlu1 %7214 }
0x3e9c   :  { %9787 = vrcp.f32 %v7058_v19 }
0x3e9f   :  { %v7289_v8 = vpop.permute.xlu0 %7288 }
0x3ea2   :  { %v9786_v61 = vpop.eup %9785 }
0x3ea3   :  { %v7061_v40 = vmul.f32 %v9786_v61, %v9782_v31 }
0x3ea5   :  { %9219 = vmatmul.mubr.msk.f32.vlgmr.msra.gmra.mrb[74].mxu0 %vm684_vm6, %v7061_v40 }
0x3ea6   :  { %v9788_v11 = vpop.eup %9787  ;;  %9227 = vmatpush3.xpose.msk.msra.mxu0 %vm508_vm3, %v11605_v49  ;;  %9228 = vmatprep.mubr.msk.f32.mxu0 %vm10064_vm0, %v11592_v17 }
0x3ea7   :  { %v7062_v13 = vmul.f32 %v9788_v11, %v9784_v1  ;;  %9236 = vmatprep.subr.mxu0 %v11592_v17 }
0x3ea9   :  { %v7209_v57 = vrot.slane %v7062_v13, 7  ;;  %9224 = vmatmul.mubr.msk.f32.vlgmr.msra.gmra.mrb[76].mxu1 %vm684_vm6, %v7062_v13  ;;  %9229 = vmatmul.mubr.msk.f32.vlgmr.msra.gmra.mrb[76].mxu0 %vm508_vm3, %v7215_v58 }
0x3eaa   :  { %9232 = vmatpush3.xpose.msk.msra.mxu1 %vm508_vm3, %v11606_v52  ;;  %9233 = vmatprep.mubr.msk.f32.mxu1 %vm10064_vm0, %v11592_v17 }
0x3eab   :  { %v7210_v38 = vsel %vm839_vm7, %v7209_v57, %v7061_v40  ;;  %9237 = vmatpush3.msk.msra.mxu0 %vm688_vm5, %v11607_v51  ;;  %9241 = vmatprep.subr.mxu1 %v11592_v17 }
0x3eac   :  { %8478 = vst.msk [vmem:[%s11569_s15 + $0x1a] sm:$0x3] %vm842_vm8, %v7210_v38  ;;  %9238 = vmatprep.mubr.msk.f32.mxu0 %vm10064_vm0, %v11592_v17  ;;  %9246 = vmatprep.subr.mxu0 %v11592_v17 }
0x3ead   :  { %9234 = vmatmul.mubr.msk.f32.vlgmr.msra.gmra.mrb[78].mxu1 %vm508_vm3, %v7289_v8 }
0x3eae   :  { %9242 = vmatpush3.msk.msra.mxu1 %vm688_vm5, %v11608_v3  ;;  %9243 = vmatprep.mubr.msk.f32.mxu1 %vm10064_vm0, %v11592_v17  ;;  %v11609_v3 = vld [vmem:[#allocation29_spill] sm:$0xff] }
0x3eaf   :  { %9251 = vmatprep.subr.mxu1 %v11592_v17 }
0x3f78   :  { %v7132_v22 = vpop.f32.mrb[74].mxu0 }
0x3f79   :  { %v9220_v32 = vpop.f32.mrb[75].mxu0 }
0x3f7c   :  { %v7205_v45 = vpop.f32.mrb[76].mxu1  ;;  %v7284_v28 = vpop.f32.mrb[76].mxu0 }
0x3f7d   :  { %v7867_v34 = vrot.slane %v7205_v45, 7  ;;  %v7362_v12 = vmul.f32 0.35355338, %v7284_v28  ;;  %v9225_v48 = vpop.f32.mrb[77].mxu1  ;;  %v9230_v0 = vpop.f32.mrb[77].mxu0  ;;  %v11611_v45 = vld [vmem:[#allocation30_spill] sm:$0xff] }
0x3f7e   :  { %v11612_v28 = vld [vmem:[#allocation25_spill] sm:$0xff] }
0x3f7f   :  { %v7364_v59 = vsel %vm661_vm4, %v7362_v12, -inf  ;;  %v11432_v15 = vsel %vm839_vm7, %v7867_v34, %v7132_v22  ;;  %v11610_v22 = vld [vmem:[#allocation31_spill] sm:$0xff] }
0x3f80   :  { %7365 = vmax.xlane.f32.xlu0 %v7364_v59  ;;  %v7358_v10 = vpop.f32.mrb[78].mxu1 }
0x3f81   :  { %v7363_v56 = vmul.f32 0.35355338, %v7358_v10  ;;  %v9235_v60 = vpop.f32.mrb[79].mxu1 }
0x3f83   :  { %v7367_v31 = vsel %vm661_vm4, %v7363_v56, -inf }
0x3f84   :  { %7368 = vmax.xlane.f32.xlu1 %v7367_v31 }
0x400d   :  { %v7366_v26 = vpop.xlane.xlu0 %7365 }
0x400e   :  { %v7370_v1 = vsub.f32 %v7362_v12, %v7366_v26 }
0x4010   :  { %v7372_v44 = vmul.f32 1.442695, %v7370_v1 }
0x4011   :  { %v7369_v16 = vpop.xlane.xlu1 %7368 }
0x4012   :  { %9789 = vpow2.f32 %v7372_v44  ;;  %v7371_v19 = vsub.f32 %v7363_v56, %v7369_v16 }
0x4014   :  { %v7374_v61 = vmul.f32 1.442695, %v7371_v19 }
0x4016   :  { %9791 = vpow2.f32 %v7374_v61 }
0x401c   :  { %v9790_v40 = vpop.eup %9789 }
0x401d   :  { %v7376_v11 = vsel %vm661_vm4, %v9790_v40, 0.0 }
0x401e   :  { %7377 = vadd.xlane.f32.xlu1 %v7376_v11 }
0x4020   :  { %v9792_v49 = vpop.eup %9791 }
0x4021   :  { %v7379_v13 = vsel %vm661_vm4, %v9792_v49, 0.0 }
0x4022   :  { %7380 = vadd.xlane.f32.xlu0 %v7379_v13 }
0x402f   :  { %7537 = vrot.lane.b32.xlu1 %v11352_v5, %s10070_s20 }
0x4038   :  { %7611 = vrot.lane.b32.xlu0 %v11357_v33, %s10070_s20 }
0x40ab   :  { %v7378_v58 = vpop.xlane.xlu1 %7377 }
0x40ac   :  { %9793 = vrcp.f32 %v7378_v58 }
0x40af   :  { %v7381_v57 = vpop.xlane.xlu0 %7380  ;;  %v7538_v5 = vpop.permute.xlu1 %7537 }
0x40b0   :  { %9795 = vrcp.f32 %v7381_v57 }
0x40b3   :  { %v7612_v32 = vpop.permute.xlu0 %7611 }
0x40b6   :  { %v9794_v52 = vpop.eup %9793 }
0x40b7   :  { %v7384_v38 = vmul.f32 %v9794_v52, %v9790_v40 }
0x40b9   :  { %9239 = vmatmul.mubr.msk.f32.vlgmr.msra.gmra.mrb[78].mxu0 %vm684_vm6, %v7384_v38 }
0x40ba   :  { %v9796_v51 = vpop.eup %9795  ;;  %9247 = vmatpush3.xpose.msk.msra.mxu0 %vm508_vm3, %v11188_v62  ;;  %9248 = vmatprep.mubr.msk.f32.mxu0 %vm10064_vm0, %v11592_v17 }
0x40bb   :  { %v7385_v8 = vmul.f32 %v9796_v51, %v9792_v49  ;;  %9256 = vmatprep.subr.mxu0 %v11592_v17 }
0x40bd   :  { %v7532_v33 = vrot.slane %v7385_v8, 7  ;;  %9244 = vmatmul.mubr.msk.f32.vlgmr.msra.gmra.mrb[80].mxu1 %vm684_vm6, %v7385_v8  ;;  %9249 = vmatmul.mubr.msk.f32.vlgmr.msra.gmra.mrb[80].mxu0 %vm508_vm3, %v7538_v5 }
0x40be   :  { %9252 = vmatpush3.xpose.msk.msra.mxu1 %vm508_vm3, %v11609_v3  ;;  %9253 = vmatprep.mubr.msk.f32.mxu1 %vm10064_vm0, %v11592_v17 }
0x40bf   :  { %v7533_v62 = vsel %vm839_vm7, %v7532_v33, %v7384_v38  ;;  %9257 = vmatpush3.msk.msra.mxu0 %vm688_vm5, %v11610_v22  ;;  %9258 = vmatprep.mubr.msk.f32.mxu0 %vm10064_vm0, %v11592_v17 }
0x40c0   :  { %8487 = vst.msk [vmem:[%s11569_s15 + $0x1c] sm:$0x3] %vm842_vm8, %v7533_v62  ;;  %9261 = vmatprep.subr.mxu1 %v11592_v17  ;;  %9506 = vmatprep.subr.bf16.mxu0 %v11593_v6 }
0x40c1   :  { %9254 = vmatmul.mubr.msk.f32.vlgmr.msra.gmra.mrb[82].mxu1 %vm508_vm3, %v7612_v32 }
0x40c2   :  { %9262 = vmatpush3.msk.msra.mxu1 %vm688_vm5, %v11611_v45  ;;  %9263 = vmatprep.mubr.msk.f32.mxu1 %vm10064_vm0, %v11592_v17 }
0x40c3   :  { %9513 = vmatprep.subr.bf16.mxu1 %v11612_v28 }
0x418c   :  { %v7455_v34 = vpop.f32.mrb[78].mxu0 }
0x418d   :  { %v9240_v12 = vpop.f32.mrb[79].mxu0 }
0x4190   :  { %v7528_v48 = vpop.f32.mrb[80].mxu1  ;;  %v7607_v0 = vpop.f32.mrb[80].mxu0 }
0x4191   :  { %v7874_v59 = vrot.slane %v7528_v48, 7  ;;  %v7685_v10 = vmul.f32 0.35355338, %v7607_v0  ;;  %v9245_v56 = vpop.f32.mrb[81].mxu1  ;;  %v9250_v60 = vpop.f32.mrb[81].mxu0 }
0x4193   :  { %v7687_v31 = vsel %vm661_vm4, %v7685_v10, -inf  ;;  %v7875_v26 = vsel %vm839_vm7, %v7874_v59, %v7455_v34 }
0x4194   :  { %7688 = vmax.xlane.f32.xlu0 %v7687_v31  ;;  %v7681_v1 = vpop.f32.mrb[82].mxu1 }
0x4195   :  { %v7686_v44 = vmul.f32 0.35355338, %v7681_v1  ;;  %v9255_v16 = vpop.f32.mrb[83].mxu1 }
0x4197   :  { %v7690_v19 = vsel %vm661_vm4, %v7686_v44, -inf }
0x4198   :  { %7691 = vmax.xlane.f32.xlu1 %v7690_v19 }
0x4221   :  { %v7689_v61 = vpop.xlane.xlu0 %7688 }
0x4222   :  { %v7693_v40 = vsub.f32 %v7685_v10, %v7689_v61 }
0x4224   :  { %v7695_v11 = vmul.f32 1.442695, %v7693_v40 }
0x4225   :  { %v7692_v49 = vpop.xlane.xlu1 %7691 }
0x4226   :  { %9797 = vpow2.f32 %v7695_v11  ;;  %v7694_v13 = vsub.f32 %v7686_v44, %v7692_v49 }
0x4228   :  { %v7697_v58 = vmul.f32 1.442695, %v7694_v13 }
0x422a   :  { %9799 = vpow2.f32 %v7697_v58 }
0x4230   :  { %v9798_v57 = vpop.eup %9797 }
0x4231   :  { %v7699_v52 = vsel %vm661_vm4, %v9798_v57, 0.0 }
0x4232   :  { %7700 = vadd.xlane.f32.xlu1 %v7699_v52 }
0x4234   :  { %v9800_v38 = vpop.eup %9799 }
0x4235   :  { %v7702_v51 = vsel %vm661_vm4, %v9800_v38, 0.0 }
0x4236   :  { %7703 = vadd.xlane.f32.xlu0 %v7702_v51 }
0x4243   :  { %7876 = vrot.lane.b32.xlu1 %v7875_v26, %s10061_s28 }
0x424c   :  { %7869 = vrot.lane.b32.xlu0 %v11432_v15, %s10051_s29 }
0x42bf   :  { %v7701_v8 = vpop.xlane.xlu1 %7700 }
0x42c0   :  { %9801 = vrcp.f32 %v7701_v8 }
0x42c3   :  { %v7704_v5 = vpop.xlane.xlu0 %7703  ;;  %v7877_v12 = vpop.permute.xlu1 %7876 }
0x42c4   :  { %9803 = vrcp.f32 %v7704_v5 }
0x42c7   :  { %v7870_v34 = vpop.permute.xlu0 %7869 }
0x42c8   :  { %v7886_v48 = vsel %vm508_vm3, %v11392_v39, %v7870_v34 }
0x42c9   :  { %v7887_v0 = vsel %vm305_vm1, %v7886_v48, %v7877_v12 }
0x42ca   :  { %v9802_v33 = vpop.eup %9801 }
0x42cb   :  { %v7707_v3 = vmul.f32 %v9802_v33, %v9798_v57 }
0x42cd   :  { %9259 = vmatmul.mubr.msk.f32.vlgmr.msra.gmra.mrb[82].mxu0 %vm684_vm6, %v7707_v3 }
0x42ce   :  { %v9804_v62 = vpop.eup %9803  ;;  %9508 = vmatpush3.bf16.msra.mxu0 %v10549_v23  ;;  %9274 = vmatprep.mubr.msk.f32.mxu0 %vm10064_vm0, %v11592_v17 }
0x42cf   :  { %v7708_v22 = vmul.f32 %v9804_v62, %v9800_v38  ;;  %9509 = vmatprep.subr.bf16.mxu0 %v11593_v6 }
0x42d1   :  { %v7855_v32 = vrot.slane %v7708_v22, 7  ;;  %9264 = vmatmul.mubr.msk.f32.vlgmr.msra.gmra.mrb[84].mxu1 %vm684_vm6, %v7708_v22 }
0x42d2   :  { %9511 = vmatpush3.bf16.msra.mxu0 %v10552_v25  ;;  %9515 = vmatpush1.bf16.msra.mxu1 %v10559_v41 }
0x42d3   :  { %v7856_v15 = vsel %vm839_vm7, %v7855_v32, %v7707_v3  ;;  %9517 = vmatprep.subr.bf16.mxu1 %v10561_v42  ;;  %8029 = vmatprep.mubr.f32.mxu1 %v11592_v17 }
0x42d4   :  { %8496 = vst.msk [vmem:[%s11569_s15 + $0x1e] sm:$0x3] %vm842_vm8, %v7856_v15  ;;  %9544 = vmatprep.subr.bf16.mxu0 %v11593_v6  ;;  %s10072_s15 = smov [#allocation16]  }
0x42d6   :  { %9519 = vmatpush1.bf16.msra.mxu1 %v10565_v47 }
0x42d7   :  { %9521 = vmatprep.subr.bf16.mxu1 %v10584_v9 }
0x43a0   :  { %v7778_v23 = vpop.f32.mrb[82].mxu0 }
0x43a1   :  { %v9260_v25 = vpop.f32.mrb[83].mxu0 }
0x43a4   :  { %v7851_v41 = vpop.f32.mrb[84].mxu1 }
0x43a5   :  { %v7881_v45 = vrot.slane %v7851_v41, 7  ;;  %v9265_v28 = vpop.f32.mrb[85].mxu1 }
0x43a7   :  { %v7882_v42 = vsel %vm839_vm7, %v7881_v45, %v7778_v23 }
0x43a8   :  { %7883 = vrot.lane.b32.xlu1 %v7882_v42, %s10071_s18 }
0x441a   :  { %v7884_v59 = vpop.permute.xlu1 %7883 }
0x441b   :  { %v7888_v47 = vsel %vm1885_vm9, %v7887_v0, %v7884_v59 }
0x441c   :  { %9275 = vmatmul.mubr.msk.f32.vlgmr.msra.gmra.mrb[84].mxu0 %vm231_vm2, %v7888_v47 }
0x441d   :  { %9546 = vmatpush3.bf16.msra.mxu0 %v10672_v29  ;;  %9293 = vmatprep.mubr.msk.f32.mxu0 %vm10064_vm0, %v11592_v17 }
0x441e   :  { %9547 = vmatprep.subr.bf16.mxu0 %v11593_v6 }
0x4421   :  { %9549 = vmatpush3.bf16.msra.mxu0 %v10678_v37 }
0x4422   :  { %9550 = vmatprep.subr.bf16.mxu0 %v11593_v6 }
0x4425   :  { %9552 = vmatpush3.bf16.msra.mxu0 %v10688_v50 }
0x4426   :  { %9553 = vmatprep.subr.bf16.mxu0 %v11593_v6 }
0x4429   :  { %9555 = vmatpush3.bf16.msra.mxu0 %v10698_v63 }
0x44ef   :  { %v7958_v9 = vpop.f32.mrb[84].mxu0 }
0x44f0   :  { %v9276_v39 = vpop.f32.mrb[85].mxu0  ;;  %8498 = vmatmul.mubr.msk.f32.vlgmr.msra.gmra.mrb[86].mxu1 %vm231_vm2, %v7958_v9 }
0x44f1   :  { %9523 = vmatpush1.bf16.msra.mxu1 %v10599_v21  ;;  %8100 = vmatprep.mubr.f32.mxu1 %v11592_v17 }
0x44f2   :  { %9525 = vmatprep.subr.bf16.mxu1 %v10601_v24 }
0x44f5   :  { %9527 = vmatpush1.bf16.msra.mxu1 %v10611_v43 }
0x44f6   :  { %9529 = vmatprep.subr.bf16.mxu1 %v10615_v46 }
0x44f8   :  { %8499 = vmatmul.mubr.msk.f32.vlgmr.msra.gmra.mrb[86].mxu1 %vm231_vm2, %v11323_v7 }
0x44f9   :  { %9531 = vmatpush1.bf16.msra.mxu1 %v10618_v53  ;;  %8171 = vmatprep.mubr.f32.mxu1 %v11592_v17 }
0x44fa   :  { %9533 = vmatprep.subr.bf16.mxu1 %v10621_v54 }
0x44fd   :  { %9535 = vmatpush1.bf16.msra.mxu1 %v10626_v4 }
0x44fe   :  { %9537 = vmatprep.subr.bf16.mxu1 %v10630_v36 }
0x4501   :  { %9539 = vmatpush1.bf16.msra.mxu1 %v10633_v18 }
0x4502   :  { %9541 = vmatprep.subr.bf16.mxu1 %v10636_v20 }
0x4505   :  { %9543 = vmatpush1.bf16.msra.mxu1 %v10639_v30 }
0x4508   :  { %8500 = vmatmul.mubr.msk.f32.vlgmr.msra.gmra.mrb[86].mxu1 %vm2105_vm10, %v11286_v2 }
0x45db   :  { %v8173_v21 = vpop.f32.mrb[86].mxu1 }
0x45dc   :  { %v8180_v24 = vadd.f32 %v8173_v21, %v10655_v35  ;;  %v8175_v43 = vpop.f32.mrb[87].mxu1 }
0x45dd   :  { %v8181_v53 = vadd.f32 %v8175_v43, %v10659_v55 }
0x45de   :  { %v8501_v46 = vmul.f32 -1.442695, %v8180_v24 }
0x45df   :  { %v8502_v30 = vmul.f32 -1.442695, %v8181_v53 }
0x45e0   :  { %9805 = vpow2.f32 %v8501_v46 }
0x45e1   :  { %9807 = vtanh.f32 %v8181_v53 }
0x45ea   :  { %v9806_v54 = vpop.eup %9805 }
0x45eb   :  { %v8185_v4 = vadd.f32 1.0, %v9806_v54  ;;  %v9808_v36 = vpop.eup %9807 }
0x45ed   :  { %9809 = vrcp.f32 %v8185_v4 }
0x45ee   :  { %9811 = vpow2.f32 %v8502_v30 }
0x45f7   :  { %v9810_v18 = vpop.eup %9809 }
0x45f8   :  { %v8196_v20 = vmul.f32 %v9810_v18, %v9808_v36  ;;  %v9812_v29 = vpop.eup %9811  ;;  %v8195_v35 = vmul.f32 %v9810_v18, %v11282_v14 }
0x45f9   :  { %v8192_v37 = vadd.f32 1.0, %v9812_v29 }
0x45fa   :  { %8198 = vrot.lane.b32.xlu0 %v8196_v20, %s10055_s7 }
0x45fb   :  { %9813 = vrcp.f32 %v8192_v37 }
0x4605   :  { %v9814_v55 = vpop.eup %9813 }
0x466c   :  { %v8199_v50 = vpop.permute.xlu0 %8198 }
0x466d   :  { %v8201_v63 = vadd.f32 %v8199_v50, %v8195_v35 }
0x466f   :  { %9815 = vtanh.f32 %v8201_v63 }
0x4679   :  { %v9816_v17 = vpop.eup %9815 }
0x467a   :  { %v8203_v6 = vmul.f32 %v9816_v17, %v9814_v55 }
0x467c   :  { %8205 = vrot.lane.b32.xlu1 %v8203_v6, %s10055_s7  ;;  %s8297_s7 = sshll.u32 %s10072_s15, 4  ;;  %s8298_s7 = int_to_ptr.vmem [resolvable:$true] %s8297_s7 }
0x467d   :  { %s10015_s18 = scalar_lea.vmem %s8298_s7, 128  ;;  %p10020_p9 = scmp.lt.s32.totalorder %s8298_s7, %s8298_s7 }
0x467e   :  { %p10016_p8 = scmp.ne.s32.totalorder %s8298_s7, %s10015_s18  ;;  %p10021_p10 = scmp.lt.s32.totalorder %s10015_s18, %s10015_s18 }
0x4680   :  { %p10022_p11 = por %p10021_p10, %p10020_p9 }
0x4682   :  { %p10023_p12 = pnand %p10022_p11, %p10016_p8 }
0x46ee   :  { %v8206_v2 = vpop.permute.xlu1 %8205 }
0x46ef   :  { %9294 = vmatmul.mubr.msk.f32.vlgmr.msra.gmra.mrb[86].mxu0 %vm2105_vm10, %v8206_v2 }
0x47c2   :  { %v8275_v7 = vpop.f32.mrb[86].mxu0 }
0x47c3   :  { %v8276_v10 = vadd.f32 %v11305_v27, %v8275_v7  ;;  %v9295_v56 = vpop.f32.mrb[87].mxu0 }
0x47c5   :  { %v8279_v60 = vsel %vm2297_vm11, %v8276_v10, -inf }
0x47c6   :  { %8280 = vmax.xlane.f32.xlu0 %v8279_v60 }
0x4853   :  { %v8281_v14 = vpop.xlane.xlu0 %8280 }
0x4854   :  { %v8282_v31 = vsub.f32 %v8276_v10, %v8281_v14 }
0x4856   :  { %v8283_v26 = vmul.f32 1.442695, %v8282_v31 }
0x4858   :  { %9817 = vpow2.f32 %v8283_v26 }
0x4862   :  { %v9818_v1 = vpop.eup %9817 }
0x4863   :  { %v8285_v44 = vsel %vm2297_vm11, %v9818_v1, 0.0 }
0x4864   :  { %8286 = vadd.xlane.f32.xlu1 %v8285_v44 }
0x48f1   :  { %v8287_v16 = vpop.xlane.xlu1 %8286 }
0x48f2   :  { %9819 = vrcp.f32 %v8287_v16 }
0x48fc   :  { %v9820_v19 = vpop.eup %9819 }
0x48fd   :  { %v8289_v61 = vmul.f32 %v9820_v19, %v9818_v1 }
0x48ff   :  { %8291 = vst.msk [vmem:[#allocation16 + $0x6] sm:$0x3] %vm2297_vm11, %v8289_v61 }
0x4900   :  { %10026 = shalt.err (!%p10023_p12)
}
0x4901   :  { %s11613_s25 = sld [smem:[#allocation32_spill]] }
0x4907   :  { %s10027_s12 = scalar_lea.hbm %s11613_s25, 128 }
0x4908   :  { %p10028_p13 = scmp.ne.s32.totalorder %s11613_s25, %s10027_s12  ;;  %p10031_p0 = scmp.lt.u32.totalorder %s10027_s12, %s11613_s25 }
0x490a   :  { %p10033_p1 = pnand %p10031_p0, %p10028_p13 }
0x490c   :  { %10036 = shalt.err (!%p10033_p1)
}
0x490d   :  { %s10073_s19 = smov 2  }
0x490e   :  { %8303 = dma.vmem_to_hbm [thread:$0]  %s8298_s7, 128, %s11613_s25, [#allocation4], %s10066_s0, %s10066_s0, %s10073_s19  }
0x490f   :  { %10047 = dma.done.wait [#allocation4], 128  }
0x4910   :  { %10048 = vsyncadd [#allocation4], 4294967168 }
0x4911   :  { %8311 = vsyncpa [#allocation3], 1 }
0x4912   :  { %8312 = vsyncpa [#allocation6], 1 }
0x4913   :  { %8313 = vsyncpa [#allocation9], 1 }
0x4914   :  { %8314 = vsyncpa [#allocation12], 1 }
0x4915   :  { %8315 = vsyncpa [#allocation15], 1 }
0x4916   :  { %8316 = vsyncpa [#allocation4], 1 }

</bundles_post_ra>
